<compile_context>
chip_gen: v5e
topology: v5e:2x2
jax: 0.10.0
libtpu: 0.0.40
codegen_flags: <defaults>
</compile_context>

<pallas_src>
import jax
import jax.numpy as jnp
from jax.experimental import pallas as pl
from jax.experimental.pallas import tpu as pltpu


def _sigmoid(x):
    # exp lives on the EUP; keep the divide explicit (no reliance on a logistic
    # lowering rule).  Swap to pl.reciprocal(..., approx=True) if the EUP slot
    # ever saturates (v5e).
    return 1.0 / (1.0 + jnp.exp(-x))


def _lstm_layer_kernel(x_ref, wx_ref, wh_ref, b_ref, h_ref, c_ref, zx_ref):
    # x_ref : (Tt, Dx, Bt) bf16   time block of inputs, batch on lanes
    # wx_ref: (4H, Dx)     bf16   packed gate weights, x part of cell_input
    # wh_ref: (4H, H)      bf16   packed gate weights, recurrent part
    # b_ref : (H, Bt)      f32    input_unit bias, pre-broadcast over lanes
    # h_ref : (H, Bt)      f32    output block, resident across time (h carry)
    # c_ref : (H, Bt)      f32    VMEM scratch, cell-state carry
    # zx_ref: (Tt, 4H, Bt) f32    VMEM scratch, hoisted Wx @ x_t pre-activations
    tb = pl.program_id(1)

    @pl.when(tb == 0)
    def _():
        h_ref[...] = jnp.zeros_like(h_ref)
        c_ref[...] = jnp.zeros_like(c_ref)

    H = h_ref.shape[0]
    Tt = x_ref.shape[0]

    # ---- Phase 1: h-independent input projection, off the sequential chain ----
    for t in range(Tt):
        zx_ref[t] = jnp.dot(wx_ref[...], x_ref[t],
                            preferred_element_type=jnp.float32)       # (4H, Bt)

    # ---- Phase 2: sequential recurrence (one small MXU matmul per step) -------
    for t in range(Tt):
        h_bf = h_ref[...].astype(jnp.bfloat16)
        z = zx_ref[t] + jnp.dot(wh_ref[...], h_bf,
                                preferred_element_type=jnp.float32)   # (4H, Bt)

        input_act = jnp.maximum(z[0:H, :] + b_ref[...], 0.0)   # ReLU(Linear+bias)
        remember = _sigmoid(z[H:2 * H, :])
        forget = _sigmoid(z[2 * H:3 * H, :])
        out_gate = _sigmoid(z[3 * H:4 * H, :])

        c_new = c_ref[...] * forget + input_act * remember
        c_ref[...] = c_new
        h_ref[...] = jnp.tanh(c_new) * out_gate


def _pick_t_tile(T, cap=8):
    """Largest divisor of T that is <= cap (time block = inner unrolled loop)."""
    for tt in range(min(T, cap), 0, -1):
        if T % tt == 0:
            return tt
    return 1


def lstm_layer_forward(x_batch, wx, wh, b, *, b_tile=128, t_tile=None):
    """x_batch: (T, B, Dx) f32; wx: (4H, Dx); wh: (4H, H); b: (H,). Returns (B, H) f32."""
    T, B, Dx = x_batch.shape
    H4 = wx.shape[0]
    H = H4 // 4

    if t_tile is None:
        t_tile = _pick_t_tile(T)
    assert T % t_tile == 0, "time block must divide sequence length"
    n_tb = T // t_tile

    # Lane-dense batch tiles: pad B up to a multiple of b_tile (128 lanes).
    B_pad = ((B + b_tile - 1) // b_tile) * b_tile
    nb = B_pad // b_tile

    # Batch on lanes: stream x as (T, Dx, B_pad) bf16 slabs.
    # (In a real pipeline the producer should emit (T, Dx, B) directly; here the
    #  transpose is fused into the unavoidable pad + bf16-cast pass over x.)
    x_tb = jnp.transpose(x_batch, (0, 2, 1))                  # (T, Dx, B)
    if B_pad != B:
        x_tb = jnp.pad(x_tb, ((0, 0), (0, 0), (0, B_pad - B)))
    x_tb = x_tb.astype(jnp.bfloat16)

    wx = wx.astype(jnp.bfloat16)
    wh = wh.astype(jnp.bfloat16)
    # Pre-broadcast the input_unit bias once; avoids re-emitting a
    # broadcast_in_dim inside the unrolled per-step loop.
    b_bc = jnp.broadcast_to(jnp.reshape(b, (H, 1)).astype(jnp.float32),
                            (H, b_tile))

    h_t = pl.pallas_call(
        _lstm_layer_kernel,
        out_shape=jax.ShapeDtypeStruct((H, B_pad), jnp.float32),
        grid_spec=pltpu.PrefetchScalarGridSpec(
            num_scalar_prefetch=0,
            grid=(nb, n_tb),
            in_specs=[
                # time-blocked x slab; batch tile picked by the parallel axis
                pl.BlockSpec((t_tile, Dx, b_tile), lambda bi, tb: (tb, 0, bi)),
                # weights / bias resident across the whole grid
                pl.BlockSpec((H4, Dx), lambda bi, tb: (0, 0)),
                pl.BlockSpec((H4, H), lambda bi, tb: (0, 0)),
                pl.BlockSpec((H, b_tile), lambda bi, tb: (0, 0)),
            ],
            # same block for every time block -> stays resident in VMEM and
            # doubles as the hidden-state carry; written back once per batch tile.
            out_specs=pl.BlockSpec((H, b_tile), lambda bi, tb: (0, bi)),
            scratch_shapes=[
                pltpu.VMEM((H, b_tile), jnp.float32),           # c carry
                pltpu.VMEM((t_tile, H4, b_tile), jnp.float32),  # hoisted Zx block
            ],
        ),
        compiler_params=pltpu.CompilerParams(
            dimension_semantics=("parallel", "arbitrary"),
            vmem_limit_bytes=64 * 1024 * 1024),
    )(x_tb, wx, wh, b_bc)
    return h_t[:, :B].T   # (B, H), matching the PyTorch layer output


def _pack_weights(W_i, b_i, W_r, W_f, W_o, input_features):
    """Each W_*: (F, H) with F = Dx + H (column c = cell c's gate weights)."""
    Dx = input_features

    def split(W):
        Wt = W.T                         # (H, F)
        return Wt[:, :Dx], Wt[:, Dx:]    # (H, Dx), (H, H)

    parts = [split(W) for W in (W_i, W_r, W_f, W_o)]
    wx = jnp.concatenate([p[0] for p in parts], axis=0)   # (4H, Dx)
    wh = jnp.concatenate([p[1] for p in parts], axis=0)   # (4H, H)
    return wx, wh, b_i                                     # bias stays f32 (H,)


def _reference(x_batch, W_i, b_i, W_r, W_f, W_o):
    """Pure-JAX f32 reimplementation of LSTMLayer.forward (vectorized over cells)."""
    T, B, _ = x_batch.shape
    H = W_i.shape[1]
    h = jnp.zeros((B, H), jnp.float32)
    c = jnp.zeros((B, H), jnp.float32)
    for t in range(T):
        xc = jnp.concatenate([x_batch[t], h], axis=1)          # (B, F)
        input_act = jnp.maximum(xc @ W_i + b_i[None, :], 0.0)
        remember = jax.nn.sigmoid(xc @ W_r)
        forget = jax.nn.sigmoid(xc @ W_f)
        out_gate = jax.nn.sigmoid(xc @ W_o)
        c = c * forget + input_act * remember
        h = jnp.tanh(c) * out_gate
    return h


if __name__ == "__main__":
    # Small shapes consistent with the module.
    seq_len = 8
    batch = 8
    input_features = 16
    layer_size = 16                  # H = number of cells = hidden size
    F = input_features + layer_size  # total_inputs per cell

    key = jax.random.PRNGKey(0)
    kx, ki, kr, kf, ko, kb = jax.random.split(key, 6)

    # Mimic nn.Linear init: U(-1/sqrt(fan_in), 1/sqrt(fan_in)); one column per cell.
    bound = 1.0 / jnp.sqrt(jnp.float32(F))
    W_i = jax.random.uniform(ki, (F, layer_size), jnp.float32, -bound, bound)
    W_r = jax.random.uniform(kr, (F, layer_size), jnp.float32, -bound, bound)
    W_f = jax.random.uniform(kf, (F, layer_size), jnp.float32, -bound, bound)
    W_o = jax.random.uniform(ko, (F, layer_size), jnp.float32, -bound, bound)
    b_i = jax.random.uniform(kb, (layer_size,), jnp.float32, -bound, bound)

    x_batch = jax.random.normal(kx, (seq_len, batch, input_features), jnp.float32)

    wx, wh, b = _pack_weights(W_i, b_i, W_r, W_f, W_o, input_features)

    out = lstm_layer_forward(x_batch, wx, wh, b)
    out = jax.block_until_ready(out)

    out_ref = _reference(x_batch, W_i, b_i, W_r, W_f, W_o)
    assert out.shape == (batch, layer_size)
    # bf16 MXU operands -> looser tolerance vs the pure-f32 reference.
    assert jnp.allclose(out, out_ref, atol=3e-2, rtol=3e-2), (
        float(jnp.max(jnp.abs(out - out_ref))))

    print("KERNEL_OK")
</pallas_src>

<mosaic_0001>
module attributes {stable_mosaic.version = 11 : i64} {
  func.func @_lstm_layer_kernel(%arg0: i32, %arg1: i32, %arg2: memref<8x16x128xbf16, #tpu.memory_space<vmem>>, %arg3: memref<64x16xbf16, #tpu.memory_space<vmem>>, %arg4: memref<64x16xbf16, #tpu.memory_space<vmem>>, %arg5: memref<16x128xf32, #tpu.memory_space<vmem>>, %arg6: memref<16x128xf32, #tpu.memory_space<vmem>>, %arg7: memref<16x128xf32, #tpu.memory_space<vmem>>, %arg8: memref<8x64x128xf32, #tpu.memory_space<vmem>>) attributes {dimension_semantics = [#tpu.dimension_semantics<parallel>, #tpu.dimension_semantics<arbitrary>], iteration_bounds = array<i64: 1, 1>, scalar_prefetch = 0 : i64, scratch_operands = 2 : i64, tpu.core_type = #tpu.core_type<tc>, window_params = [{transform_indices = @transform_0, window_bounds = array<i64: 8, 16, 128>}, {pipeline_mode = #tpu.pipeline_mode<synchronous>, transform_indices = @transform_1, window_bounds = array<i64: 64, 16>}, {pipeline_mode = #tpu.pipeline_mode<synchronous>, transform_indices = @transform_2, window_bounds = array<i64: 64, 16>}, {pipeline_mode = #tpu.pipeline_mode<synchronous>, transform_indices = @transform_3, window_bounds = array<i64: 16, 128>}, {transform_indices = @transform_4, window_bounds = array<i64: 16, 128>}]} {
    %c0_i32 = arith.constant 0 : i32
    %0 = arith.cmpi eq, %arg1, %c0_i32 : i32
    %1 = arith.extui %0 : i1 to i32
    %c0_i32_0 = arith.constant 0 : i32
    %2 = arith.cmpi ne, %1, %c0_i32_0 : i32
    scf.if %2 {
      %cst_272 = arith.constant 0.000000e+00 : f32
      %411 = vector.broadcast %cst_272 : f32 to vector<16x128xf32>
      %c0_273 = arith.constant 0 : index
      %c0_274 = arith.constant 0 : index
      %412 = vector.load %arg6[%c0_273, %c0_274] : memref<16x128xf32, #tpu.memory_space<vmem>>, vector<16x128xf32>
      tpu.vector_store %arg6[%c0_273, %c0_274], %411 {strides = array<i32>} : memref<16x128xf32, #tpu.memory_space<vmem>>, vector<16x128xf32>,
      %cst_275 = arith.constant 0.000000e+00 : f32
      %413 = vector.broadcast %cst_275 : f32 to vector<16x128xf32>
      %c0_276 = arith.constant 0 : index
      %c0_277 = arith.constant 0 : index
      %414 = vector.load %arg7[%c0_276, %c0_277] : memref<16x128xf32, #tpu.memory_space<vmem>>, vector<16x128xf32>
      tpu.vector_store %arg7[%c0_276, %c0_277], %413 {strides = array<i32>} : memref<16x128xf32, #tpu.memory_space<vmem>>, vector<16x128xf32>,
    } else {
    }
    %c0 = arith.constant 0 : index
    %c0_1 = arith.constant 0 : index
    %3 = vector.load %arg3[%c0, %c0_1] : memref<64x16xbf16, #tpu.memory_space<vmem>>, vector<64x16xbf16>
    %c0_2 = arith.constant 0 : index
    %c0_3 = arith.constant 0 : index
    %c0_4 = arith.constant 0 : index
    %4 = vector.load %arg2[%c0_2, %c0_3, %c0_4] : memref<8x16x128xbf16, #tpu.memory_space<vmem>>, vector<1x16x128xbf16>
    %5 = vector.shape_cast %4 : vector<1x16x128xbf16> to vector<16x128xbf16>
    %cst = arith.constant dense<0.000000e+00> : vector<64x128xf32>
    %6 = tpu.matmul %3, %5, %cst {dimension_numbers = #tpu.dot_dimension_numbers<[1], [0], [0], [1], [0, 0, 1, 1], [], []>} : vector<64x16xbf16>, vector<16x128xbf16>, vector<64x128xf32> -> vector<64x128xf32>
    %c0_5 = arith.constant 0 : index
    %c0_6 = arith.constant 0 : index
    %c0_7 = arith.constant 0 : index
    %7 = vector.load %arg8[%c0_5, %c0_6, %c0_7] : memref<8x64x128xf32, #tpu.memory_space<vmem>>, vector<1x64x128xf32>
    %8 = vector.shape_cast %7 : vector<1x64x128xf32> to vector<64x128xf32>
    %9 = vector.shape_cast %6 : vector<64x128xf32> to vector<1x64x128xf32>
    tpu.vector_store %arg8[%c0_5, %c0_6, %c0_7], %9 {strides = array<i32>} : memref<8x64x128xf32, #tpu.memory_space<vmem>>, vector<1x64x128xf32>,
    %c0_8 = arith.constant 0 : index
    %c0_9 = arith.constant 0 : index
    %10 = vector.load %arg3[%c0_8, %c0_9] : memref<64x16xbf16, #tpu.memory_space<vmem>>, vector<64x16xbf16>
    %c1 = arith.constant 1 : index
    %c0_10 = arith.constant 0 : index
    %c0_11 = arith.constant 0 : index
    %11 = vector.load %arg2[%c1, %c0_10, %c0_11] : memref<8x16x128xbf16, #tpu.memory_space<vmem>>, vector<1x16x128xbf16>
    %12 = vector.shape_cast %11 : vector<1x16x128xbf16> to vector<16x128xbf16>
    %cst_12 = arith.constant dense<0.000000e+00> : vector<64x128xf32>
    %13 = tpu.matmul %10, %12, %cst_12 {dimension_numbers = #tpu.dot_dimension_numbers<[1], [0], [0], [1], [0, 0, 1, 1], [], []>} : vector<64x16xbf16>, vector<16x128xbf16>, vector<64x128xf32> -> vector<64x128xf32>
    %c1_13 = arith.constant 1 : index
    %c0_14 = arith.constant 0 : index
    %c0_15 = arith.constant 0 : index
    %14 = vector.load %arg8[%c1_13, %c0_14, %c0_15] : memref<8x64x128xf32, #tpu.memory_space<vmem>>, vector<1x64x128xf32>
    %15 = vector.shape_cast %14 : vector<1x64x128xf32> to vector<64x128xf32>
    %16 = vector.shape_cast %13 : vector<64x128xf32> to vector<1x64x128xf32>
    tpu.vector_store %arg8[%c1_13, %c0_14, %c0_15], %16 {strides = array<i32>} : memref<8x64x128xf32, #tpu.memory_space<vmem>>, vector<1x64x128xf32>,
    %c0_16 = arith.constant 0 : index
    %c0_17 = arith.constant 0 : index
    %17 = vector.load %arg3[%c0_16, %c0_17] : memref<64x16xbf16, #tpu.memory_space<vmem>>, vector<64x16xbf16>
    %c2 = arith.constant 2 : index
    %c0_18 = arith.constant 0 : index
    %c0_19 = arith.constant 0 : index
    %18 = vector.load %arg2[%c2, %c0_18, %c0_19] : memref<8x16x128xbf16, #tpu.memory_space<vmem>>, vector<1x16x128xbf16>
    %19 = vector.shape_cast %18 : vector<1x16x128xbf16> to vector<16x128xbf16>
    %cst_20 = arith.constant dense<0.000000e+00> : vector<64x128xf32>
    %20 = tpu.matmul %17, %19, %cst_20 {dimension_numbers = #tpu.dot_dimension_numbers<[1], [0], [0], [1], [0, 0, 1, 1], [], []>} : vector<64x16xbf16>, vector<16x128xbf16>, vector<64x128xf32> -> vector<64x128xf32>
    %c2_21 = arith.constant 2 : index
    %c0_22 = arith.constant 0 : index
    %c0_23 = arith.constant 0 : index
    %21 = vector.load %arg8[%c2_21, %c0_22, %c0_23] : memref<8x64x128xf32, #tpu.memory_space<vmem>>, vector<1x64x128xf32>
    %22 = vector.shape_cast %21 : vector<1x64x128xf32> to vector<64x128xf32>
    %23 = vector.shape_cast %20 : vector<64x128xf32> to vector<1x64x128xf32>
    tpu.vector_store %arg8[%c2_21, %c0_22, %c0_23], %23 {strides = array<i32>} : memref<8x64x128xf32, #tpu.memory_space<vmem>>, vector<1x64x128xf32>,
    %c0_24 = arith.constant 0 : index
    %c0_25 = arith.constant 0 : index
    %24 = vector.load %arg3[%c0_24, %c0_25] : memref<64x16xbf16, #tpu.memory_space<vmem>>, vector<64x16xbf16>
    %c3 = arith.constant 3 : index
    %c0_26 = arith.constant 0 : index
    %c0_27 = arith.constant 0 : index
    %25 = vector.load %arg2[%c3, %c0_26, %c0_27] : memref<8x16x128xbf16, #tpu.memory_space<vmem>>, vector<1x16x128xbf16>
    %26 = vector.shape_cast %25 : vector<1x16x128xbf16> to vector<16x128xbf16>
    %cst_28 = arith.constant dense<0.000000e+00> : vector<64x128xf32>
    %27 = tpu.matmul %24, %26, %cst_28 {dimension_numbers = #tpu.dot_dimension_numbers<[1], [0], [0], [1], [0, 0, 1, 1], [], []>} : vector<64x16xbf16>, vector<16x128xbf16>, vector<64x128xf32> -> vector<64x128xf32>
    %c3_29 = arith.constant 3 : index
    %c0_30 = arith.constant 0 : index
    %c0_31 = arith.constant 0 : index
    %28 = vector.load %arg8[%c3_29, %c0_30, %c0_31] : memref<8x64x128xf32, #tpu.memory_space<vmem>>, vector<1x64x128xf32>
    %29 = vector.shape_cast %28 : vector<1x64x128xf32> to vector<64x128xf32>
    %30 = vector.shape_cast %27 : vector<64x128xf32> to vector<1x64x128xf32>
    tpu.vector_store %arg8[%c3_29, %c0_30, %c0_31], %30 {strides = array<i32>} : memref<8x64x128xf32, #tpu.memory_space<vmem>>, vector<1x64x128xf32>,
    %c0_32 = arith.constant 0 : index
    %c0_33 = arith.constant 0 : index
    %31 = vector.load %arg3[%c0_32, %c0_33] : memref<64x16xbf16, #tpu.memory_space<vmem>>, vector<64x16xbf16>
    %c4 = arith.constant 4 : index
    %c0_34 = arith.constant 0 : index
    %c0_35 = arith.constant 0 : index
    %32 = vector.load %arg2[%c4, %c0_34, %c0_35] : memref<8x16x128xbf16, #tpu.memory_space<vmem>>, vector<1x16x128xbf16>
    %33 = vector.shape_cast %32 : vector<1x16x128xbf16> to vector<16x128xbf16>
    %cst_36 = arith.constant dense<0.000000e+00> : vector<64x128xf32>
    %34 = tpu.matmul %31, %33, %cst_36 {dimension_numbers = #tpu.dot_dimension_numbers<[1], [0], [0], [1], [0, 0, 1, 1], [], []>} : vector<64x16xbf16>, vector<16x128xbf16>, vector<64x128xf32> -> vector<64x128xf32>
    %c4_37 = arith.constant 4 : index
    %c0_38 = arith.constant 0 : index
    %c0_39 = arith.constant 0 : index
    %35 = vector.load %arg8[%c4_37, %c0_38, %c0_39] : memref<8x64x128xf32, #tpu.memory_space<vmem>>, vector<1x64x128xf32>
    %36 = vector.shape_cast %35 : vector<1x64x128xf32> to vector<64x128xf32>
    %37 = vector.shape_cast %34 : vector<64x128xf32> to vector<1x64x128xf32>
    tpu.vector_store %arg8[%c4_37, %c0_38, %c0_39], %37 {strides = array<i32>} : memref<8x64x128xf32, #tpu.memory_space<vmem>>, vector<1x64x128xf32>,
    %c0_40 = arith.constant 0 : index
    %c0_41 = arith.constant 0 : index
    %38 = vector.load %arg3[%c0_40, %c0_41] : memref<64x16xbf16, #tpu.memory_space<vmem>>, vector<64x16xbf16>
    %c5 = arith.constant 5 : index
    %c0_42 = arith.constant 0 : index
    %c0_43 = arith.constant 0 : index
    %39 = vector.load %arg2[%c5, %c0_42, %c0_43] : memref<8x16x128xbf16, #tpu.memory_space<vmem>>, vector<1x16x128xbf16>
    %40 = vector.shape_cast %39 : vector<1x16x128xbf16> to vector<16x128xbf16>
    %cst_44 = arith.constant dense<0.000000e+00> : vector<64x128xf32>
    %41 = tpu.matmul %38, %40, %cst_44 {dimension_numbers = #tpu.dot_dimension_numbers<[1], [0], [0], [1], [0, 0, 1, 1], [], []>} : vector<64x16xbf16>, vector<16x128xbf16>, vector<64x128xf32> -> vector<64x128xf32>
    %c5_45 = arith.constant 5 : index
    %c0_46 = arith.constant 0 : index
    %c0_47 = arith.constant 0 : index
    %42 = vector.load %arg8[%c5_45, %c0_46, %c0_47] : memref<8x64x128xf32, #tpu.memory_space<vmem>>, vector<1x64x128xf32>
    %43 = vector.shape_cast %42 : vector<1x64x128xf32> to vector<64x128xf32>
    %44 = vector.shape_cast %41 : vector<64x128xf32> to vector<1x64x128xf32>
    tpu.vector_store %arg8[%c5_45, %c0_46, %c0_47], %44 {strides = array<i32>} : memref<8x64x128xf32, #tpu.memory_space<vmem>>, vector<1x64x128xf32>,
    %c0_48 = arith.constant 0 : index
    %c0_49 = arith.constant 0 : index
    %45 = vector.load %arg3[%c0_48, %c0_49] : memref<64x16xbf16, #tpu.memory_space<vmem>>, vector<64x16xbf16>
    %c6 = arith.constant 6 : index
    %c0_50 = arith.constant 0 : index
    %c0_51 = arith.constant 0 : index
    %46 = vector.load %arg2[%c6, %c0_50, %c0_51] : memref<8x16x128xbf16, #tpu.memory_space<vmem>>, vector<1x16x128xbf16>
    %47 = vector.shape_cast %46 : vector<1x16x128xbf16> to vector<16x128xbf16>
    %cst_52 = arith.constant dense<0.000000e+00> : vector<64x128xf32>
    %48 = tpu.matmul %45, %47, %cst_52 {dimension_numbers = #tpu.dot_dimension_numbers<[1], [0], [0], [1], [0, 0, 1, 1], [], []>} : vector<64x16xbf16>, vector<16x128xbf16>, vector<64x128xf32> -> vector<64x128xf32>
    %c6_53 = arith.constant 6 : index
    %c0_54 = arith.constant 0 : index
    %c0_55 = arith.constant 0 : index
    %49 = vector.load %arg8[%c6_53, %c0_54, %c0_55] : memref<8x64x128xf32, #tpu.memory_space<vmem>>, vector<1x64x128xf32>
    %50 = vector.shape_cast %49 : vector<1x64x128xf32> to vector<64x128xf32>
    %51 = vector.shape_cast %48 : vector<64x128xf32> to vector<1x64x128xf32>
    tpu.vector_store %arg8[%c6_53, %c0_54, %c0_55], %51 {strides = array<i32>} : memref<8x64x128xf32, #tpu.memory_space<vmem>>, vector<1x64x128xf32>,
    %c0_56 = arith.constant 0 : index
    %c0_57 = arith.constant 0 : index
    %52 = vector.load %arg3[%c0_56, %c0_57] : memref<64x16xbf16, #tpu.memory_space<vmem>>, vector<64x16xbf16>
    %c7 = arith.constant 7 : index
    %c0_58 = arith.constant 0 : index
    %c0_59 = arith.constant 0 : index
    %53 = vector.load %arg2[%c7, %c0_58, %c0_59] : memref<8x16x128xbf16, #tpu.memory_space<vmem>>, vector<1x16x128xbf16>
    %54 = vector.shape_cast %53 : vector<1x16x128xbf16> to vector<16x128xbf16>
    %cst_60 = arith.constant dense<0.000000e+00> : vector<64x128xf32>
    %55 = tpu.matmul %52, %54, %cst_60 {dimension_numbers = #tpu.dot_dimension_numbers<[1], [0], [0], [1], [0, 0, 1, 1], [], []>} : vector<64x16xbf16>, vector<16x128xbf16>, vector<64x128xf32> -> vector<64x128xf32>
    %c7_61 = arith.constant 7 : index
    %c0_62 = arith.constant 0 : index
    %c0_63 = arith.constant 0 : index
    %56 = vector.load %arg8[%c7_61, %c0_62, %c0_63] : memref<8x64x128xf32, #tpu.memory_space<vmem>>, vector<1x64x128xf32>
    %57 = vector.shape_cast %56 : vector<1x64x128xf32> to vector<64x128xf32>
    %58 = vector.shape_cast %55 : vector<64x128xf32> to vector<1x64x128xf32>
    tpu.vector_store %arg8[%c7_61, %c0_62, %c0_63], %58 {strides = array<i32>} : memref<8x64x128xf32, #tpu.memory_space<vmem>>, vector<1x64x128xf32>,
    %c0_64 = arith.constant 0 : index
    %c0_65 = arith.constant 0 : index
    %59 = vector.load %arg6[%c0_64, %c0_65] : memref<16x128xf32, #tpu.memory_space<vmem>>, vector<16x128xf32>
    %60 = arith.truncf %59 : vector<16x128xf32> to vector<16x128xbf16>
    %c0_66 = arith.constant 0 : index
    %c0_67 = arith.constant 0 : index
    %c0_68 = arith.constant 0 : index
    %61 = vector.load %arg8[%c0_66, %c0_67, %c0_68] : memref<8x64x128xf32, #tpu.memory_space<vmem>>, vector<1x64x128xf32>
    %62 = vector.shape_cast %61 : vector<1x64x128xf32> to vector<64x128xf32>
    %c0_69 = arith.constant 0 : index
    %c0_70 = arith.constant 0 : index
    %63 = vector.load %arg4[%c0_69, %c0_70] : memref<64x16xbf16, #tpu.memory_space<vmem>>, vector<64x16xbf16>
    %cst_71 = arith.constant dense<0.000000e+00> : vector<64x128xf32>
    %64 = tpu.matmul %63, %60, %cst_71 {dimension_numbers = #tpu.dot_dimension_numbers<[1], [0], [0], [1], [0, 0, 1, 1], [], []>} : vector<64x16xbf16>, vector<16x128xbf16>, vector<64x128xf32> -> vector<64x128xf32>
    %65 = arith.addf %62, %64 : vector<64x128xf32>
    %66 = vector.extract_strided_slice %65 {offsets = [0, 0], sizes = [16, 128], strides = [1, 1]} : vector<64x128xf32> to vector<16x128xf32>
    %c0_72 = arith.constant 0 : index
    %c0_73 = arith.constant 0 : index
    %67 = vector.load %arg5[%c0_72, %c0_73] : memref<16x128xf32, #tpu.memory_space<vmem>>, vector<16x128xf32>
    %68 = arith.addf %66, %67 : vector<16x128xf32>
    %cst_74 = arith.constant 0.000000e+00 : f32
    %69 = vector.broadcast %cst_74 : f32 to vector<16x128xf32>
    %70 = arith.maximumf %68, %69 : vector<16x128xf32>
    %71 = vector.extract_strided_slice %65 {offsets = [16, 0], sizes = [16, 128], strides = [1, 1]} : vector<64x128xf32> to vector<16x128xf32>
    %cst_75 = arith.constant 0.000000e+00 : f32
    %72 = vector.broadcast %cst_75 : f32 to vector<16x128xf32>
    %73 = arith.subf %72, %71 : vector<16x128xf32>
    %74 = math.exp %73 : vector<16x128xf32>
    %cst_76 = arith.constant 1.000000e+00 : f32
    %75 = vector.broadcast %cst_76 : f32 to vector<16x128xf32>
    %76 = arith.addf %75, %74 : vector<16x128xf32>
    %cst_77 = arith.constant 1.000000e+00 : f32
    %77 = vector.broadcast %cst_77 : f32 to vector<16x128xf32>
    %78 = arith.divf %77, %76 : vector<16x128xf32>
    %79 = vector.extract_strided_slice %65 {offsets = [32, 0], sizes = [16, 128], strides = [1, 1]} : vector<64x128xf32> to vector<16x128xf32>
    %cst_78 = arith.constant 0.000000e+00 : f32
    %80 = vector.broadcast %cst_78 : f32 to vector<16x128xf32>
    %81 = arith.subf %80, %79 : vector<16x128xf32>
    %82 = math.exp %81 : vector<16x128xf32>
    %cst_79 = arith.constant 1.000000e+00 : f32
    %83 = vector.broadcast %cst_79 : f32 to vector<16x128xf32>
    %84 = arith.addf %83, %82 : vector<16x128xf32>
    %cst_80 = arith.constant 1.000000e+00 : f32
    %85 = vector.broadcast %cst_80 : f32 to vector<16x128xf32>
    %86 = arith.divf %85, %84 : vector<16x128xf32>
    %87 = vector.extract_strided_slice %65 {offsets = [48, 0], sizes = [16, 128], strides = [1, 1]} : vector<64x128xf32> to vector<16x128xf32>
    %cst_81 = arith.constant 0.000000e+00 : f32
    %88 = vector.broadcast %cst_81 : f32 to vector<16x128xf32>
    %89 = arith.subf %88, %87 : vector<16x128xf32>
    %90 = math.exp %89 : vector<16x128xf32>
    %cst_82 = arith.constant 1.000000e+00 : f32
    %91 = vector.broadcast %cst_82 : f32 to vector<16x128xf32>
    %92 = arith.addf %91, %90 : vector<16x128xf32>
    %cst_83 = arith.constant 1.000000e+00 : f32
    %93 = vector.broadcast %cst_83 : f32 to vector<16x128xf32>
    %94 = arith.divf %93, %92 : vector<16x128xf32>
    %c0_84 = arith.constant 0 : index
    %c0_85 = arith.constant 0 : index
    %95 = vector.load %arg7[%c0_84, %c0_85] : memref<16x128xf32, #tpu.memory_space<vmem>>, vector<16x128xf32>
    %96 = arith.mulf %95, %86 : vector<16x128xf32>
    %97 = arith.mulf %70, %78 : vector<16x128xf32>
    %98 = arith.addf %96, %97 : vector<16x128xf32>
    %c0_86 = arith.constant 0 : index
    %c0_87 = arith.constant 0 : index
    %99 = vector.load %arg7[%c0_86, %c0_87] : memref<16x128xf32, #tpu.memory_space<vmem>>, vector<16x128xf32>
    tpu.vector_store %arg7[%c0_86, %c0_87], %98 {strides = array<i32>} : memref<16x128xf32, #tpu.memory_space<vmem>>, vector<16x128xf32>,
    %100 = math.tanh %98 : vector<16x128xf32>
    %101 = arith.mulf %100, %94 : vector<16x128xf32>
    %c0_88 = arith.constant 0 : index
    %c0_89 = arith.constant 0 : index
    %102 = vector.load %arg6[%c0_88, %c0_89] : memref<16x128xf32, #tpu.memory_space<vmem>>, vector<16x128xf32>
    tpu.vector_store %arg6[%c0_88, %c0_89], %101 {strides = array<i32>} : memref<16x128xf32, #tpu.memory_space<vmem>>, vector<16x128xf32>,
    %c0_90 = arith.constant 0 : index
    %c0_91 = arith.constant 0 : index
    %103 = vector.load %arg6[%c0_90, %c0_91] : memref<16x128xf32, #tpu.memory_space<vmem>>, vector<16x128xf32>
    %104 = arith.truncf %103 : vector<16x128xf32> to vector<16x128xbf16>
    %c1_92 = arith.constant 1 : index
    %c0_93 = arith.constant 0 : index
    %c0_94 = arith.constant 0 : index
    %105 = vector.load %arg8[%c1_92, %c0_93, %c0_94] : memref<8x64x128xf32, #tpu.memory_space<vmem>>, vector<1x64x128xf32>
    %106 = vector.shape_cast %105 : vector<1x64x128xf32> to vector<64x128xf32>
    %c0_95 = arith.constant 0 : index
    %c0_96 = arith.constant 0 : index
    %107 = vector.load %arg4[%c0_95, %c0_96] : memref<64x16xbf16, #tpu.memory_space<vmem>>, vector<64x16xbf16>
    %cst_97 = arith.constant dense<0.000000e+00> : vector<64x128xf32>
    %108 = tpu.matmul %107, %104, %cst_97 {dimension_numbers = #tpu.dot_dimension_numbers<[1], [0], [0], [1], [0, 0, 1, 1], [], []>} : vector<64x16xbf16>, vector<16x128xbf16>, vector<64x128xf32> -> vector<64x128xf32>
    %109 = arith.addf %106, %108 : vector<64x128xf32>
    %110 = vector.extract_strided_slice %109 {offsets = [0, 0], sizes = [16, 128], strides = [1, 1]} : vector<64x128xf32> to vector<16x128xf32>
    %c0_98 = arith.constant 0 : index
    %c0_99 = arith.constant 0 : index
    %111 = vector.load %arg5[%c0_98, %c0_99] : memref<16x128xf32, #tpu.memory_space<vmem>>, vector<16x128xf32>
    %112 = arith.addf %110, %111 : vector<16x128xf32>
    %cst_100 = arith.constant 0.000000e+00 : f32
    %113 = vector.broadcast %cst_100 : f32 to vector<16x128xf32>
    %114 = arith.maximumf %112, %113 : vector<16x128xf32>
    %115 = vector.extract_strided_slice %109 {offsets = [16, 0], sizes = [16, 128], strides = [1, 1]} : vector<64x128xf32> to vector<16x128xf32>
    %cst_101 = arith.constant 0.000000e+00 : f32
    %116 = vector.broadcast %cst_101 : f32 to vector<16x128xf32>
    %117 = arith.subf %116, %115 : vector<16x128xf32>
    %118 = math.exp %117 : vector<16x128xf32>
    %cst_102 = arith.constant 1.000000e+00 : f32
    %119 = vector.broadcast %cst_102 : f32 to vector<16x128xf32>
    %120 = arith.addf %119, %118 : vector<16x128xf32>
    %cst_103 = arith.constant 1.000000e+00 : f32
    %121 = vector.broadcast %cst_103 : f32 to vector<16x128xf32>
    %122 = arith.divf %121, %120 : vector<16x128xf32>
    %123 = vector.extract_strided_slice %109 {offsets = [32, 0], sizes = [16, 128], strides = [1, 1]} : vector<64x128xf32> to vector<16x128xf32>
    %cst_104 = arith.constant 0.000000e+00 : f32
    %124 = vector.broadcast %cst_104 : f32 to vector<16x128xf32>
    %125 = arith.subf %124, %123 : vector<16x128xf32>
    %126 = math.exp %125 : vector<16x128xf32>
    %cst_105 = arith.constant 1.000000e+00 : f32
    %127 = vector.broadcast %cst_105 : f32 to vector<16x128xf32>
    %128 = arith.addf %127, %126 : vector<16x128xf32>
    %cst_106 = arith.constant 1.000000e+00 : f32
    %129 = vector.broadcast %cst_106 : f32 to vector<16x128xf32>
    %130 = arith.divf %129, %128 : vector<16x128xf32>
    %131 = vector.extract_strided_slice %109 {offsets = [48, 0], sizes = [16, 128], strides = [1, 1]} : vector<64x128xf32> to vector<16x128xf32>
    %cst_107 = arith.constant 0.000000e+00 : f32
    %132 = vector.broadcast %cst_107 : f32 to vector<16x128xf32>
    %133 = arith.subf %132, %131 : vector<16x128xf32>
    %134 = math.exp %133 : vector<16x128xf32>
    %cst_108 = arith.constant 1.000000e+00 : f32
    %135 = vector.broadcast %cst_108 : f32 to vector<16x128xf32>
    %136 = arith.addf %135, %134 : vector<16x128xf32>
    %cst_109 = arith.constant 1.000000e+00 : f32
    %137 = vector.broadcast %cst_109 : f32 to vector<16x128xf32>
    %138 = arith.divf %137, %136 : vector<16x128xf32>
    %c0_110 = arith.constant 0 : index
    %c0_111 = arith.constant 0 : index
    %139 = vector.load %arg7[%c0_110, %c0_111] : memref<16x128xf32, #tpu.memory_space<vmem>>, vector<16x128xf32>
    %140 = arith.mulf %139, %130 : vector<16x128xf32>
    %141 = arith.mulf %114, %122 : vector<16x128xf32>
    %142 = arith.addf %140, %141 : vector<16x128xf32>
    %c0_112 = arith.constant 0 : index
    %c0_113 = arith.constant 0 : index
    %143 = vector.load %arg7[%c0_112, %c0_113] : memref<16x128xf32, #tpu.memory_space<vmem>>, vector<16x128xf32>
    tpu.vector_store %arg7[%c0_112, %c0_113], %142 {strides = array<i32>} : memref<16x128xf32, #tpu.memory_space<vmem>>, vector<16x128xf32>,
    %144 = math.tanh %142 : vector<16x128xf32>
    %145 = arith.mulf %144, %138 : vector<16x128xf32>
    %c0_114 = arith.constant 0 : index
    %c0_115 = arith.constant 0 : index
    %146 = vector.load %arg6[%c0_114, %c0_115] : memref<16x128xf32, #tpu.memory_space<vmem>>, vector<16x128xf32>
    tpu.vector_store %arg6[%c0_114, %c0_115], %145 {strides = array<i32>} : memref<16x128xf32, #tpu.memory_space<vmem>>, vector<16x128xf32>,
    %c0_116 = arith.constant 0 : index
    %c0_117 = arith.constant 0 : index
    %147 = vector.load %arg6[%c0_116, %c0_117] : memref<16x128xf32, #tpu.memory_space<vmem>>, vector<16x128xf32>
    %148 = arith.truncf %147 : vector<16x128xf32> to vector<16x128xbf16>
    %c2_118 = arith.constant 2 : index
    %c0_119 = arith.constant 0 : index
    %c0_120 = arith.constant 0 : index
    %149 = vector.load %arg8[%c2_118, %c0_119, %c0_120] : memref<8x64x128xf32, #tpu.memory_space<vmem>>, vector<1x64x128xf32>
    %150 = vector.shape_cast %149 : vector<1x64x128xf32> to vector<64x128xf32>
    %c0_121 = arith.constant 0 : index
    %c0_122 = arith.constant 0 : index
    %151 = vector.load %arg4[%c0_121, %c0_122] : memref<64x16xbf16, #tpu.memory_space<vmem>>, vector<64x16xbf16>
    %cst_123 = arith.constant dense<0.000000e+00> : vector<64x128xf32>
    %152 = tpu.matmul %151, %148, %cst_123 {dimension_numbers = #tpu.dot_dimension_numbers<[1], [0], [0], [1], [0, 0, 1, 1], [], []>} : vector<64x16xbf16>, vector<16x128xbf16>, vector<64x128xf32> -> vector<64x128xf32>
    %153 = arith.addf %150, %152 : vector<64x128xf32>
    %154 = vector.extract_strided_slice %153 {offsets = [0, 0], sizes = [16, 128], strides = [1, 1]} : vector<64x128xf32> to vector<16x128xf32>
    %c0_124 = arith.constant 0 : index
    %c0_125 = arith.constant 0 : index
    %155 = vector.load %arg5[%c0_124, %c0_125] : memref<16x128xf32, #tpu.memory_space<vmem>>, vector<16x128xf32>
    %156 = arith.addf %154, %155 : vector<16x128xf32>
    %cst_126 = arith.constant 0.000000e+00 : f32
    %157 = vector.broadcast %cst_126 : f32 to vector<16x128xf32>
    %158 = arith.maximumf %156, %157 : vector<16x128xf32>
    %159 = vector.extract_strided_slice %153 {offsets = [16, 0], sizes = [16, 128], strides = [1, 1]} : vector<64x128xf32> to vector<16x128xf32>
    %cst_127 = arith.constant 0.000000e+00 : f32
    %160 = vector.broadcast %cst_127 : f32 to vector<16x128xf32>
    %161 = arith.subf %160, %159 : vector<16x128xf32>
    %162 = math.exp %161 : vector<16x128xf32>
    %cst_128 = arith.constant 1.000000e+00 : f32
    %163 = vector.broadcast %cst_128 : f32 to vector<16x128xf32>
    %164 = arith.addf %163, %162 : vector<16x128xf32>
    %cst_129 = arith.constant 1.000000e+00 : f32
    %165 = vector.broadcast %cst_129 : f32 to vector<16x128xf32>
    %166 = arith.divf %165, %164 : vector<16x128xf32>
    %167 = vector.extract_strided_slice %153 {offsets = [32, 0], sizes = [16, 128], strides = [1, 1]} : vector<64x128xf32> to vector<16x128xf32>
    %cst_130 = arith.constant 0.000000e+00 : f32
    %168 = vector.broadcast %cst_130 : f32 to vector<16x128xf32>
    %169 = arith.subf %168, %167 : vector<16x128xf32>
    %170 = math.exp %169 : vector<16x128xf32>
    %cst_131 = arith.constant 1.000000e+00 : f32
    %171 = vector.broadcast %cst_131 : f32 to vector<16x128xf32>
    %172 = arith.addf %171, %170 : vector<16x128xf32>
    %cst_132 = arith.constant 1.000000e+00 : f32
    %173 = vector.broadcast %cst_132 : f32 to vector<16x128xf32>
    %174 = arith.divf %173, %172 : vector<16x128xf32>
    %175 = vector.extract_strided_slice %153 {offsets = [48, 0], sizes = [16, 128], strides = [1, 1]} : vector<64x128xf32> to vector<16x128xf32>
    %cst_133 = arith.constant 0.000000e+00 : f32
    %176 = vector.broadcast %cst_133 : f32 to vector<16x128xf32>
    %177 = arith.subf %176, %175 : vector<16x128xf32>
    %178 = math.exp %177 : vector<16x128xf32>
    %cst_134 = arith.constant 1.000000e+00 : f32
    %179 = vector.broadcast %cst_134 : f32 to vector<16x128xf32>
    %180 = arith.addf %179, %178 : vector<16x128xf32>
    %cst_135 = arith.constant 1.000000e+00 : f32
    %181 = vector.broadcast %cst_135 : f32 to vector<16x128xf32>
    %182 = arith.divf %181, %180 : vector<16x128xf32>
    %c0_136 = arith.constant 0 : index
    %c0_137 = arith.constant 0 : index
    %183 = vector.load %arg7[%c0_136, %c0_137] : memref<16x128xf32, #tpu.memory_space<vmem>>, vector<16x128xf32>
    %184 = arith.mulf %183, %174 : vector<16x128xf32>
    %185 = arith.mulf %158, %166 : vector<16x128xf32>
    %186 = arith.addf %184, %185 : vector<16x128xf32>
    %c0_138 = arith.constant 0 : index
    %c0_139 = arith.constant 0 : index
    %187 = vector.load %arg7[%c0_138, %c0_139] : memref<16x128xf32, #tpu.memory_space<vmem>>, vector<16x128xf32>
    tpu.vector_store %arg7[%c0_138, %c0_139], %186 {strides = array<i32>} : memref<16x128xf32, #tpu.memory_space<vmem>>, vector<16x128xf32>,
    %188 = math.tanh %186 : vector<16x128xf32>
    %189 = arith.mulf %188, %182 : vector<16x128xf32>
    %c0_140 = arith.constant 0 : index
    %c0_141 = arith.constant 0 : index
    %190 = vector.load %arg6[%c0_140, %c0_141] : memref<16x128xf32, #tpu.memory_space<vmem>>, vector<16x128xf32>
    tpu.vector_store %arg6[%c0_140, %c0_141], %189 {strides = array<i32>} : memref<16x128xf32, #tpu.memory_space<vmem>>, vector<16x128xf32>,
    %c0_142 = arith.constant 0 : index
    %c0_143 = arith.constant 0 : index
    %191 = vector.load %arg6[%c0_142, %c0_143] : memref<16x128xf32, #tpu.memory_space<vmem>>, vector<16x128xf32>
    %192 = arith.truncf %191 : vector<16x128xf32> to vector<16x128xbf16>
    %c3_144 = arith.constant 3 : index
    %c0_145 = arith.constant 0 : index
    %c0_146 = arith.constant 0 : index
    %193 = vector.load %arg8[%c3_144, %c0_145, %c0_146] : memref<8x64x128xf32, #tpu.memory_space<vmem>>, vector<1x64x128xf32>
    %194 = vector.shape_cast %193 : vector<1x64x128xf32> to vector<64x128xf32>
    %c0_147 = arith.constant 0 : index
    %c0_148 = arith.constant 0 : index
    %195 = vector.load %arg4[%c0_147, %c0_148] : memref<64x16xbf16, #tpu.memory_space<vmem>>, vector<64x16xbf16>
    %cst_149 = arith.constant dense<0.000000e+00> : vector<64x128xf32>
    %196 = tpu.matmul %195, %192, %cst_149 {dimension_numbers = #tpu.dot_dimension_numbers<[1], [0], [0], [1], [0, 0, 1, 1], [], []>} : vector<64x16xbf16>, vector<16x128xbf16>, vector<64x128xf32> -> vector<64x128xf32>
    %197 = arith.addf %194, %196 : vector<64x128xf32>
    %198 = vector.extract_strided_slice %197 {offsets = [0, 0], sizes = [16, 128], strides = [1, 1]} : vector<64x128xf32> to vector<16x128xf32>
    %c0_150 = arith.constant 0 : index
    %c0_151 = arith.constant 0 : index
    %199 = vector.load %arg5[%c0_150, %c0_151] : memref<16x128xf32, #tpu.memory_space<vmem>>, vector<16x128xf32>
    %200 = arith.addf %198, %199 : vector<16x128xf32>
    %cst_152 = arith.constant 0.000000e+00 : f32
    %201 = vector.broadcast %cst_152 : f32 to vector<16x128xf32>
    %202 = arith.maximumf %200, %201 : vector<16x128xf32>
    %203 = vector.extract_strided_slice %197 {offsets = [16, 0], sizes = [16, 128], strides = [1, 1]} : vector<64x128xf32> to vector<16x128xf32>
    %cst_153 = arith.constant 0.000000e+00 : f32
    %204 = vector.broadcast %cst_153 : f32 to vector<16x128xf32>
    %205 = arith.subf %204, %203 : vector<16x128xf32>
    %206 = math.exp %205 : vector<16x128xf32>
    %cst_154 = arith.constant 1.000000e+00 : f32
    %207 = vector.broadcast %cst_154 : f32 to vector<16x128xf32>
    %208 = arith.addf %207, %206 : vector<16x128xf32>
    %cst_155 = arith.constant 1.000000e+00 : f32
    %209 = vector.broadcast %cst_155 : f32 to vector<16x128xf32>
    %210 = arith.divf %209, %208 : vector<16x128xf32>
    %211 = vector.extract_strided_slice %197 {offsets = [32, 0], sizes = [16, 128], strides = [1, 1]} : vector<64x128xf32> to vector<16x128xf32>
    %cst_156 = arith.constant 0.000000e+00 : f32
    %212 = vector.broadcast %cst_156 : f32 to vector<16x128xf32>
    %213 = arith.subf %212, %211 : vector<16x128xf32>
    %214 = math.exp %213 : vector<16x128xf32>
    %cst_157 = arith.constant 1.000000e+00 : f32
    %215 = vector.broadcast %cst_157 : f32 to vector<16x128xf32>
    %216 = arith.addf %215, %214 : vector<16x128xf32>
    %cst_158 = arith.constant 1.000000e+00 : f32
    %217 = vector.broadcast %cst_158 : f32 to vector<16x128xf32>
    %218 = arith.divf %217, %216 : vector<16x128xf32>
    %219 = vector.extract_strided_slice %197 {offsets = [48, 0], sizes = [16, 128], strides = [1, 1]} : vector<64x128xf32> to vector<16x128xf32>
    %cst_159 = arith.constant 0.000000e+00 : f32
    %220 = vector.broadcast %cst_159 : f32 to vector<16x128xf32>
    %221 = arith.subf %220, %219 : vector<16x128xf32>
    %222 = math.exp %221 : vector<16x128xf32>
    %cst_160 = arith.constant 1.000000e+00 : f32
    %223 = vector.broadcast %cst_160 : f32 to vector<16x128xf32>
    %224 = arith.addf %223, %222 : vector<16x128xf32>
    %cst_161 = arith.constant 1.000000e+00 : f32
    %225 = vector.broadcast %cst_161 : f32 to vector<16x128xf32>
    %226 = arith.divf %225, %224 : vector<16x128xf32>
    %c0_162 = arith.constant 0 : index
    %c0_163 = arith.constant 0 : index
    %227 = vector.load %arg7[%c0_162, %c0_163] : memref<16x128xf32, #tpu.memory_space<vmem>>, vector<16x128xf32>
    %228 = arith.mulf %227, %218 : vector<16x128xf32>
    %229 = arith.mulf %202, %210 : vector<16x128xf32>
    %230 = arith.addf %228, %229 : vector<16x128xf32>
    %c0_164 = arith.constant 0 : index
    %c0_165 = arith.constant 0 : index
    %231 = vector.load %arg7[%c0_164, %c0_165] : memref<16x128xf32, #tpu.memory_space<vmem>>, vector<16x128xf32>
    tpu.vector_store %arg7[%c0_164, %c0_165], %230 {strides = array<i32>} : memref<16x128xf32, #tpu.memory_space<vmem>>, vector<16x128xf32>,
    %232 = math.tanh %230 : vector<16x128xf32>
    %233 = arith.mulf %232, %226 : vector<16x128xf32>
    %c0_166 = arith.constant 0 : index
    %c0_167 = arith.constant 0 : index
    %234 = vector.load %arg6[%c0_166, %c0_167] : memref<16x128xf32, #tpu.memory_space<vmem>>, vector<16x128xf32>
    tpu.vector_store %arg6[%c0_166, %c0_167], %233 {strides = array<i32>} : memref<16x128xf32, #tpu.memory_space<vmem>>, vector<16x128xf32>,
    %c0_168 = arith.constant 0 : index
    %c0_169 = arith.constant 0 : index
    %235 = vector.load %arg6[%c0_168, %c0_169] : memref<16x128xf32, #tpu.memory_space<vmem>>, vector<16x128xf32>
    %236 = arith.truncf %235 : vector<16x128xf32> to vector<16x128xbf16>
    %c4_170 = arith.constant 4 : index
    %c0_171 = arith.constant 0 : index
    %c0_172 = arith.constant 0 : index
    %237 = vector.load %arg8[%c4_170, %c0_171, %c0_172] : memref<8x64x128xf32, #tpu.memory_space<vmem>>, vector<1x64x128xf32>
    %238 = vector.shape_cast %237 : vector<1x64x128xf32> to vector<64x128xf32>
    %c0_173 = arith.constant 0 : index
    %c0_174 = arith.constant 0 : index
    %239 = vector.load %arg4[%c0_173, %c0_174] : memref<64x16xbf16, #tpu.memory_space<vmem>>, vector<64x16xbf16>
    %cst_175 = arith.constant dense<0.000000e+00> : vector<64x128xf32>
    %240 = tpu.matmul %239, %236, %cst_175 {dimension_numbers = #tpu.dot_dimension_numbers<[1], [0], [0], [1], [0, 0, 1, 1], [], []>} : vector<64x16xbf16>, vector<16x128xbf16>, vector<64x128xf32> -> vector<64x128xf32>
    %241 = arith.addf %238, %240 : vector<64x128xf32>
    %242 = vector.extract_strided_slice %241 {offsets = [0, 0], sizes = [16, 128], strides = [1, 1]} : vector<64x128xf32> to vector<16x128xf32>
    %c0_176 = arith.constant 0 : index
    %c0_177 = arith.constant 0 : index
    %243 = vector.load %arg5[%c0_176, %c0_177] : memref<16x128xf32, #tpu.memory_space<vmem>>, vector<16x128xf32>
    %244 = arith.addf %242, %243 : vector<16x128xf32>
    %cst_178 = arith.constant 0.000000e+00 : f32
    %245 = vector.broadcast %cst_178 : f32 to vector<16x128xf32>
    %246 = arith.maximumf %244, %245 : vector<16x128xf32>
    %247 = vector.extract_strided_slice %241 {offsets = [16, 0], sizes = [16, 128], strides = [1, 1]} : vector<64x128xf32> to vector<16x128xf32>
    %cst_179 = arith.constant 0.000000e+00 : f32
    %248 = vector.broadcast %cst_179 : f32 to vector<16x128xf32>
    %249 = arith.subf %248, %247 : vector<16x128xf32>
    %250 = math.exp %249 : vector<16x128xf32>
    %cst_180 = arith.constant 1.000000e+00 : f32
    %251 = vector.broadcast %cst_180 : f32 to vector<16x128xf32>
    %252 = arith.addf %251, %250 : vector<16x128xf32>
    %cst_181 = arith.constant 1.000000e+00 : f32
    %253 = vector.broadcast %cst_181 : f32 to vector<16x128xf32>
    %254 = arith.divf %253, %252 : vector<16x128xf32>
    %255 = vector.extract_strided_slice %241 {offsets = [32, 0], sizes = [16, 128], strides = [1, 1]} : vector<64x128xf32> to vector<16x128xf32>
    %cst_182 = arith.constant 0.000000e+00 : f32
    %256 = vector.broadcast %cst_182 : f32 to vector<16x128xf32>
    %257 = arith.subf %256, %255 : vector<16x128xf32>
    %258 = math.exp %257 : vector<16x128xf32>
    %cst_183 = arith.constant 1.000000e+00 : f32
    %259 = vector.broadcast %cst_183 : f32 to vector<16x128xf32>
    %260 = arith.addf %259, %258 : vector<16x128xf32>
    %cst_184 = arith.constant 1.000000e+00 : f32
    %261 = vector.broadcast %cst_184 : f32 to vector<16x128xf32>
    %262 = arith.divf %261, %260 : vector<16x128xf32>
    %263 = vector.extract_strided_slice %241 {offsets = [48, 0], sizes = [16, 128], strides = [1, 1]} : vector<64x128xf32> to vector<16x128xf32>
    %cst_185 = arith.constant 0.000000e+00 : f32
    %264 = vector.broadcast %cst_185 : f32 to vector<16x128xf32>
    %265 = arith.subf %264, %263 : vector<16x128xf32>
    %266 = math.exp %265 : vector<16x128xf32>
    %cst_186 = arith.constant 1.000000e+00 : f32
    %267 = vector.broadcast %cst_186 : f32 to vector<16x128xf32>
    %268 = arith.addf %267, %266 : vector<16x128xf32>
    %cst_187 = arith.constant 1.000000e+00 : f32
    %269 = vector.broadcast %cst_187 : f32 to vector<16x128xf32>
    %270 = arith.divf %269, %268 : vector<16x128xf32>
    %c0_188 = arith.constant 0 : index
    %c0_189 = arith.constant 0 : index
    %271 = vector.load %arg7[%c0_188, %c0_189] : memref<16x128xf32, #tpu.memory_space<vmem>>, vector<16x128xf32>
    %272 = arith.mulf %271, %262 : vector<16x128xf32>
    %273 = arith.mulf %246, %254 : vector<16x128xf32>
    %274 = arith.addf %272, %273 : vector<16x128xf32>
    %c0_190 = arith.constant 0 : index
    %c0_191 = arith.constant 0 : index
    %275 = vector.load %arg7[%c0_190, %c0_191] : memref<16x128xf32, #tpu.memory_space<vmem>>, vector<16x128xf32>
    tpu.vector_store %arg7[%c0_190, %c0_191], %274 {strides = array<i32>} : memref<16x128xf32, #tpu.memory_space<vmem>>, vector<16x128xf32>,
    %276 = math.tanh %274 : vector<16x128xf32>
    %277 = arith.mulf %276, %270 : vector<16x128xf32>
    %c0_192 = arith.constant 0 : index
    %c0_193 = arith.constant 0 : index
    %278 = vector.load %arg6[%c0_192, %c0_193] : memref<16x128xf32, #tpu.memory_space<vmem>>, vector<16x128xf32>
    tpu.vector_store %arg6[%c0_192, %c0_193], %277 {strides = array<i32>} : memref<16x128xf32, #tpu.memory_space<vmem>>, vector<16x128xf32>,
    %c0_194 = arith.constant 0 : index
    %c0_195 = arith.constant 0 : index
    %279 = vector.load %arg6[%c0_194, %c0_195] : memref<16x128xf32, #tpu.memory_space<vmem>>, vector<16x128xf32>
    %280 = arith.truncf %279 : vector<16x128xf32> to vector<16x128xbf16>
    %c5_196 = arith.constant 5 : index
    %c0_197 = arith.constant 0 : index
    %c0_198 = arith.constant 0 : index
    %281 = vector.load %arg8[%c5_196, %c0_197, %c0_198] : memref<8x64x128xf32, #tpu.memory_space<vmem>>, vector<1x64x128xf32>
    %282 = vector.shape_cast %281 : vector<1x64x128xf32> to vector<64x128xf32>
    %c0_199 = arith.constant 0 : index
    %c0_200 = arith.constant 0 : index
    %283 = vector.load %arg4[%c0_199, %c0_200] : memref<64x16xbf16, #tpu.memory_space<vmem>>, vector<64x16xbf16>
    %cst_201 = arith.constant dense<0.000000e+00> : vector<64x128xf32>
    %284 = tpu.matmul %283, %280, %cst_201 {dimension_numbers = #tpu.dot_dimension_numbers<[1], [0], [0], [1], [0, 0, 1, 1], [], []>} : vector<64x16xbf16>, vector<16x128xbf16>, vector<64x128xf32> -> vector<64x128xf32>
    %285 = arith.addf %282, %284 : vector<64x128xf32>
    %286 = vector.extract_strided_slice %285 {offsets = [0, 0], sizes = [16, 128], strides = [1, 1]} : vector<64x128xf32> to vector<16x128xf32>
    %c0_202 = arith.constant 0 : index
    %c0_203 = arith.constant 0 : index
    %287 = vector.load %arg5[%c0_202, %c0_203] : memref<16x128xf32, #tpu.memory_space<vmem>>, vector<16x128xf32>
    %288 = arith.addf %286, %287 : vector<16x128xf32>
    %cst_204 = arith.constant 0.000000e+00 : f32
    %289 = vector.broadcast %cst_204 : f32 to vector<16x128xf32>
    %290 = arith.maximumf %288, %289 : vector<16x128xf32>
    %291 = vector.extract_strided_slice %285 {offsets = [16, 0], sizes = [16, 128], strides = [1, 1]} : vector<64x128xf32> to vector<16x128xf32>
    %cst_205 = arith.constant 0.000000e+00 : f32
    %292 = vector.broadcast %cst_205 : f32 to vector<16x128xf32>
    %293 = arith.subf %292, %291 : vector<16x128xf32>
    %294 = math.exp %293 : vector<16x128xf32>
    %cst_206 = arith.constant 1.000000e+00 : f32
    %295 = vector.broadcast %cst_206 : f32 to vector<16x128xf32>
    %296 = arith.addf %295, %294 : vector<16x128xf32>
    %cst_207 = arith.constant 1.000000e+00 : f32
    %297 = vector.broadcast %cst_207 : f32 to vector<16x128xf32>
    %298 = arith.divf %297, %296 : vector<16x128xf32>
    %299 = vector.extract_strided_slice %285 {offsets = [32, 0], sizes = [16, 128], strides = [1, 1]} : vector<64x128xf32> to vector<16x128xf32>
    %cst_208 = arith.constant 0.000000e+00 : f32
    %300 = vector.broadcast %cst_208 : f32 to vector<16x128xf32>
    %301 = arith.subf %300, %299 : vector<16x128xf32>
    %302 = math.exp %301 : vector<16x128xf32>
    %cst_209 = arith.constant 1.000000e+00 : f32
    %303 = vector.broadcast %cst_209 : f32 to vector<16x128xf32>
    %304 = arith.addf %303, %302 : vector<16x128xf32>
    %cst_210 = arith.constant 1.000000e+00 : f32
    %305 = vector.broadcast %cst_210 : f32 to vector<16x128xf32>
    %306 = arith.divf %305, %304 : vector<16x128xf32>
    %307 = vector.extract_strided_slice %285 {offsets = [48, 0], sizes = [16, 128], strides = [1, 1]} : vector<64x128xf32> to vector<16x128xf32>
    %cst_211 = arith.constant 0.000000e+00 : f32
    %308 = vector.broadcast %cst_211 : f32 to vector<16x128xf32>
    %309 = arith.subf %308, %307 : vector<16x128xf32>
    %310 = math.exp %309 : vector<16x128xf32>
    %cst_212 = arith.constant 1.000000e+00 : f32
    %311 = vector.broadcast %cst_212 : f32 to vector<16x128xf32>
    %312 = arith.addf %311, %310 : vector<16x128xf32>
    %cst_213 = arith.constant 1.000000e+00 : f32
    %313 = vector.broadcast %cst_213 : f32 to vector<16x128xf32>
    %314 = arith.divf %313, %312 : vector<16x128xf32>
    %c0_214 = arith.constant 0 : index
    %c0_215 = arith.constant 0 : index
    %315 = vector.load %arg7[%c0_214, %c0_215] : memref<16x128xf32, #tpu.memory_space<vmem>>, vector<16x128xf32>
    %316 = arith.mulf %315, %306 : vector<16x128xf32>
    %317 = arith.mulf %290, %298 : vector<16x128xf32>
    %318 = arith.addf %316, %317 : vector<16x128xf32>
    %c0_216 = arith.constant 0 : index
    %c0_217 = arith.constant 0 : index
    %319 = vector.load %arg7[%c0_216, %c0_217] : memref<16x128xf32, #tpu.memory_space<vmem>>, vector<16x128xf32>
    tpu.vector_store %arg7[%c0_216, %c0_217], %318 {strides = array<i32>} : memref<16x128xf32, #tpu.memory_space<vmem>>, vector<16x128xf32>,
    %320 = math.tanh %318 : vector<16x128xf32>
    %321 = arith.mulf %320, %314 : vector<16x128xf32>
    %c0_218 = arith.constant 0 : index
    %c0_219 = arith.constant 0 : index
    %322 = vector.load %arg6[%c0_218, %c0_219] : memref<16x128xf32, #tpu.memory_space<vmem>>, vector<16x128xf32>
    tpu.vector_store %arg6[%c0_218, %c0_219], %321 {strides = array<i32>} : memref<16x128xf32, #tpu.memory_space<vmem>>, vector<16x128xf32>,
    %c0_220 = arith.constant 0 : index
    %c0_221 = arith.constant 0 : index
    %323 = vector.load %arg6[%c0_220, %c0_221] : memref<16x128xf32, #tpu.memory_space<vmem>>, vector<16x128xf32>
    %324 = arith.truncf %323 : vector<16x128xf32> to vector<16x128xbf16>
    %c6_222 = arith.constant 6 : index
    %c0_223 = arith.constant 0 : index
    %c0_224 = arith.constant 0 : index
    %325 = vector.load %arg8[%c6_222, %c0_223, %c0_224] : memref<8x64x128xf32, #tpu.memory_space<vmem>>, vector<1x64x128xf32>
    %326 = vector.shape_cast %325 : vector<1x64x128xf32> to vector<64x128xf32>
    %c0_225 = arith.constant 0 : index
    %c0_226 = arith.constant 0 : index
    %327 = vector.load %arg4[%c0_225, %c0_226] : memref<64x16xbf16, #tpu.memory_space<vmem>>, vector<64x16xbf16>
    %cst_227 = arith.constant dense<0.000000e+00> : vector<64x128xf32>
    %328 = tpu.matmul %327, %324, %cst_227 {dimension_numbers = #tpu.dot_dimension_numbers<[1], [0], [0], [1], [0, 0, 1, 1], [], []>} : vector<64x16xbf16>, vector<16x128xbf16>, vector<64x128xf32> -> vector<64x128xf32>
    %329 = arith.addf %326, %328 : vector<64x128xf32>
    %330 = vector.extract_strided_slice %329 {offsets = [0, 0], sizes = [16, 128], strides = [1, 1]} : vector<64x128xf32> to vector<16x128xf32>
    %c0_228 = arith.constant 0 : index
    %c0_229 = arith.constant 0 : index
    %331 = vector.load %arg5[%c0_228, %c0_229] : memref<16x128xf32, #tpu.memory_space<vmem>>, vector<16x128xf32>
    %332 = arith.addf %330, %331 : vector<16x128xf32>
    %cst_230 = arith.constant 0.000000e+00 : f32
    %333 = vector.broadcast %cst_230 : f32 to vector<16x128xf32>
    %334 = arith.maximumf %332, %333 : vector<16x128xf32>
    %335 = vector.extract_strided_slice %329 {offsets = [16, 0], sizes = [16, 128], strides = [1, 1]} : vector<64x128xf32> to vector<16x128xf32>
    %cst_231 = arith.constant 0.000000e+00 : f32
    %336 = vector.broadcast %cst_231 : f32 to vector<16x128xf32>
    %337 = arith.subf %336, %335 : vector<16x128xf32>
    %338 = math.exp %337 : vector<16x128xf32>
    %cst_232 = arith.constant 1.000000e+00 : f32
    %339 = vector.broadcast %cst_232 : f32 to vector<16x128xf32>
    %340 = arith.addf %339, %338 : vector<16x128xf32>
    %cst_233 = arith.constant 1.000000e+00 : f32
    %341 = vector.broadcast %cst_233 : f32 to vector<16x128xf32>
    %342 = arith.divf %341, %340 : vector<16x128xf32>
    %343 = vector.extract_strided_slice %329 {offsets = [32, 0], sizes = [16, 128], strides = [1, 1]} : vector<64x128xf32> to vector<16x128xf32>
    %cst_234 = arith.constant 0.000000e+00 : f32
    %344 = vector.broadcast %cst_234 : f32 to vector<16x128xf32>
    %345 = arith.subf %344, %343 : vector<16x128xf32>
    %346 = math.exp %345 : vector<16x128xf32>
    %cst_235 = arith.constant 1.000000e+00 : f32
    %347 = vector.broadcast %cst_235 : f32 to vector<16x128xf32>
    %348 = arith.addf %347, %346 : vector<16x128xf32>
    %cst_236 = arith.constant 1.000000e+00 : f32
    %349 = vector.broadcast %cst_236 : f32 to vector<16x128xf32>
    %350 = arith.divf %349, %348 : vector<16x128xf32>
    %351 = vector.extract_strided_slice %329 {offsets = [48, 0], sizes = [16, 128], strides = [1, 1]} : vector<64x128xf32> to vector<16x128xf32>
    %cst_237 = arith.constant 0.000000e+00 : f32
    %352 = vector.broadcast %cst_237 : f32 to vector<16x128xf32>
    %353 = arith.subf %352, %351 : vector<16x128xf32>
    %354 = math.exp %353 : vector<16x128xf32>
    %cst_238 = arith.constant 1.000000e+00 : f32
    %355 = vector.broadcast %cst_238 : f32 to vector<16x128xf32>
    %356 = arith.addf %355, %354 : vector<16x128xf32>
    %cst_239 = arith.constant 1.000000e+00 : f32
    %357 = vector.broadcast %cst_239 : f32 to vector<16x128xf32>
    %358 = arith.divf %357, %356 : vector<16x128xf32>
    %c0_240 = arith.constant 0 : index
    %c0_241 = arith.constant 0 : index
    %359 = vector.load %arg7[%c0_240, %c0_241] : memref<16x128xf32, #tpu.memory_space<vmem>>, vector<16x128xf32>
    %360 = arith.mulf %359, %350 : vector<16x128xf32>
    %361 = arith.mulf %334, %342 : vector<16x128xf32>
    %362 = arith.addf %360, %361 : vector<16x128xf32>
    %c0_242 = arith.constant 0 : index
    %c0_243 = arith.constant 0 : index
    %363 = vector.load %arg7[%c0_242, %c0_243] : memref<16x128xf32, #tpu.memory_space<vmem>>, vector<16x128xf32>
    tpu.vector_store %arg7[%c0_242, %c0_243], %362 {strides = array<i32>} : memref<16x128xf32, #tpu.memory_space<vmem>>, vector<16x128xf32>,
    %364 = math.tanh %362 : vector<16x128xf32>
    %365 = arith.mulf %364, %358 : vector<16x128xf32>
    %c0_244 = arith.constant 0 : index
    %c0_245 = arith.constant 0 : index
    %366 = vector.load %arg6[%c0_244, %c0_245] : memref<16x128xf32, #tpu.memory_space<vmem>>, vector<16x128xf32>
    tpu.vector_store %arg6[%c0_244, %c0_245], %365 {strides = array<i32>} : memref<16x128xf32, #tpu.memory_space<vmem>>, vector<16x128xf32>,
    %c0_246 = arith.constant 0 : index
    %c0_247 = arith.constant 0 : index
    %367 = vector.load %arg6[%c0_246, %c0_247] : memref<16x128xf32, #tpu.memory_space<vmem>>, vector<16x128xf32>
    %368 = arith.truncf %367 : vector<16x128xf32> to vector<16x128xbf16>
    %c7_248 = arith.constant 7 : index
    %c0_249 = arith.constant 0 : index
    %c0_250 = arith.constant 0 : index
    %369 = vector.load %arg8[%c7_248, %c0_249, %c0_250] : memref<8x64x128xf32, #tpu.memory_space<vmem>>, vector<1x64x128xf32>
    %370 = vector.shape_cast %369 : vector<1x64x128xf32> to vector<64x128xf32>
    %c0_251 = arith.constant 0 : index
    %c0_252 = arith.constant 0 : index
    %371 = vector.load %arg4[%c0_251, %c0_252] : memref<64x16xbf16, #tpu.memory_space<vmem>>, vector<64x16xbf16>
    %cst_253 = arith.constant dense<0.000000e+00> : vector<64x128xf32>
    %372 = tpu.matmul %371, %368, %cst_253 {dimension_numbers = #tpu.dot_dimension_numbers<[1], [0], [0], [1], [0, 0, 1, 1], [], []>} : vector<64x16xbf16>, vector<16x128xbf16>, vector<64x128xf32> -> vector<64x128xf32>
    %373 = arith.addf %370, %372 : vector<64x128xf32>
    %374 = vector.extract_strided_slice %373 {offsets = [0, 0], sizes = [16, 128], strides = [1, 1]} : vector<64x128xf32> to vector<16x128xf32>
    %c0_254 = arith.constant 0 : index
    %c0_255 = arith.constant 0 : index
    %375 = vector.load %arg5[%c0_254, %c0_255] : memref<16x128xf32, #tpu.memory_space<vmem>>, vector<16x128xf32>
    %376 = arith.addf %374, %375 : vector<16x128xf32>
    %cst_256 = arith.constant 0.000000e+00 : f32
    %377 = vector.broadcast %cst_256 : f32 to vector<16x128xf32>
    %378 = arith.maximumf %376, %377 : vector<16x128xf32>
    %379 = vector.extract_strided_slice %373 {offsets = [16, 0], sizes = [16, 128], strides = [1, 1]} : vector<64x128xf32> to vector<16x128xf32>
    %cst_257 = arith.constant 0.000000e+00 : f32
    %380 = vector.broadcast %cst_257 : f32 to vector<16x128xf32>
    %381 = arith.subf %380, %379 : vector<16x128xf32>
    %382 = math.exp %381 : vector<16x128xf32>
    %cst_258 = arith.constant 1.000000e+00 : f32
    %383 = vector.broadcast %cst_258 : f32 to vector<16x128xf32>
    %384 = arith.addf %383, %382 : vector<16x128xf32>
    %cst_259 = arith.constant 1.000000e+00 : f32
    %385 = vector.broadcast %cst_259 : f32 to vector<16x128xf32>
    %386 = arith.divf %385, %384 : vector<16x128xf32>
    %387 = vector.extract_strided_slice %373 {offsets = [32, 0], sizes = [16, 128], strides = [1, 1]} : vector<64x128xf32> to vector<16x128xf32>
    %cst_260 = arith.constant 0.000000e+00 : f32
    %388 = vector.broadcast %cst_260 : f32 to vector<16x128xf32>
    %389 = arith.subf %388, %387 : vector<16x128xf32>
    %390 = math.exp %389 : vector<16x128xf32>
    %cst_261 = arith.constant 1.000000e+00 : f32
    %391 = vector.broadcast %cst_261 : f32 to vector<16x128xf32>
    %392 = arith.addf %391, %390 : vector<16x128xf32>
    %cst_262 = arith.constant 1.000000e+00 : f32
    %393 = vector.broadcast %cst_262 : f32 to vector<16x128xf32>
    %394 = arith.divf %393, %392 : vector<16x128xf32>
    %395 = vector.extract_strided_slice %373 {offsets = [48, 0], sizes = [16, 128], strides = [1, 1]} : vector<64x128xf32> to vector<16x128xf32>
    %cst_263 = arith.constant 0.000000e+00 : f32
    %396 = vector.broadcast %cst_263 : f32 to vector<16x128xf32>
    %397 = arith.subf %396, %395 : vector<16x128xf32>
    %398 = math.exp %397 : vector<16x128xf32>
    %cst_264 = arith.constant 1.000000e+00 : f32
    %399 = vector.broadcast %cst_264 : f32 to vector<16x128xf32>
    %400 = arith.addf %399, %398 : vector<16x128xf32>
    %cst_265 = arith.constant 1.000000e+00 : f32
    %401 = vector.broadcast %cst_265 : f32 to vector<16x128xf32>
    %402 = arith.divf %401, %400 : vector<16x128xf32>
    %c0_266 = arith.constant 0 : index
    %c0_267 = arith.constant 0 : index
    %403 = vector.load %arg7[%c0_266, %c0_267] : memref<16x128xf32, #tpu.memory_space<vmem>>, vector<16x128xf32>
    %404 = arith.mulf %403, %394 : vector<16x128xf32>
    %405 = arith.mulf %378, %386 : vector<16x128xf32>
    %406 = arith.addf %404, %405 : vector<16x128xf32>
    %c0_268 = arith.constant 0 : index
    %c0_269 = arith.constant 0 : index
    %407 = vector.load %arg7[%c0_268, %c0_269] : memref<16x128xf32, #tpu.memory_space<vmem>>, vector<16x128xf32>
    tpu.vector_store %arg7[%c0_268, %c0_269], %406 {strides = array<i32>} : memref<16x128xf32, #tpu.memory_space<vmem>>, vector<16x128xf32>,
    %408 = math.tanh %406 : vector<16x128xf32>
    %409 = arith.mulf %408, %402 : vector<16x128xf32>
    %c0_270 = arith.constant 0 : index
    %c0_271 = arith.constant 0 : index
    %410 = vector.load %arg6[%c0_270, %c0_271] : memref<16x128xf32, #tpu.memory_space<vmem>>, vector<16x128xf32>
    tpu.vector_store %arg6[%c0_270, %c0_271], %409 {strides = array<i32>} : memref<16x128xf32, #tpu.memory_space<vmem>>, vector<16x128xf32>,
    return
  }
  func.func @transform_0(%arg0: i32, %arg1: i32) -> (i32, i32, i32) {
    %c0_i32 = arith.constant 0 : i32
    %c0_i32_0 = arith.constant 0 : i32
    return %arg1, %c0_i32, %arg0 : i32, i32, i32
  }
  func.func @transform_1(%arg0: i32, %arg1: i32) -> (i32, i32) {
    %c0_i32 = arith.constant 0 : i32
    %c0_i32_0 = arith.constant 0 : i32
    %c0_i32_1 = arith.constant 0 : i32
    return %c0_i32, %c0_i32_0 : i32, i32
  }
  func.func @transform_2(%arg0: i32, %arg1: i32) -> (i32, i32) {
    %c0_i32 = arith.constant 0 : i32
    %c0_i32_0 = arith.constant 0 : i32
    %c0_i32_1 = arith.constant 0 : i32
    return %c0_i32, %c0_i32_0 : i32, i32
  }
  func.func @transform_3(%arg0: i32, %arg1: i32) -> (i32, i32) {
    %c0_i32 = arith.constant 0 : i32
    %c0_i32_0 = arith.constant 0 : i32
    %c0_i32_1 = arith.constant 0 : i32
    return %c0_i32, %c0_i32_0 : i32, i32
  }
  func.func @transform_4(%arg0: i32, %arg1: i32) -> (i32, i32) {
    %c0_i32 = arith.constant 0 : i32
    %c0_i32_0 = arith.constant 0 : i32
    return %c0_i32, %arg0 : i32, i32
  }
}

</mosaic_0001>

<bundles_post_ra>
// kernel: tpu_custom_call.1
= control target key start
LH: loop header
LB: loop body
LE: loop exit
PB: predicated region body
PF: predicated region fallthrough
CT: control target
= control target key end

     0   :  { %9 = vsyncpa [#allocation5], 0  ;;  %s4474_s0 = inlined_call_operand.vmem [shape: bf16[8,16,128], index: 0, kind: input, shape index: {}]   ;;  %s4475_s1 = inlined_call_operand.vmem [shape: bf16[64,16], index: 1, kind: input, shape index: {}]   ;;  %s4476_s2 = inlined_call_operand.vmem [shape: bf16[64,16], index: 2, kind: input, shape index: {}]   ;;  %s4477_s3 = inlined_call_operand.hbm [shape: f32[16,128], index: 3, kind: input, shape index: {}]   ;;  %s4478_s4 = inlined_call_operand.hbm [shape: f32[16,128], index: 4, kind: output, shape index: {}]  }
   0x1   :  { %10 = vsyncpa [#allocation6], 0  ;;  %s21_s17 = sshll.u32 %s4477_s3, 4  ;;  %s3268_s18 = smov [#allocation4]   ;;  %s22_s17 = int_to_ptr.hbm [resolvable:$true] %s21_s17 }
   0x2   :  { %s23_s19 = sshll.u32 %s3268_s18, 4  ;;  %s3269_s20 = smov 128   ;;  %s24_s19 = int_to_ptr.vmem [resolvable:$true] %s23_s19 }
   0x3   :  { %s3270_s21 = smov 8  }
   0x4   :  { %29 = dma.hbm_to_vmem [thread:$0]  %s22_s17, 256, %s24_s19, [#allocation5], %s3269_s20, %s3269_s20, %s3270_s21  }
   0x5   :  { %3264 = dma.done.wait [#allocation5], 256  }
   0x6   :  { %3265 = vsyncadd [#allocation5], 4294967040  ;;  %v2919_v0 = vld [vmem:[%s4474_s0] sm:$0xff]  ;;  %vm79_vm0 = vcmask 130048   ;;  %v2916_v2 = vld [vmem:[%s4475_s1 + $0x8] sm:$0xff]  ;;  %v3271_v9 = vmov 0.0|0.0  }
   0x7   :  { %v2915_v1 = vld [vmem:[%s4475_s1] sm:$0xff]  ;;  %99 = vmatpush.bf16.msra.mxu0 %v2919_v0  ;;  %v2917_v4 = vld [vmem:[%s4475_s1 + $0x10] sm:$0xff]  ;;  %v2918_v5 = vld [vmem:[%s4475_s1 + $0x18] sm:$0xff]  ;;  %s2536_s13 = sshll.u32 %s4478_s4, 4  ;;  %s2537_s13 = int_to_ptr.hbm [resolvable:$true] %s2536_s13 }
   0x8   :  { %v2939_v3 = vld [vmem:[%s4474_s0 + $0x20] sm:$0xff]  ;;  %v2936_v7 = vld [vmem:[%s4475_s1 + $0x8] sm:$0xff]  ;;  %v2937_v8 = vld [vmem:[%s4475_s1 + $0x10] sm:$0xff] }
   0x9   :  { %v2935_v6 = vld [vmem:[%s4475_s1] sm:$0xff]  ;;  %v2938_v10 = vld [vmem:[%s4475_s1 + $0x18] sm:$0xff]  ;;  %v2956_v14 = vld [vmem:[%s4476_s2 + $0x8] sm:$0xff] }
   0xa   :  { %2569 = vmatmul.msk.bf16.vlgmr.msra.gmra.mxu0 %vm79_vm0, %v2915_v1  ;;  %v2955_v11 = vld [vmem:[%s4476_s2] sm:$0xff]  ;;  %v2957_v17 = vld [vmem:[%s4476_s2 + $0x10] sm:$0xff]  ;;  %v2958_v20 = vld [vmem:[%s4476_s2 + $0x18] sm:$0xff] }
   0xb   :  { %446 = vmatpush.bf16.msrb.mxu0 %v2939_v3  ;;  %v2924_v22 = vld [vmem:[%s4474_s0 + $0x8] sm:$0xff]  ;;  %v2920_v23 = vld [vmem:[%s4475_s1] sm:$0xff]  ;;  %v2922_v29 = vld [vmem:[%s4475_s1 + $0x10] sm:$0xff] }
   0xc   :  { %185 = vmatpush.bf16.msra.mxu1 %v2924_v22  ;;  %v2921_v26 = vld [vmem:[%s4475_s1 + $0x8] sm:$0xff]  ;;  %v2923_v32 = vld [vmem:[%s4475_s1 + $0x18] sm:$0xff]  ;;  %v2940_v36 = vld [vmem:[%s4475_s1] sm:$0xff] }
   0xd   :  { %v2944_v35 = vld [vmem:[%s4474_s0 + $0x28] sm:$0xff]  ;;  %v2942_v44 = vld [vmem:[%s4475_s1 + $0x10] sm:$0xff]  ;;  %v2943_v56 = vld [vmem:[%s4475_s1 + $0x18] sm:$0xff] }
   0xe   :  { %v2941_v39 = vld [vmem:[%s4475_s1 + $0x8] sm:$0xff] }
   0xf   :  { %796 = vmatpush.bf16.msra.mxu0 %v3271_v9  ;;  %2595 = vmatmul.msk.bf16.vlgmr.msra.gmra.mxu1 %vm79_vm0, %v2920_v23  ;;  %v3450_v22 = vld [vmem:[#allocation4 + $0x8] sm:$0xff] }
  0x10   :  { %533 = vmatpush.bf16.msrb.mxu1 %v2944_v35 }
  0x1a   :  { %2570 = vmatmul.msk.bf16.gmra.mxu0 %vm79_vm0, %v2916_v2 }
  0x1f   :  { %2596 = vmatmul.msk.bf16.gmra.mxu1 %vm79_vm0, %v2921_v26 }
  0x2a   :  { %2571 = vmatmul.msk.bf16.gmra.mxu0 %vm79_vm0, %v2917_v4 }
  0x2f   :  { %2597 = vmatmul.msk.bf16.gmra.mxu1 %vm79_vm0, %v2922_v29 }
  0x3a   :  { %2572 = vmatmul.msk.bf16.gmra.mxu0 %vm79_vm0, %v2918_v5 }
  0x3f   :  { %2598 = vmatmul.msk.bf16.gmra.mxu1 %vm79_vm0, %v2923_v32 }
  0x4a   :  { %2673 = vmatmul.msk.bf16.vlgmr.msrb.gmra.mxu0 %vm79_vm0, %v2935_v6 }
  0x4f   :  { %2699 = vmatmul.msk.bf16.vlgmr.msrb.gmra.mxu1 %vm79_vm0, %v2940_v36 }
  0x5a   :  { %2674 = vmatmul.msk.bf16.gmra.mxu0 %vm79_vm0, %v2936_v7 }
  0x5f   :  { %2700 = vmatmul.msk.bf16.gmra.mxu1 %vm79_vm0, %v2941_v39 }
  0x6a   :  { %2675 = vmatmul.msk.bf16.gmra.mxu0 %vm79_vm0, %v2937_v8 }
  0x6f   :  { %2701 = vmatmul.msk.bf16.gmra.mxu1 %vm79_vm0, %v2942_v44 }
  0x7a   :  { %2676 = vmatmul.msk.bf16.gmra.mxu0 %vm79_vm0, %v2938_v10 }
  0x7f   :  { %2702 = vmatmul.msk.bf16.gmra.mxu1 %vm79_vm0, %v2943_v56 }
  0x87   :  { %v3345_v12 = vpop.f32.mrf.mxu0 }
  0x8a   :  { %2771 = vmatmul.msk.bf16.vlgmr.msra.gmra.mxu0 %vm79_vm0, %v2955_v11 }
  0x8c   :  { %v3469_v44 = vpop.f32.mrf.mxu1 }
  0x8f   :  { %v3348_v13 = vpop.f32.mrf.mxu0 }
  0x97   :  { %v106_v15 = vpop.f32.mrf.mxu0 }
  0x9a   :  { %2772 = vmatmul.msk.bf16.gmra.mxu0 %vm79_vm0, %v2956_v14 }
  0x9f   :  { %v108_v16 = vpop.f32.mrf.mxu0 }
  0xa7   :  { %v111_v18 = vpop.f32.mrf.mxu0 }
  0xaa   :  { %2773 = vmatmul.msk.bf16.gmra.mxu0 %vm79_vm0, %v2957_v17 }
  0xaf   :  { %v113_v19 = vpop.f32.mrf.mxu0 }
  0xb7   :  { %v3361_v21 = vpop.f32.mrf.mxu0 }
  0xba   :  { %2774 = vmatmul.msk.bf16.gmra.mxu0 %vm79_vm0, %v2958_v20 }
  0xbf   :  { %v3370_v24 = vpop.f32.mrf.mxu0 }
  0xc7   :  { %v3373_v25 = vpop.f32.mrf.mxu0 }
  0xcf   :  { %v3378_v27 = vpop.f32.mrf.mxu0 }
  0xd7   :  { %v3381_v28 = vpop.f32.mrf.mxu0 }
  0xdf   :  { %v3386_v30 = vpop.f32.mrf.mxu0 }
  0xe7   :  { %v3389_v31 = vpop.f32.mrf.mxu0 }
  0xef   :  { %v3394_v33 = vpop.f32.mrf.mxu0 }
  0xf7   :  { %v3397_v34 = vpop.f32.mrf.mxu0 }
  0xff   :  { %v3405_v37 = vpop.f32.mrf.mxu0 }
 0x107   :  { %v798_v38 = vpop.f32.mrf.mxu0 }
 0x10f   :  { %v800_v40 = vpop.f32.mrf.mxu0 }
 0x110   :  { %v819_v17 = vadd.f32 %v800_v40, %v3348_v13 }
 0x112   :  { %v3458_v13 = vadd.f32 %v3450_v22, %v819_v17  ;;  %v3523_v17 = vpop.f32.mrf.mxu1 }
 0x117   :  { %v803_v41 = vpop.f32.mrf.mxu0 }
 0x118   :  { %v820_v42 = vadd.f32 %v803_v41, %v106_v15  ;;  %v818_v15 = vadd.f32 %v798_v38, %v3345_v12 }
 0x11a   :  { %v832_v43 = vsub.f32 0.0, %v820_v42 }
 0x11c   :  { %v834_v47 = vmul.f32 1.442695, %v832_v43 }
 0x11e   :  { %2992 = vpow2.f32 %v834_v47 }
 0x11f   :  { %v805_v45 = vpop.f32.mrf.mxu0 }
 0x120   :  { %v821_v46 = vadd.f32 %v805_v45, %v108_v16  ;;  %v192_v45 = vpop.f32.mrf.mxu1 }
 0x122   :  { %v833_v48 = vsub.f32 0.0, %v821_v46 }
 0x124   :  { %v836_v49 = vmul.f32 1.442695, %v833_v48  ;;  %v2993_v53 = vpop.eup %2992 }
 0x125   :  { %v3419_v57 = vadd.f32 1.0, %v2993_v53 }
 0x126   :  { %2994 = vpow2.f32 %v836_v49 }
 0x127   :  { %v808_v50 = vpop.f32.mrf.mxu0  ;;  %v849_v32 = vand.u32 2147483647, %v3419_v57  ;;  %vm845_vm1 = vweird.f32 %v3419_v57  ;;  %v851_v39 = vand.u32 2147483648, %v3419_v57 }
 0x128   :  { %v822_v51 = vadd.f32 %v808_v50, %v111_v18 }
 0x129   :  { %vm3472_vm4 = vcmp.eq.f32.partialorder %v849_v32, 8.507059e+37 }
 0x12a   :  { %v870_v52 = vsub.f32 0.0, %v822_v51 }
 0x12c   :  { %v872_v54 = vmul.f32 1.442695, %v870_v52  ;;  %v2995_v55 = vpop.eup %2994 }
 0x12d   :  { %v3421_v59 = vadd.f32 1.0, %v2995_v55 }
 0x12e   :  { %2996 = vpow2.f32 %v872_v54 }
 0x12f   :  { %v810_v58 = vpop.f32.mrf.mxu0  ;;  %2998 = vrcp.f32 %v3419_v57  ;;  %v866_v51 = vand.u32 2147483648, %v3421_v59  ;;  %vm860_vm10 = vweird.f32 %v3421_v59 }
 0x130   :  { %v823_v60 = vadd.f32 %v810_v58, %v113_v19  ;;  %3000 = vrcp.f32 %v3421_v59  ;;  %v194_v58 = vpop.f32.mrf.mxu1 }
 0x132   :  { %v871_v61 = vsub.f32 0.0, %v823_v60  ;;  %v852_v60 = vor.u32 1.1754944e-38, %v851_v39 }
 0x134   :  { %v2997_v62 = vpop.eup %2996  ;;  %v874_v63 = vmul.f32 1.442695, %v871_v61  ;;  %v864_v61 = vand.u32 2147483647, %v3421_v59 }
 0x135   :  { %v3426_v0 = vadd.f32 1.0, %v2997_v62  ;;  %v3430_v3 = vpop.eup %2998 }
 0x136   :  { %3002 = vpow2.f32 %v874_v63  ;;  %v3432_v4 = vpop.eup %3000  ;;  %v841_v7 = vmul.f32 %v3430_v3, %v3419_v57  ;;  %vm846_vm3 = vweird.f32 %v3430_v3 }
 0x137   :  { %3004 = vrcp.f32 %v3426_v0  ;;  %v813_v1 = vpop.f32.mrf.mxu0  ;;  %v856_v10 = vmul.f32 %v3432_v4, %v3421_v59  ;;  %v889_v46 = vand.u32 2147483648, %v3426_v0  ;;  %vm883_vm5 = vweird.f32 %v3426_v0  ;;  %vm3499_vm9 = vmor %vm845_vm1, %vm846_vm3 }
 0x138   :  { %v824_v2 = vadd.f32 %v813_v1, %v3361_v21  ;;  %v842_v18 = vsub.f32 1.0, %v841_v7  ;;  %v3448_v21 = vld [vmem:[#allocation4] sm:$0xff]  ;;  %v887_v48 = vand.u32 2147483647, %v3426_v0  ;;  %vm861_vm6 = vweird.f32 %v3432_v4 }
 0x139   :  { %v857_v23 = vsub.f32 1.0, %v856_v10  ;;  %v3455_v35 = vadd.f32 %v3448_v21, %v818_v15  ;;  %v890_v62 = vor.u32 1.1754944e-38, %v889_v46  ;;  %vm3510_vm11 = vmor %vm860_vm10, %vm861_vm6  ;;  %v867_v7 = vor.u32 1.1754944e-38, %v866_v51 }
 0x13a   :  { %v908_v5 = vsub.f32 0.0, %v824_v2  ;;  %v843_v36 = vmul.f32 %v3430_v3, %v842_v18  ;;  %vm888_vm12 = vcmp.eq.f32.partialorder %v887_v48, 8.507059e+37  ;;  %vm865_vm1 = vcmp.eq.f32.partialorder %v864_v61, 8.507059e+37  ;;  %v2960_v61 = vld [vmem:[%s4476_s2 + $0x8] sm:$0xff] }
 0x13b   :  { %v858_v40 = vmul.f32 %v3432_v4, %v857_v23  ;;  %v831_v18 = vmax.f32 %v3458_v13, 0.0 }
 0x13c   :  { %v3003_v6 = vpop.eup %3002  ;;  %v910_v8 = vmul.f32 1.442695, %v908_v5  ;;  %v844_v47 = vadd.f32 %v3430_v3, %v843_v36 }
 0x13d   :  { %v3436_v9 = vpop.eup %3004  ;;  %v3440_v11 = vadd.f32 1.0, %v3003_v6  ;;  %v859_v50 = vadd.f32 %v3432_v4, %v858_v40 }
 0x13e   :  { %v879_v14 = vmul.f32 %v3436_v9, %v3426_v0  ;;  %3006 = vpow2.f32 %v910_v8  ;;  %vm884_vm2 = vweird.f32 %v3436_v9  ;;  %v848_v0 = vsel %vm3499_vm9, %v3430_v3, %v844_v47 }
 0x13f   :  { %3008 = vrcp.f32 %v3440_v11  ;;  %v815_v16 = vpop.f32.mrf.mxu0  ;;  %vm3486_vm7 = vmor %vm883_vm5, %vm884_vm2  ;;  %v904_v53 = vand.u32 2147483648, %v3440_v11  ;;  %v902_v56 = vand.u32 2147483647, %v3440_v11  ;;  %vm898_vm13 = vweird.f32 %v3440_v11 }
 0x140   :  { %v880_v19 = vsub.f32 1.0, %v879_v14  ;;  %v825_v20 = vadd.f32 %v815_v16, %v3370_v24  ;;  %v863_v59 = vsel %vm3510_vm11, %v3432_v4, %v859_v50  ;;  %v853_v10 = vsel %vm3472_vm4, %v852_v60, %v848_v0  ;;  %v197_v60 = vpop.f32.mrf.mxu1  ;;  %v2925_v0 = vld [vmem:[%s4475_s1] sm:$0xff] }
 0x141   :  { %v905_v6 = vor.u32 1.1754944e-38, %v904_v53  ;;  %vm903_vm15 = vcmp.eq.f32.partialorder %v902_v56, 8.507059e+37  ;;  %v830_v14 = vmax.f32 %v3455_v35, 0.0  ;;  %v868_v15 = vsel %vm865_vm1, %v867_v7, %v863_v59  ;;  %v2959_v56 = vld [vmem:[%s4476_s2] sm:$0xff]  ;;  %v2926_v59 = vld [vmem:[%s4475_s1 + $0x8] sm:$0xff] }
 0x142   :  { %v881_v26 = vmul.f32 %v3436_v9, %v880_v19  ;;  %v909_v29 = vsub.f32 0.0, %v825_v20 }
 0x143   :  { %v950_v20 = vmul.f32 %v853_v10, %v830_v14  ;;  %v2928_v14 = vld [vmem:[%s4475_s1 + $0x18] sm:$0xff] }
 0x144   :  { %v3007_v12 = vpop.eup %3006  ;;  %v912_v24 = vmul.f32 1.442695, %v909_v29  ;;  %v882_v42 = vadd.f32 %v3436_v9, %v881_v26  ;;  %v951_v26 = vmul.f32 %v868_v15, %v831_v18 }
 0x145   :  { %v3009_v38 = vpop.eup %3008  ;;  %v3464_v41 = vadd.f32 1.0, %v3007_v12 }
 0x146   :  { %v894_v43 = vmul.f32 %v3009_v38, %v3440_v11  ;;  %3010 = vpow2.f32 %v912_v24  ;;  %v886_v54 = vsel %vm3486_vm7, %v3436_v9, %v882_v42  ;;  %vm899_vm8 = vweird.f32 %v3009_v38 }
 0x147   :  { %3012 = vrcp.f32 %v3464_v41  ;;  %v891_v5 = vsel %vm888_vm12, %v890_v62, %v886_v54  ;;  %vm900_vm14 = vmor %vm898_vm13, %vm899_vm8  ;;  %v927_v35 = vand.u32 2147483648, %v3464_v41  ;;  %vm921_vm3 = vweird.f32 %v3464_v41 }
 0x148   :  { %v895_v49 = vsub.f32 1.0, %v894_v43  ;;  %v948_v4 = vmul.f32 0.0, %v891_v5  ;;  %v925_v13 = vand.u32 2147483647, %v3464_v41  ;;  %v199_v62 = vpop.f32.mrf.mxu1  ;;  %v2962_v5 = vld [vmem:[%s4476_s2 + $0x18] sm:$0xff] }
 0x149   :  { %v928_v46 = vor.u32 1.1754944e-38, %v927_v35 }
 0x14a   :  { %v896_v55 = vmul.f32 %v3009_v38, %v895_v49  ;;  %v3526_v29 = vadd.f32 %v950_v20, %v948_v4  ;;  %vm926_vm6 = vcmp.eq.f32.partialorder %v925_v13, 8.507059e+37  ;;  %v2949_v4 = vld [vmem:[%s4474_s0 + $0x30] sm:$0xff]  ;;  %v2946_v20 = vld [vmem:[%s4475_s1 + $0x8] sm:$0xff] }
 0x14c   :  { %v3011_v63 = vpop.eup %3010  ;;  %v897_v57 = vadd.f32 %v3009_v38, %v896_v55 }
 0x14d   :  { %v3013_v2 = vpop.eup %3012  ;;  %v915_v3 = vadd.f32 1.0, %v3011_v63  ;;  %v2929_v63 = vld [vmem:[%s4474_s0 + $0x10] sm:$0xff] }
 0x14e   :  { %v901_v8 = vsel %vm900_vm14, %v3009_v38, %v897_v57  ;;  %v917_v9 = vmul.f32 %v3013_v2, %v3464_v41  ;;  %vm922_vm2 = vweird.f32 %v3013_v2  ;;  %272 = vmatpush.bf16.msra.mxu2 %v2929_v63  ;;  %v2961_v57 = vld [vmem:[%s4476_s2 + $0x10] sm:$0xff] }
 0x14f   :  { %v906_v11 = vsel %vm903_vm15, %v905_v6, %v901_v8  ;;  %3014 = vrcp.f32 %v915_v3  ;;  %vm923_vm4 = vmor %vm921_vm3, %vm922_vm2  ;;  %v942_v39 = vand.u32 2147483648, %v915_v3  ;;  %v940_v43 = vand.u32 2147483647, %v915_v3 }
 0x150   :  { %v918_v16 = vsub.f32 1.0, %v917_v9  ;;  %v949_v19 = vmul.f32 0.0, %v906_v11  ;;  %3016 = vtanh.f32 %v3526_v29  ;;  %vm936_vm7 = vweird.f32 %v915_v3  ;;  %v3549_v1 = vpop.f32.mrf.mxu1 }
 0x151   :  { %v943_v49 = vor.u32 1.1754944e-38, %v942_v39  ;;  %vm941_vm9 = vcmp.eq.f32.partialorder %v940_v43, 8.507059e+37  ;;  %2621 = vmatmul.msk.bf16.vlgmr.msra.gmra.mxu2 %vm79_vm0, %v2925_v0 }
 0x152   :  { %v919_v23 = vmul.f32 %v3013_v2, %v918_v16  ;;  %v3528_v12 = vadd.f32 %v951_v26, %v949_v19  ;;  %620 = vmatpush.bf16.msrb.mxu2 %v2949_v4  ;;  %v2945_v16 = vld [vmem:[%s4475_s1] sm:$0xff] }
 0x154   :  { %v920_v36 = vadd.f32 %v3013_v2, %v919_v23  ;;  %3018 = vtanh.f32 %v3528_v12 }
 0x155   :  { %v3015_v32 = vpop.eup %3014 }
 0x156   :  { %v932_v24 = vmul.f32 %v3015_v32, %v915_v3  ;;  %v924_v40 = vsel %vm923_vm4, %v3013_v2, %v920_v36  ;;  %vm937_vm5 = vweird.f32 %v3015_v32  ;;  %v3017_v50 = vpop.eup %3016  ;;  %v2927_v3 = vld [vmem:[%s4475_s1 + $0x10] sm:$0xff] }
 0x157   :  { %v929_v48 = vsel %vm926_vm6, %v928_v46, %v924_v40  ;;  %vm938_vm8 = vmor %vm936_vm7, %vm937_vm5 }
 0x158   :  { %v933_v38 = vsub.f32 1.0, %v932_v24  ;;  %v958_v53 = vmul.f32 %v3017_v50, %v929_v48  ;;  %v3556_v2 = vpop.f32.mrf.mxu1  ;;  %v2947_v24 = vld [vmem:[%s4475_s1 + $0x10] sm:$0xff] }
 0x15a   :  { %v934_v42 = vmul.f32 %v3015_v32, %v933_v38  ;;  %v3019_v41 = vpop.eup %3018 }
 0x15c   :  { %v935_v47 = vadd.f32 %v3015_v32, %v934_v42 }
 0x15e   :  { %v939_v51 = vsel %vm938_vm8, %v3015_v32, %v935_v47 }
 0x15f   :  { %v944_v52 = vsel %vm941_vm9, %v943_v49, %v939_v51  ;;  %v2948_v49 = vld [vmem:[%s4475_s1 + $0x18] sm:$0xff] }
 0x160   :  { %v959_v54 = vmul.f32 %v3019_v41, %v944_v52  ;;  %v3565_v6 = vpop.f32.mrf.mxu1 }
 0x161   :  { %2622 = vmatmul.msk.bf16.gmra.mxu2 %vm79_vm0, %v2926_v59 }
 0x162   :  { %v964_v55 = vpack.c.bf16 %v959_v54, %v958_v53 }
 0x164   :  { %1020 = vmatpush.bf16.msra.mxu1 %v964_v55 }
 0x167   :  { %2791 = vmatmul.msk.bf16.vlgmr.msra.gmra.mxu1 %vm79_vm0, %v2959_v56 }
 0x168   :  { %v3571_v7 = vpop.f32.mrf.mxu1 }
 0x170   :  { %v3574_v8 = vpop.f32.mrf.mxu1 }
 0x171   :  { %2623 = vmatmul.msk.bf16.gmra.mxu2 %vm79_vm0, %v2927_v3 }
 0x177   :  { %2792 = vmatmul.msk.bf16.gmra.mxu1 %vm79_vm0, %v2960_v61 }
 0x178   :  { %v3576_v9 = vpop.f32.mrf.mxu1 }
 0x180   :  { %v3578_v10 = vpop.f32.mrf.mxu1 }
 0x181   :  { %2624 = vmatmul.msk.bf16.gmra.mxu2 %vm79_vm0, %v2928_v14 }
 0x187   :  { %2793 = vmatmul.msk.bf16.gmra.mxu1 %vm79_vm0, %v2961_v57 }
 0x188   :  { %v3580_v11 = vpop.f32.mrf.mxu1 }
 0x190   :  { %v3586_v15 = vpop.f32.mrf.mxu1 }
 0x191   :  { %2725 = vmatmul.msk.bf16.vlgmr.msrb.gmra.mxu2 %vm79_vm0, %v2945_v16 }
 0x197   :  { %2794 = vmatmul.msk.bf16.gmra.mxu1 %vm79_vm0, %v2962_v5 }
 0x198   :  { %v3594_v18 = vpop.f32.mrf.mxu1 }
 0x1a1   :  { %2726 = vmatmul.msk.bf16.gmra.mxu2 %vm79_vm0, %v2946_v20 }
 0x1b1   :  { %2727 = vmatmul.msk.bf16.gmra.mxu2 %vm79_vm0, %v2947_v24 }
 0x1c1   :  { %2728 = vmatmul.msk.bf16.gmra.mxu2 %vm79_vm0, %v2948_v49 }
 0x1e4   :  { %v1022_v19 = vpop.f32.mrf.mxu1 }
 0x1e5   :  { %v1042_v4 = vadd.f32 %v1022_v19, %v3469_v44 }
 0x1ec   :  { %v1024_v23 = vpop.f32.mrf.mxu1 }
 0x1ed   :  { %v1043_v20 = vadd.f32 %v1024_v23, %v3523_v17 }
 0x1ef   :  { %v3643_v44 = vadd.f32 %v1043_v20, %v3450_v22 }
 0x1f4   :  { %v1027_v26 = vpop.f32.mrf.mxu1 }
 0x1f5   :  { %v1044_v32 = vadd.f32 %v1027_v26, %v192_v45 }
 0x1f7   :  { %v1056_v36 = vsub.f32 0.0, %v1044_v32 }
 0x1f9   :  { %v1058_v38 = vmul.f32 1.442695, %v1056_v36 }
 0x1fb   :  { %3020 = vpow2.f32 %v1058_v38 }
 0x1fc   :  { %v1029_v35 = vpop.f32.mrf.mxu1 }
 0x1fd   :  { %v1045_v13 = vadd.f32 %v1029_v35, %v194_v58 }
 0x1ff   :  { %v1057_v39 = vsub.f32 0.0, %v1045_v13 }
 0x201   :  { %v1060_v40 = vmul.f32 1.442695, %v1057_v39  ;;  %v3021_v47 = vpop.eup %3020 }
 0x202   :  { %v3608_v50 = vadd.f32 1.0, %v3021_v47 }
 0x203   :  { %3022 = vpow2.f32 %v1060_v40  ;;  %v3640_v40 = vadd.f32 %v1042_v4, %v3448_v21 }
 0x204   :  { %v1032_v42 = vpop.f32.mrf.mxu1  ;;  %v1073_v38 = vand.u32 2147483647, %v3608_v50  ;;  %vm1069_vm10 = vweird.f32 %v3608_v50 }
 0x205   :  { %v1046_v43 = vadd.f32 %v1032_v42, %v197_v60 }
 0x206   :  { %vm3655_vm13 = vcmp.eq.f32.partialorder %v1073_v38, 8.507059e+37  ;;  %v1054_v38 = vmax.f32 %v3640_v40, 0.0 }
 0x207   :  { %v1094_v46 = vsub.f32 0.0, %v1046_v43 }
 0x209   :  { %v1096_v48 = vmul.f32 1.442695, %v1094_v46  ;;  %v3023_v45 = vpop.eup %3022 }
 0x20a   :  { %v3610_v41 = vadd.f32 1.0, %v3023_v45 }
 0x20b   :  { %3024 = vpow2.f32 %v1096_v48 }
 0x20c   :  { %v1034_v51 = vpop.f32.mrf.mxu1  ;;  %3026 = vrcp.f32 %v3608_v50  ;;  %vm1084_vm4 = vweird.f32 %v3610_v41 }
 0x20d   :  { %v1047_v52 = vadd.f32 %v1034_v51, %v199_v62  ;;  %3028 = vrcp.f32 %v3610_v41 }
 0x20f   :  { %v1095_v53 = vsub.f32 0.0, %v1047_v52 }
 0x211   :  { %v3025_v54 = vpop.eup %3024  ;;  %v1098_v55 = vmul.f32 1.442695, %v1095_v53 }
 0x212   :  { %v3615_v56 = vadd.f32 1.0, %v3025_v54  ;;  %v3619_v61 = vpop.eup %3026  ;;  %v1090_v54 = vand.u32 2147483648, %v3610_v41 }
 0x213   :  { %3030 = vpow2.f32 %v1098_v55  ;;  %v3621_v62 = vpop.eup %3028  ;;  %v1065_v57 = vmul.f32 %v3619_v61, %v3608_v50  ;;  %vm1070_vm12 = vweird.f32 %v3619_v61 }
 0x214   :  { %3032 = vrcp.f32 %v3615_v56  ;;  %v1037_v58 = vpop.f32.mrf.mxu1  ;;  %v1080_v3 = vmul.f32 %v3621_v62, %v3610_v41  ;;  %v1113_v45 = vand.u32 2147483648, %v3615_v56  ;;  %vm1107_vm14 = vweird.f32 %v3615_v56  ;;  %vm3680_vm3 = vmor %vm1069_vm10, %vm1070_vm12 }
 0x215   :  { %v1048_v60 = vadd.f32 %v1037_v58, %v3549_v1  ;;  %v1066_v26 = vsub.f32 1.0, %v1065_v57  ;;  %v1111_v51 = vand.u32 2147483647, %v3615_v56  ;;  %vm1085_vm15 = vweird.f32 %v3621_v62 }
 0x216   :  { %v1081_v24 = vsub.f32 1.0, %v1080_v3  ;;  %v1114_v3 = vor.u32 1.1754944e-38, %v1113_v45  ;;  %vm3691_vm5 = vmor %vm1084_vm4, %vm1085_vm15 }
 0x217   :  { %v1132_v63 = vsub.f32 0.0, %v1048_v60  ;;  %v1067_v19 = vmul.f32 %v3619_v61, %v1066_v26  ;;  %vm1112_vm6 = vcmp.eq.f32.partialorder %v1111_v51, 8.507059e+37 }
 0x218   :  { %v1082_v42 = vmul.f32 %v3621_v62, %v1081_v24 }
 0x219   :  { %v3031_v0 = vpop.eup %3030  ;;  %v1134_v59 = vmul.f32 1.442695, %v1132_v63  ;;  %v1068_v49 = vadd.f32 %v3619_v61, %v1067_v19 }
 0x21a   :  { %v3625_v5 = vpop.eup %3032  ;;  %v3629_v14 = vadd.f32 1.0, %v3031_v0  ;;  %v1083_v53 = vadd.f32 %v3621_v62, %v1082_v42 }
 0x21b   :  { %v1103_v1 = vmul.f32 %v3625_v5, %v3615_v56  ;;  %3034 = vpow2.f32 %v1134_v59  ;;  %vm1108_vm11 = vweird.f32 %v3625_v5  ;;  %v1088_v59 = vand.u32 2147483647, %v3610_v41 }
 0x21c   :  { %3036 = vrcp.f32 %v3629_v14  ;;  %v1039_v16 = vpop.f32.mrf.mxu1  ;;  %vm3667_vm1 = vmor %vm1107_vm14, %vm1108_vm11  ;;  %v1128_v58 = vand.u32 2147483648, %v3629_v14  ;;  %v1126_v56 = vand.u32 2147483647, %v3629_v14  ;;  %vm1122_vm7 = vweird.f32 %v3629_v14 }
 0x21d   :  { %v1104_v32 = vsub.f32 1.0, %v1103_v1  ;;  %v1049_v36 = vadd.f32 %v1039_v16, %v3556_v2  ;;  %v1075_v2 = vand.u32 2147483648, %v3608_v50  ;;  %v3696_v16 = vpop.f32.mrf.mxu2  ;;  %v1087_v41 = vsel %vm3691_vm5, %v3621_v62, %v1083_v53 }
 0x21e   :  { %vm1127_vm9 = vcmp.eq.f32.partialorder %v1126_v56, 8.507059e+37  ;;  %vm1089_vm10 = vcmp.eq.f32.partialorder %v1088_v59, 8.507059e+37 }
 0x21f   :  { %v1105_v35 = vmul.f32 %v3625_v5, %v1104_v32  ;;  %v1133_v13 = vsub.f32 0.0, %v1049_v36  ;;  %v1076_v57 = vor.u32 1.1754944e-38, %v1075_v2  ;;  %v1091_v36 = vor.u32 1.1754944e-38, %v1090_v54 }
 0x221   :  { %v3035_v39 = vpop.eup %3034  ;;  %v1136_v17 = vmul.f32 1.442695, %v1133_v13  ;;  %v1106_v46 = vadd.f32 %v3625_v5, %v1105_v35 }
 0x222   :  { %v3037_v23 = vpop.eup %3036  ;;  %v3649_v43 = vadd.f32 1.0, %v3035_v39  ;;  %v1092_v39 = vsel %vm1089_vm10, %v1091_v36, %v1087_v41  ;;  %v2964_v41 = vld [vmem:[%s4476_s2 + $0x8] sm:$0xff]  ;;  %v2934_v36 = vld [vmem:[%s4474_s0 + $0x18] sm:$0xff] }
 0x223   :  { %v1118_v47 = vmul.f32 %v3037_v23, %v3629_v14  ;;  %3038 = vpow2.f32 %v1136_v17  ;;  %v1110_v60 = vsel %vm3667_vm1, %v3625_v5, %v1106_v46  ;;  %vm1123_vm2 = vweird.f32 %v3037_v23  ;;  %359 = vmatpush.bf16.msra.mxu3 %v2934_v36 }
 0x224   :  { %3040 = vrcp.f32 %v3649_v43  ;;  %v1072_v5 = vsel %vm3680_vm3, %v3619_v61, %v1068_v49  ;;  %v1115_v26 = vsel %vm1112_vm6, %v1114_v3, %v1110_v60  ;;  %vm1124_vm8 = vmor %vm1122_vm7, %vm1123_vm2  ;;  %v1129_v61 = vor.u32 1.1754944e-38, %v1128_v58 }
 0x225   :  { %v1119_v52 = vsub.f32 1.0, %v1118_v47  ;;  %v1077_v14 = vsel %vm3655_vm13, %v1076_v57, %v1072_v5  ;;  %v1172_v62 = vmul.f32 %v1115_v26, %v3526_v29  ;;  %v1055_v17 = vmax.f32 %v3643_v44, 0.0  ;;  %v3713_v40 = vpop.f32.mrf.mxu2 }
 0x226   :  { %v1151_v29 = vand.u32 2147483648, %v3649_v43  ;;  %vm1145_vm12 = vweird.f32 %v3649_v43 }
 0x227   :  { %v1120_v63 = vmul.f32 %v3037_v23, %v1119_v52  ;;  %v1175_v46 = vmul.f32 %v1092_v39, %v1055_v17 }
 0x228   :  { %v1152_v58 = vor.u32 1.1754944e-38, %v1151_v29 }
 0x229   :  { %v3039_v1 = vpop.eup %3038  ;;  %v1121_v50 = vadd.f32 %v3037_v23, %v1120_v63 }
 0x22a   :  { %v3041_v20 = vpop.eup %3040  ;;  %v1139_v32 = vadd.f32 1.0, %v3039_v1 }
 0x22b   :  { %v1125_v24 = vsel %vm1124_vm8, %v3037_v23, %v1121_v50  ;;  %v1141_v35 = vmul.f32 %v3041_v20, %v3649_v43  ;;  %v1174_v23 = vmul.f32 %v1077_v14, %v1054_v38  ;;  %vm1146_vm11 = vweird.f32 %v3041_v20  ;;  %v2963_v50 = vld [vmem:[%s4476_s2] sm:$0xff]  ;;  %v2931_v38 = vld [vmem:[%s4475_s1 + $0x8] sm:$0xff] }
 0x22c   :  { %v1130_v13 = vsel %vm1127_vm9, %v1129_v61, %v1125_v24  ;;  %3042 = vrcp.f32 %v1139_v32  ;;  %vm1147_vm13 = vmor %vm1145_vm12, %vm1146_vm11  ;;  %v1166_v52 = vand.u32 2147483648, %v1139_v32  ;;  %v1164_v55 = vand.u32 2147483647, %v1139_v32  ;;  %v2930_v24 = vld [vmem:[%s4475_s1] sm:$0xff] }
 0x22d   :  { %v1142_v19 = vsub.f32 1.0, %v1141_v35  ;;  %v1173_v2 = vmul.f32 %v1130_v13, %v3528_v12  ;;  %v3709_v47 = vadd.f32 %v1174_v23, %v1172_v62  ;;  %v1149_v12 = vand.u32 2147483647, %v3649_v43  ;;  %v279_v5 = vpop.f32.mrf.mxu2  ;;  %2647 = vmatmul.msk.bf16.vlgmr.msra.gmra.mxu3 %vm79_vm0, %v2930_v24  ;;  %v2966_v13 = vld [vmem:[%s4476_s2 + $0x18] sm:$0xff]  ;;  %v2932_v62 = vld [vmem:[%s4475_s1 + $0x10] sm:$0xff] }
 0x22e   :  { %vm1160_vm1 = vweird.f32 %v1139_v32  ;;  %v1167_v56 = vor.u32 1.1754944e-38, %v1166_v52  ;;  %vm1165_vm3 = vcmp.eq.f32.partialorder %v1164_v55, 8.507059e+37 }
 0x22f   :  { %v1143_v42 = vmul.f32 %v3041_v20, %v1142_v19  ;;  %v3711_v45 = vadd.f32 %v1175_v46, %v1173_v2  ;;  %3044 = vtanh.f32 %v3709_v47  ;;  %vm1150_vm15 = vcmp.eq.f32.partialorder %v1149_v12, 8.507059e+37  ;;  %v2933_v46 = vld [vmem:[%s4475_s1 + $0x18] sm:$0xff] }
 0x231   :  { %v1144_v49 = vadd.f32 %v3041_v20, %v1143_v42  ;;  %3046 = vtanh.f32 %v3711_v45 }
 0x232   :  { %v3043_v48 = vpop.eup %3042 }
 0x233   :  { %v1156_v51 = vmul.f32 %v3043_v48, %v1139_v32  ;;  %v1148_v53 = vsel %vm1147_vm13, %v3041_v20, %v1144_v49  ;;  %vm1161_vm14 = vweird.f32 %v3043_v48  ;;  %v2965_v32 = vld [vmem:[%s4476_s2 + $0x10] sm:$0xff]  ;;  %v2954_v49 = vld [vmem:[%s4474_s0 + $0x38] sm:$0xff] }
 0x234   :  { %v1153_v63 = vsel %vm1150_vm15, %v1152_v58, %v1148_v53  ;;  %vm1162_vm2 = vmor %vm1160_vm1, %vm1161_vm14  ;;  %707 = vmatpush.bf16.msrb.mxu3 %v2954_v49  ;;  %v2952_v58 = vld [vmem:[%s4475_s1 + $0x10] sm:$0xff] }
 0x235   :  { %v1157_v44 = vsub.f32 1.0, %v1156_v51  ;;  %v3045_v0 = vpop.eup %3044  ;;  %v281_v20 = vpop.f32.mrf.mxu2  ;;  %v2950_v51 = vld [vmem:[%s4475_s1] sm:$0xff] }
 0x236   :  { %v1182_v3 = vmul.f32 %v3045_v0, %v1153_v63 }
 0x237   :  { %v1158_v54 = vmul.f32 %v3043_v48, %v1157_v44  ;;  %v3047_v43 = vpop.eup %3046  ;;  %v2951_v44 = vld [vmem:[%s4475_s1 + $0x8] sm:$0xff] }
 0x239   :  { %v1159_v60 = vadd.f32 %v3043_v48, %v1158_v54 }
 0x23b   :  { %v1163_v57 = vsel %vm1162_vm2, %v3043_v48, %v1159_v60 }
 0x23c   :  { %v1168_v59 = vsel %vm1165_vm3, %v1167_v56, %v1163_v57 }
 0x23d   :  { %v1183_v1 = vmul.f32 %v3047_v43, %v1168_v59  ;;  %v284_v26 = vpop.f32.mrf.mxu2  ;;  %2648 = vmatmul.msk.bf16.gmra.mxu3 %vm79_vm0, %v2931_v38 }
 0x23f   :  { %v1188_v4 = vpack.c.bf16 %v1183_v1, %v1182_v3 }
 0x241   :  { %1244 = vmatpush.bf16.msra.mxu2 %v1188_v4 }
 0x244   :  { %2811 = vmatmul.msk.bf16.vlgmr.msra.gmra.mxu2 %vm79_vm0, %v2963_v50  ;;  %v2953_v50 = vld [vmem:[%s4475_s1 + $0x18] sm:$0xff] }
 0x245   :  { %v286_v61 = vpop.f32.mrf.mxu2 }
 0x24d   :  { %v289_v35 = vpop.f32.mrf.mxu2  ;;  %2649 = vmatmul.msk.bf16.gmra.mxu3 %vm79_vm0, %v2932_v62 }
 0x254   :  { %2812 = vmatmul.msk.bf16.gmra.mxu2 %vm79_vm0, %v2964_v41 }
 0x255   :  { %v3739_v14 = vpop.f32.mrf.mxu2 }
 0x25d   :  { %v3749_v39 = vpop.f32.mrf.mxu2  ;;  %2650 = vmatmul.msk.bf16.gmra.mxu3 %vm79_vm0, %v2933_v46 }
 0x264   :  { %2813 = vmatmul.msk.bf16.gmra.mxu2 %vm79_vm0, %v2965_v32 }
 0x265   :  { %v3754_v19 = vpop.f32.mrf.mxu2 }
 0x26d   :  { %v3757_v17 = vpop.f32.mrf.mxu2  ;;  %2751 = vmatmul.msk.bf16.vlgmr.msrb.gmra.mxu3 %vm79_vm0, %v2950_v51 }
 0x274   :  { %2814 = vmatmul.msk.bf16.gmra.mxu2 %vm79_vm0, %v2966_v13 }
 0x275   :  { %v3759_v2 = vpop.f32.mrf.mxu2 }
 0x27d   :  { %v3761_v23 = vpop.f32.mrf.mxu2  ;;  %2752 = vmatmul.msk.bf16.gmra.mxu3 %vm79_vm0, %v2951_v44 }
 0x285   :  { %v3763_v42 = vpop.f32.mrf.mxu2 }
 0x28d   :  { %v3769_v48 = vpop.f32.mrf.mxu2  ;;  %2753 = vmatmul.msk.bf16.gmra.mxu3 %vm79_vm0, %v2952_v58 }
 0x295   :  { %v3777_v29 = vpop.f32.mrf.mxu2 }
 0x29d   :  { %2754 = vmatmul.msk.bf16.gmra.mxu3 %vm79_vm0, %v2953_v50 }
 0x2c7   :  { %v1246_v12 = vpop.f32.mrf.mxu2 }
 0x2cf   :  { %v1248_v52 = vpop.f32.mrf.mxu2 }
 0x2d7   :  { %v1251_v53 = vpop.f32.mrf.mxu2 }
 0x2d8   :  { %v1268_v54 = vadd.f32 %v1251_v53, %v279_v5 }
 0x2da   :  { %v1280_v55 = vsub.f32 0.0, %v1268_v54 }
 0x2dc   :  { %v1282_v56 = vmul.f32 1.442695, %v1280_v55 }
 0x2de   :  { %3048 = vpow2.f32 %v1282_v56 }
 0x2df   :  { %v1253_v60 = vpop.f32.mrf.mxu2 }
 0x2e0   :  { %v1269_v63 = vadd.f32 %v1253_v60, %v281_v20 }
 0x2e2   :  { %v1281_v0 = vsub.f32 0.0, %v1269_v63  ;;  %v1266_v63 = vadd.f32 %v1246_v12, %v3696_v16 }
 0x2e4   :  { %v1284_v57 = vmul.f32 1.442695, %v1281_v0  ;;  %v3049_v1 = vpop.eup %3048  ;;  %v1267_v0 = vadd.f32 %v1248_v52, %v3713_v40 }
 0x2e5   :  { %v3791_v41 = vadd.f32 1.0, %v3049_v1 }
 0x2e6   :  { %3050 = vpow2.f32 %v1284_v57  ;;  %v3825_v16 = vadd.f32 %v1267_v0, %v3450_v22 }
 0x2e7   :  { %v1256_v43 = vpop.f32.mrf.mxu2  ;;  %vm1293_vm4 = vweird.f32 %v3791_v41 }
 0x2e8   :  { %v1270_v59 = vadd.f32 %v1256_v43, %v284_v26 }
 0x2ea   :  { %v1318_v3 = vsub.f32 0.0, %v1270_v59 }
 0x2ec   :  { %v1320_v4 = vmul.f32 1.442695, %v1318_v3  ;;  %v3051_v5 = vpop.eup %3050 }
 0x2ed   :  { %v3793_v32 = vadd.f32 1.0, %v3051_v5  ;;  %v1297_v5 = vand.u32 2147483647, %v3791_v41 }
 0x2ee   :  { %3052 = vpow2.f32 %v1320_v4 }
 0x2ef   :  { %v1258_v20 = vpop.f32.mrf.mxu2  ;;  %3054 = vrcp.f32 %v3791_v41  ;;  %vm3837_vm7 = vcmp.eq.f32.partialorder %v1297_v5, 8.507059e+37  ;;  %vm1308_vm13 = vweird.f32 %v3793_v32 }
 0x2f0   :  { %v1271_v36 = vadd.f32 %v1258_v20, %v286_v61  ;;  %3056 = vrcp.f32 %v3793_v32  ;;  %v3822_v20 = vadd.f32 %v1266_v63, %v3448_v21 }
 0x2f2   :  { %v1319_v24 = vsub.f32 0.0, %v1271_v36 }
 0x2f4   :  { %v3053_v26 = vpop.eup %3052  ;;  %v1322_v13 = vmul.f32 1.442695, %v1319_v24 }
 0x2f5   :  { %v3798_v38 = vadd.f32 1.0, %v3053_v26  ;;  %v3801_v49 = vpop.eup %3054 }
 0x2f6   :  { %3058 = vpow2.f32 %v1322_v13  ;;  %v3803_v51 = vpop.eup %3056  ;;  %v1289_v53 = vmul.f32 %v3801_v49, %v3791_v41  ;;  %vm1294_vm6 = vweird.f32 %v3801_v49 }
 0x2f7   :  { %3060 = vrcp.f32 %v3798_v38  ;;  %v1261_v62 = vpop.f32.mrf.mxu2  ;;  %v1304_v58 = vmul.f32 %v3803_v51, %v3793_v32  ;;  %v1337_v13 = vand.u32 2147483648, %v3798_v38  ;;  %vm1331_vm8 = vweird.f32 %v3798_v38  ;;  %vm3862_vm12 = vmor %vm1293_vm4, %vm1294_vm6 }
 0x2f8   :  { %v1272_v46 = vadd.f32 %v1261_v62, %v289_v35  ;;  %v1290_v57 = vsub.f32 1.0, %v1289_v53  ;;  %vm1309_vm9 = vweird.f32 %v3803_v51  ;;  %v1314_v53 = vand.u32 2147483648, %v3793_v32 }
 0x2f9   :  { %v1305_v3 = vsub.f32 1.0, %v1304_v58  ;;  %vm3873_vm14 = vmor %vm1308_vm13, %vm1309_vm9 }
 0x2fa   :  { %v1356_v61 = vsub.f32 0.0, %v1272_v46  ;;  %v1291_v12 = vmul.f32 %v3801_v49, %v1290_v57  ;;  %v1335_v46 = vand.u32 2147483647, %v3798_v38  ;;  %v1312_v57 = vand.u32 2147483647, %v3793_v32 }
 0x2fb   :  { %v1306_v36 = vmul.f32 %v3803_v51, %v1305_v3 }
 0x2fc   :  { %v3059_v44 = vpop.eup %3058  ;;  %v1358_v54 = vmul.f32 1.442695, %v1356_v61  ;;  %v1292_v62 = vadd.f32 %v3801_v49, %v1291_v12  ;;  %vm1336_vm15 = vcmp.eq.f32.partialorder %v1335_v46, 8.507059e+37  ;;  %v1315_v12 = vor.u32 1.1754944e-38, %v1314_v53 }
 0x2fd   :  { %v3807_v55 = vpop.eup %3060  ;;  %v3811_v60 = vadd.f32 1.0, %v3059_v44  ;;  %v1307_v44 = vadd.f32 %v3803_v51, %v1306_v36  ;;  %vm1313_vm4 = vcmp.eq.f32.partialorder %v1312_v57, 8.507059e+37 }
 0x2fe   :  { %v1327_v35 = vmul.f32 %v3807_v55, %v3798_v38  ;;  %3062 = vpow2.f32 %v1358_v54  ;;  %vm1332_vm5 = vweird.f32 %v3807_v55 }
 0x2ff   :  { %3064 = vrcp.f32 %v3811_v60  ;;  %v1263_v56 = vpop.f32.mrf.mxu2  ;;  %vm3849_vm10 = vmor %vm1331_vm8, %vm1332_vm5  ;;  %v1352_v58 = vand.u32 2147483648, %v3811_v60  ;;  %v1350_v38 = vand.u32 2147483647, %v3811_v60  ;;  %vm1346_vm1 = vweird.f32 %v3811_v60 }
 0x300   :  { %v1328_v43 = vsub.f32 1.0, %v1327_v35  ;;  %v1273_v59 = vadd.f32 %v1263_v56, %v3739_v14  ;;  %v1299_v14 = vand.u32 2147483648, %v3791_v41  ;;  %v1311_v32 = vsel %vm3873_vm14, %v3803_v51, %v1307_v44 }
 0x301   :  { %vm1351_vm3 = vcmp.eq.f32.partialorder %v1350_v38, 8.507059e+37 }
 0x302   :  { %v1329_v1 = vmul.f32 %v3807_v55, %v1328_v43  ;;  %v1357_v4 = vsub.f32 0.0, %v1273_v59  ;;  %v1300_v0 = vor.u32 1.1754944e-38, %v1299_v14  ;;  %v1338_v43 = vor.u32 1.1754944e-38, %v1337_v13 }
 0x304   :  { %v3063_v50 = vpop.eup %3062  ;;  %v1360_v40 = vmul.f32 1.442695, %v1357_v4  ;;  %v1330_v26 = vadd.f32 %v3807_v55, %v1329_v1  ;;  %v3878_v1 = vpop.f32.mrf.mxu3 }
 0x305   :  { %v3065_v52 = vpop.eup %3064  ;;  %v3831_v24 = vadd.f32 1.0, %v3063_v50 }
 0x306   :  { %v1342_v21 = vmul.f32 %v3065_v52, %v3811_v60  ;;  %3066 = vpow2.f32 %v1360_v40  ;;  %v1334_v35 = vsel %vm3849_vm10, %v3807_v55, %v1330_v26  ;;  %vm1347_vm11 = vweird.f32 %v3065_v52 }
 0x307   :  { %3068 = vrcp.f32 %v3831_v24  ;;  %v1296_v55 = vsel %vm3862_vm12, %v3801_v49, %v1292_v62  ;;  %v1339_v5 = vsel %vm1336_vm15, %v1338_v43, %v1334_v35  ;;  %vm1348_vm2 = vmor %vm1346_vm1, %vm1347_vm11  ;;  %v1353_v49 = vor.u32 1.1754944e-38, %v1352_v58 }
 0x308   :  { %v1343_v61 = vsub.f32 1.0, %v1342_v21  ;;  %v1301_v60 = vsel %vm3837_vm7, %v1300_v0, %v1296_v55  ;;  %v1278_v26 = vmax.f32 %v3822_v20, 0.0  ;;  %v1316_v21 = vsel %vm1313_vm4, %v1315_v12, %v1311_v32 }
 0x309   :  { %v1396_v51 = vmul.f32 %v1339_v5, %v3709_v47  ;;  %v1279_v62 = vmax.f32 %v3825_v16, 0.0  ;;  %v1375_v47 = vand.u32 2147483648, %v3831_v24  ;;  %vm1369_vm6 = vweird.f32 %v3831_v24 }
 0x30a   :  { %v1344_v63 = vmul.f32 %v3065_v52, %v1343_v61 }
 0x30b   :  { %v1399_v44 = vmul.f32 %v1316_v21, %v1279_v62  ;;  %v1376_v57 = vor.u32 1.1754944e-38, %v1375_v47 }
 0x30c   :  { %v3067_v59 = vpop.eup %3066  ;;  %v1345_v41 = vadd.f32 %v3065_v52, %v1344_v63  ;;  %v3895_v20 = vpop.f32.mrf.mxu3 }
 0x30d   :  { %v3069_v4 = vpop.eup %3068  ;;  %v1363_v50 = vadd.f32 1.0, %v3067_v59 }
 0x30e   :  { %v1349_v40 = vsel %vm1348_vm2, %v3065_v52, %v1345_v41  ;;  %v1365_v14 = vmul.f32 %v3069_v4, %v3831_v24  ;;  %v1398_v52 = vmul.f32 %v1301_v60, %v1278_v26  ;;  %vm1370_vm5 = vweird.f32 %v3069_v4  ;;  %v2969_v26 = vld [vmem:[%s4476_s2 + $0x10] sm:$0xff] }
 0x30f   :  { %v1354_v36 = vsel %vm1351_vm3, %v1353_v49, %v1349_v40  ;;  %3070 = vrcp.f32 %v1363_v50  ;;  %vm1371_vm7 = vmor %vm1369_vm6, %vm1370_vm5  ;;  %v1390_v63 = vand.u32 2147483648, %v1363_v50  ;;  %v1388_v0 = vand.u32 2147483647, %v1363_v50 }
 0x310   :  { %v1366_v13 = vsub.f32 1.0, %v1365_v14  ;;  %v1397_v46 = vmul.f32 %v1354_v36, %v3711_v45  ;;  %v3891_v53 = vadd.f32 %v1398_v52, %v1396_v51  ;;  %v1373_v45 = vand.u32 2147483647, %v3831_v24  ;;  %v2968_v14 = vld [vmem:[%s4476_s2 + $0x8] sm:$0xff] }
 0x311   :  { %vm1384_vm10 = vweird.f32 %v1363_v50  ;;  %v1391_v55 = vor.u32 1.1754944e-38, %v1390_v63  ;;  %vm1389_vm12 = vcmp.eq.f32.partialorder %v1388_v0, 8.507059e+37 }
 0x312   :  { %v1367_v61 = vmul.f32 %v3069_v4, %v1366_v13  ;;  %v3893_v54 = vadd.f32 %v1399_v44, %v1397_v46  ;;  %3072 = vtanh.f32 %v3891_v53  ;;  %vm1374_vm9 = vcmp.eq.f32.partialorder %v1373_v45, 8.507059e+37  ;;  %v2970_v13 = vld [vmem:[%s4476_s2 + $0x18] sm:$0xff] }
 0x314   :  { %v1368_v58 = vadd.f32 %v3069_v4, %v1367_v61  ;;  %3074 = vtanh.f32 %v3893_v54  ;;  %v366_v12 = vpop.f32.mrf.mxu3 }
 0x315   :  { %v3071_v22 = vpop.eup %3070 }
 0x316   :  { %v1380_v35 = vmul.f32 %v3071_v22, %v1363_v50  ;;  %v1372_v38 = vsel %vm1371_vm7, %v3069_v4, %v1368_v58  ;;  %vm1385_vm8 = vweird.f32 %v3071_v22  ;;  %v2967_v4 = vld [vmem:[%s4476_s2] sm:$0xff] }
 0x317   :  { %v1377_v59 = vsel %vm1374_vm9, %v1376_v57, %v1372_v38  ;;  %vm1386_vm11 = vmor %vm1384_vm10, %vm1385_vm8 }
 0x318   :  { %v1381_v16 = vsub.f32 1.0, %v1380_v35  ;;  %v3073_v3 = vpop.eup %3072 }
 0x319   :  { %v1406_v5 = vmul.f32 %v3073_v3, %v1377_v59 }
 0x31a   :  { %v1382_v56 = vmul.f32 %v3071_v22, %v1381_v16  ;;  %v3075_v24 = vpop.eup %3074 }
 0x31c   :  { %v1383_v43 = vadd.f32 %v3071_v22, %v1382_v56  ;;  %v368_v50 = vpop.f32.mrf.mxu3 }
 0x31e   :  { %v1387_v41 = vsel %vm1386_vm11, %v3071_v22, %v1383_v43 }
 0x31f   :  { %v1392_v32 = vsel %vm1389_vm12, %v1391_v55, %v1387_v41 }
 0x320   :  { %v1407_v49 = vmul.f32 %v3075_v24, %v1392_v32 }
 0x322   :  { %v1412_v40 = vpack.c.bf16 %v1407_v49, %v1406_v5 }
 0x324   :  { %1468 = vmatpush.bf16.msra.mxu3 %v1412_v40  ;;  %v371_v60 = vpop.f32.mrf.mxu3 }
 0x327   :  { %2831 = vmatmul.msk.bf16.vlgmr.msra.gmra.mxu3 %vm79_vm0, %v2967_v4 }
 0x32c   :  { %v373_v36 = vpop.f32.mrf.mxu3 }
 0x334   :  { %v376_v21 = vpop.f32.mrf.mxu3 }
 0x337   :  { %2832 = vmatmul.msk.bf16.gmra.mxu3 %vm79_vm0, %v2968_v14 }
 0x33c   :  { %v378_v51 = vpop.f32.mrf.mxu3 }
 0x344   :  { %v3918_v62 = vpop.f32.mrf.mxu3 }
 0x347   :  { %2833 = vmatmul.msk.bf16.gmra.mxu3 %vm79_vm0, %v2969_v26 }
 0x34c   :  { %v3920_v46 = vpop.f32.mrf.mxu3 }
 0x34d   :  { %4503 = vst [vmem:[#allocation10_spill] sm:$0xff] %v3920_v46 }
 0x354   :  { %v3922_v52 = vpop.f32.mrf.mxu3 }
 0x357   :  { %2834 = vmatmul.msk.bf16.gmra.mxu3 %vm79_vm0, %v2970_v13 }
 0x35c   :  { %v3924_v61 = vpop.f32.mrf.mxu3 }
 0x364   :  { %v3926_v44 = vpop.f32.mrf.mxu3 }
 0x36c   :  { %v3928_v22 = vpop.f32.mrf.mxu3 }
 0x374   :  { %v3930_v58 = vpop.f32.mrf.mxu3 }
 0x37c   :  { %v3932_v35 = vpop.f32.mrf.mxu3 }
 0x37d   :  { %4504 = vst [vmem:[#allocation11_spill] sm:$0xff] %v3932_v35 }
 0x3aa   :  { %v1470_v47 = vpop.f32.mrf.mxu3 }
 0x3b2   :  { %v1472_v45 = vpop.f32.mrf.mxu3 }
 0x3ba   :  { %v1475_v16 = vpop.f32.mrf.mxu3 }
 0x3bb   :  { %v1492_v63 = vadd.f32 %v1475_v16, %v366_v12 }
 0x3bd   :  { %v1504_v38 = vsub.f32 0.0, %v1492_v63 }
 0x3bf   :  { %v1506_v57 = vmul.f32 1.442695, %v1504_v38 }
 0x3c1   :  { %3076 = vpow2.f32 %v1506_v57 }
 0x3c2   :  { %v1477_v56 = vpop.f32.mrf.mxu3 }
 0x3c3   :  { %v1493_v0 = vadd.f32 %v1477_v56, %v368_v50 }
 0x3c5   :  { %v1505_v43 = vsub.f32 0.0, %v1493_v0 }
 0x3c7   :  { %v1508_v59 = vmul.f32 1.442695, %v1505_v43  ;;  %v3077_v24 = vpop.eup %3076 }
 0x3c8   :  { %v3934_v49 = vadd.f32 1.0, %v3077_v24  ;;  %v1491_v24 = vadd.f32 %v1472_v45, %v3895_v20 }
 0x3c9   :  { %3078 = vpow2.f32 %v1508_v59 }
 0x3ca   :  { %v1480_v55 = vpop.f32.mrf.mxu3  ;;  %vm1517_vm13 = vweird.f32 %v3934_v49 }
 0x3cb   :  { %v1494_v3 = vadd.f32 %v1480_v55, %v371_v60 }
 0x3cd   :  { %v1542_v41 = vsub.f32 0.0, %v1494_v3  ;;  %v1490_v3 = vadd.f32 %v1470_v47, %v3878_v1 }
 0x3cf   :  { %v1544_v32 = vmul.f32 1.442695, %v1542_v41  ;;  %v3079_v5 = vpop.eup %3078 }
 0x3d0   :  { %v3936_v4 = vadd.f32 1.0, %v3079_v5 }
 0x3d1   :  { %3080 = vpow2.f32 %v1544_v32 }
 0x3d2   :  { %v1482_v40 = vpop.f32.mrf.mxu3  ;;  %3082 = vrcp.f32 %v3934_v49  ;;  %vm1532_vm7 = vweird.f32 %v3936_v4 }
 0x3d3   :  { %v1495_v12 = vadd.f32 %v1482_v40, %v373_v36  ;;  %3084 = vrcp.f32 %v3936_v4 }
 0x3d5   :  { %v1543_v14 = vsub.f32 0.0, %v1495_v12  ;;  %v3960_v12 = vld [vmem:[#allocation4] sm:$0xff] }
 0x3d6   :  { %v1500_v1 = vadd.f32 %v3960_v12, %v1490_v3 }
 0x3d7   :  { %v3081_v50 = vpop.eup %3080  ;;  %v1546_v26 = vmul.f32 1.442695, %v1543_v14  ;;  %v3962_v14 = vld [vmem:[#allocation4 + $0x8] sm:$0xff] }
 0x3d8   :  { %v3940_v13 = vadd.f32 1.0, %v3081_v50  ;;  %v3943_v63 = vpop.eup %3082  ;;  %v3968_v47 = vadd.f32 %v3962_v14, %v1491_v24 }
 0x3d9   :  { %3086 = vpow2.f32 %v1546_v26  ;;  %v3945_v38 = vpop.eup %3084  ;;  %v1513_v0 = vmul.f32 %v3943_v63, %v3934_v49  ;;  %vm1518_vm15 = vweird.f32 %v3943_v63 }
 0x3da   :  { %3088 = vrcp.f32 %v3940_v13  ;;  %v1485_v60 = vpop.f32.mrf.mxu3  ;;  %v1528_v59 = vmul.f32 %v3945_v38, %v3936_v4  ;;  %vm1555_vm2 = vweird.f32 %v3940_v13  ;;  %vm1533_vm3 = vweird.f32 %v3945_v38  ;;  %vm4005_vm6 = vmor %vm1517_vm13, %vm1518_vm15 }
 0x3db   :  { %v1496_v16 = vadd.f32 %v1485_v60, %v376_v21  ;;  %v1514_v32 = vsub.f32 1.0, %v1513_v0  ;;  %vm4016_vm8 = vmor %vm1532_vm7, %vm1533_vm3 }
 0x3dc   :  { %v1529_v50 = vsub.f32 1.0, %v1528_v59 }
 0x3dd   :  { %v1580_v56 = vsub.f32 0.0, %v1496_v16  ;;  %v1521_v16 = vand.u32 2147483647, %v3934_v49  ;;  %v1515_v20 = vmul.f32 %v3943_v63, %v1514_v32  ;;  %v1559_v32 = vand.u32 2147483647, %v3940_v13 }
 0x3de   :  { %v1530_v0 = vmul.f32 %v3945_v38, %v1529_v50  ;;  %v1538_v50 = vand.u32 2147483648, %v3936_v4 }
 0x3df   :  { %v3087_v36 = vpop.eup %3086  ;;  %v1582_v57 = vmul.f32 1.442695, %v1580_v56  ;;  %vm3980_vm1 = vcmp.eq.f32.partialorder %v1521_v16, 8.507059e+37  ;;  %v1516_v24 = vadd.f32 %v3943_v63, %v1515_v20  ;;  %vm1560_vm9 = vcmp.eq.f32.partialorder %v1559_v32, 8.507059e+37 }
 0x3e0   :  { %v3949_v43 = vpop.eup %3088  ;;  %v3953_v55 = vadd.f32 1.0, %v3087_v36  ;;  %v1523_v36 = vand.u32 2147483648, %v3934_v49 }
 0x3e1   :  { %v1551_v21 = vmul.f32 %v3949_v43, %v3940_v13  ;;  %3090 = vpow2.f32 %v1582_v57  ;;  %vm1556_vm14 = vweird.f32 %v3949_v43 }
 0x3e2   :  { %3092 = vrcp.f32 %v3953_v55  ;;  %v1487_v41 = vpop.f32.mrf.mxu3  ;;  %vm3992_vm4 = vmor %vm1555_vm2, %vm1556_vm14  ;;  %vm1570_vm10 = vweird.f32 %v3953_v55 }
 0x3e3   :  { %v1552_v5 = vsub.f32 1.0, %v1551_v21  ;;  %v1497_v40 = vadd.f32 %v1487_v41, %v378_v51  ;;  %v1561_v41 = vand.u32 2147483648, %v3940_v13  ;;  %v1574_v13 = vand.u32 2147483647, %v3953_v55 }
 0x3e5   :  { %v1553_v26 = vmul.f32 %v3949_v43, %v1552_v5  ;;  %v1581_v60 = vsub.f32 0.0, %v1497_v40  ;;  %v1531_v40 = vadd.f32 %v3945_v38, %v1530_v0  ;;  %v1536_v0 = vand.u32 2147483647, %v3936_v4 }
 0x3e6   :  { %vm1575_vm12 = vcmp.eq.f32.partialorder %v1574_v13, 8.507059e+37 }
 0x3e7   :  { %v3091_v56 = vpop.eup %3090  ;;  %v1584_v45 = vmul.f32 1.442695, %v1581_v60  ;;  %v1554_v59 = vadd.f32 %v3949_v43, %v1553_v26  ;;  %v1576_v60 = vand.u32 2147483648, %v3953_v55  ;;  %v1535_v4 = vsel %vm4016_vm8, %v3945_v38, %v1531_v40 }
 0x3e8   :  { %v3093_v51 = vpop.eup %3092  ;;  %v3974_v57 = vadd.f32 1.0, %v3091_v56  ;;  %vm1537_vm13 = vcmp.eq.f32.partialorder %v1536_v0, 8.507059e+37 }
 0x3e9   :  { %v1566_v21 = vmul.f32 %v3093_v51, %v3953_v55  ;;  %3094 = vpow2.f32 %v1584_v45  ;;  %v1558_v16 = vsel %vm3992_vm4, %v3949_v43, %v1554_v59  ;;  %vm1571_vm5 = vweird.f32 %v3093_v51 }
 0x3ea   :  { %3096 = vrcp.f32 %v3974_v57  ;;  %v1524_v45 = vor.u32 1.1754944e-38, %v1523_v36  ;;  %v1520_v43 = vsel %vm4005_vm6, %v3943_v63, %v1516_v24  ;;  %vm1572_vm11 = vmor %vm1570_vm10, %vm1571_vm5  ;;  %v1539_v24 = vor.u32 1.1754944e-38, %v1538_v50 }
 0x3eb   :  { %v1567_v5 = vsub.f32 1.0, %v1566_v21  ;;  %v1562_v21 = vor.u32 1.1754944e-38, %v1561_v41  ;;  %vm1593_vm15 = vweird.f32 %v3974_v57 }
 0x3ec   :  { %v1525_v32 = vsel %vm3980_vm1, %v1524_v45, %v1520_v43  ;;  %v1540_v35 = vsel %vm1537_vm13, %v1539_v24, %v1535_v4 }
 0x3ed   :  { %v1568_v56 = vmul.f32 %v3093_v51, %v1567_v5  ;;  %v1563_v41 = vsel %vm1560_vm9, %v1562_v21, %v1558_v16  ;;  %v1577_v5 = vor.u32 1.1754944e-38, %v1576_v60  ;;  %v1503_v16 = vmax.f32 %v3968_v47, 0.0 }
 0x3ee   :  { %v1620_v38 = vmul.f32 %v1563_v41, %v3891_v53  ;;  %v1597_v53 = vand.u32 2147483647, %v3974_v57 }
 0x3ef   :  { %v3095_v26 = vpop.eup %3094  ;;  %v1569_v49 = vadd.f32 %v3093_v51, %v1568_v56  ;;  %v1502_v56 = vmax.f32 %v1500_v1, 0.0  ;;  %v1623_v13 = vmul.f32 %v1540_v35, %v1503_v16  ;;  %v1599_v1 = vand.u32 2147483648, %v3974_v57 }
 0x3f0   :  { %v3097_v36 = vpop.eup %3096  ;;  %v1587_v63 = vadd.f32 1.0, %v3095_v26  ;;  %vm1598_vm3 = vcmp.eq.f32.partialorder %v1597_v53, 8.507059e+37 }
 0x3f1   :  { %v1573_v20 = vsel %vm1572_vm11, %v3093_v51, %v1569_v49  ;;  %v1589_v46 = vmul.f32 %v3097_v36, %v3974_v57  ;;  %v1622_v50 = vmul.f32 %v1525_v32, %v1502_v56  ;;  %vm1594_vm14 = vweird.f32 %v3097_v36 }
 0x3f2   :  { %v1578_v55 = vsel %vm1575_vm12, %v1577_v5, %v1573_v20  ;;  %3098 = vrcp.f32 %v1587_v63  ;;  %vm1595_vm1 = vmor %vm1593_vm15, %vm1594_vm14  ;;  %v1612_v43 = vand.u32 2147483647, %v1587_v63  ;;  %v1600_v59 = vor.u32 1.1754944e-38, %v1599_v1 }
 0x3f3   :  { %v1590_v40 = vsub.f32 1.0, %v1589_v46  ;;  %v1621_v60 = vmul.f32 %v1578_v55, %v3893_v54  ;;  %v4031_v21 = vadd.f32 %v1622_v50, %v1620_v38  ;;  %v1614_v46 = vand.u32 2147483648, %v1587_v63  ;;  %v2973_v38 = vld [vmem:[%s4476_s2 + $0x10] sm:$0xff] }
 0x3f4   :  { %vm1608_vm4 = vweird.f32 %v1587_v63  ;;  %vm1613_vm6 = vcmp.eq.f32.partialorder %v1612_v43, 8.507059e+37 }
 0x3f5   :  { %v1591_v51 = vmul.f32 %v3097_v36, %v1590_v40  ;;  %v4033_v3 = vadd.f32 %v1623_v13, %v1621_v60  ;;  %3100 = vtanh.f32 %v4031_v21  ;;  %v1615_v41 = vor.u32 1.1754944e-38, %v1614_v46  ;;  %v2974_v40 = vld [vmem:[%s4476_s2 + $0x18] sm:$0xff] }
 0x3f7   :  { %v1592_v45 = vadd.f32 %v3097_v36, %v1591_v51  ;;  %3102 = vtanh.f32 %v4033_v3 }
 0x3f8   :  { %v3099_v26 = vpop.eup %3098 }
 0x3f9   :  { %v1604_v0 = vmul.f32 %v3099_v26, %v1587_v63  ;;  %v1596_v35 = vsel %vm1595_vm1, %v3097_v36, %v1592_v45  ;;  %vm1609_vm2 = vweird.f32 %v3099_v26  ;;  %v2971_v36 = vld [vmem:[%s4476_s2] sm:$0xff]  ;;  %v2972_v63 = vld [vmem:[%s4476_s2 + $0x8] sm:$0xff] }
 0x3fa   :  { %v1601_v4 = vsel %vm1598_vm3, %v1600_v59, %v1596_v35  ;;  %vm1610_vm5 = vmor %vm1608_vm4, %vm1609_vm2 }
 0x3fb   :  { %v1605_v54 = vsub.f32 1.0, %v1604_v0  ;;  %v3101_v5 = vpop.eup %3100 }
 0x3fc   :  { %v1630_v32 = vmul.f32 %v3101_v5, %v1601_v4 }
 0x3fd   :  { %v1606_v47 = vmul.f32 %v3099_v26, %v1605_v54  ;;  %v3103_v57 = vpop.eup %3102 }
 0x3ff   :  { %v1607_v49 = vadd.f32 %v3099_v26, %v1606_v47 }
 0x401   :  { %v1611_v24 = vsel %vm1610_vm5, %v3099_v26, %v1607_v49 }
 0x402   :  { %v1616_v20 = vsel %vm1613_vm6, %v1615_v41, %v1611_v24 }
 0x403   :  { %v1631_v55 = vmul.f32 %v3103_v57, %v1616_v20 }
 0x405   :  { %v1636_v56 = vpack.c.bf16 %v1631_v55, %v1630_v32 }
 0x407   :  { %1692 = vmatpush.bf16.msrb.mxu0 %v1636_v56 }
 0x40a   :  { %2851 = vmatmul.msk.bf16.vlgmr.msrb.gmra.mxu0 %vm79_vm0, %v2971_v36 }
 0x41a   :  { %2852 = vmatmul.msk.bf16.gmra.mxu0 %vm79_vm0, %v2972_v63 }
 0x42a   :  { %2853 = vmatmul.msk.bf16.gmra.mxu0 %vm79_vm0, %v2973_v38 }
 0x43a   :  { %2854 = vmatmul.msk.bf16.gmra.mxu0 %vm79_vm0, %v2974_v40 }
 0x487   :  { %v1694_v16 = vpop.f32.mrf.mxu0 }
 0x48f   :  { %v1696_v60 = vpop.f32.mrf.mxu0 }
 0x497   :  { %v1699_v50 = vpop.f32.mrf.mxu0 }
 0x498   :  { %v1716_v51 = vadd.f32 %v1699_v50, %v3381_v28 }
 0x49a   :  { %v1728_v13 = vsub.f32 0.0, %v1716_v51 }
 0x49c   :  { %v1730_v0 = vmul.f32 1.442695, %v1728_v13 }
 0x49e   :  { %3104 = vpow2.f32 %v1730_v0 }
 0x49f   :  { %v1701_v26 = vpop.f32.mrf.mxu0 }
 0x4a0   :  { %v1717_v45 = vadd.f32 %v1701_v26, %v3386_v30  ;;  %v1715_v26 = vadd.f32 %v1696_v60, %v3378_v27 }
 0x4a2   :  { %v1729_v1 = vsub.f32 0.0, %v1717_v45 }
 0x4a4   :  { %v1732_v53 = vmul.f32 1.442695, %v1729_v1  ;;  %v3105_v47 = vpop.eup %3104 }
 0x4a5   :  { %v4059_v49 = vadd.f32 1.0, %v3105_v47 }
 0x4a6   :  { %3106 = vpow2.f32 %v1732_v53 }
 0x4a7   :  { %v1704_v54 = vpop.f32.mrf.mxu0  ;;  %vm1741_vm7 = vweird.f32 %v4059_v49  ;;  %v1747_v27 = vand.u32 2147483648, %v4059_v49 }
 0x4a8   :  { %v1718_v46 = vadd.f32 %v1704_v54, %v3389_v31 }
 0x4aa   :  { %v1766_v35 = vsub.f32 0.0, %v1718_v46 }
 0x4ac   :  { %v1768_v43 = vmul.f32 1.442695, %v1766_v35  ;;  %v3107_v59 = vpop.eup %3106  ;;  %v1745_v35 = vand.u32 2147483647, %v4059_v49 }
 0x4ad   :  { %v4061_v4 = vadd.f32 1.0, %v3107_v59  ;;  %v4088_v59 = vadd.f32 %v1715_v26, %v3962_v14  ;;  %v1748_v26 = vor.u32 1.1754944e-38, %v1747_v27 }
 0x4ae   :  { %3108 = vpow2.f32 %v1768_v43  ;;  %vm4098_vm10 = vcmp.eq.f32.partialorder %v1745_v35, 8.507059e+37 }
 0x4af   :  { %v1706_v28 = vpop.f32.mrf.mxu0  ;;  %3110 = vrcp.f32 %v4059_v49  ;;  %vm1756_vm1 = vweird.f32 %v4061_v4 }
 0x4b0   :  { %v1719_v30 = vadd.f32 %v1706_v28, %v3394_v33  ;;  %3112 = vrcp.f32 %v4061_v4 }
 0x4b2   :  { %v1767_v41 = vsub.f32 0.0, %v1719_v30 }
 0x4b4   :  { %v3109_v5 = vpop.eup %3108  ;;  %v1770_v24 = vmul.f32 1.442695, %v1767_v41 }
 0x4b5   :  { %v4066_v31 = vadd.f32 1.0, %v3109_v5  ;;  %v4070_v32 = vpop.eup %3110 }
 0x4b6   :  { %3114 = vpow2.f32 %v1770_v24  ;;  %v4072_v55 = vpop.eup %3112  ;;  %v1737_v36 = vmul.f32 %v4070_v32, %v4059_v49  ;;  %vm1742_vm9 = vweird.f32 %v4070_v32 }
 0x4b7   :  { %3116 = vrcp.f32 %v4066_v31  ;;  %v1709_v57 = vpop.f32.mrf.mxu0  ;;  %v1752_v40 = vmul.f32 %v4072_v55, %v4061_v4  ;;  %v1785_v24 = vand.u32 2147483648, %v4066_v31  ;;  %vm1779_vm11 = vweird.f32 %v4066_v31  ;;  %vm4122_vm15 = vmor %vm1741_vm7, %vm1742_vm9 }
 0x4b8   :  { %v1720_v20 = vadd.f32 %v1709_v57, %v3397_v34  ;;  %v1714_v34 = vadd.f32 %v1694_v16, %v3373_v25  ;;  %v1738_v45 = vsub.f32 1.0, %v1737_v36  ;;  %vm1757_vm12 = vweird.f32 %v4072_v55 }
 0x4b9   :  { %v1753_v53 = vsub.f32 1.0, %v1752_v40  ;;  %v1762_v36 = vand.u32 2147483648, %v4061_v4  ;;  %vm4133_vm2 = vmor %vm1756_vm1, %vm1757_vm12 }
 0x4ba   :  { %v1804_v33 = vsub.f32 0.0, %v1720_v20  ;;  %v1724_v43 = vadd.f32 %v1714_v34, %v3960_v12  ;;  %v1739_v25 = vmul.f32 %v4070_v32, %v1738_v45  ;;  %v1783_v20 = vand.u32 2147483647, %v4066_v31 }
 0x4bb   :  { %v1760_v45 = vand.u32 2147483647, %v4061_v4 }
 0x4bc   :  { %v3115_v56 = vpop.eup %3114  ;;  %v1806_v63 = vmul.f32 1.442695, %v1804_v33  ;;  %v1740_v57 = vadd.f32 %v4070_v32, %v1739_v25  ;;  %vm1784_vm3 = vcmp.eq.f32.partialorder %v1783_v20, 8.507059e+37 }
 0x4bd   :  { %v3117_v38 = vpop.eup %3116  ;;  %v4078_v50 = vadd.f32 1.0, %v3115_v56  ;;  %vm1761_vm7 = vcmp.eq.f32.partialorder %v1760_v45, 8.507059e+37 }
 0x4be   :  { %v1775_v51 = vmul.f32 %v3117_v38, %v4066_v31  ;;  %3118 = vpow2.f32 %v1806_v63  ;;  %vm1780_vm8 = vweird.f32 %v3117_v38 }
 0x4bf   :  { %3120 = vrcp.f32 %v4078_v50  ;;  %v1711_v13 = vpop.f32.mrf.mxu0  ;;  %vm4110_vm13 = vmor %vm1779_vm11, %vm1780_vm8  ;;  %v1800_v40 = vand.u32 2147483648, %v4078_v50  ;;  %v1798_v31 = vand.u32 2147483647, %v4078_v50  ;;  %vm1794_vm4 = vweird.f32 %v4078_v50 }
 0x4c0   :  { %v1776_v0 = vsub.f32 1.0, %v1775_v51  ;;  %v1721_v1 = vadd.f32 %v1711_v13, %v3405_v37  ;;  %v1754_v37 = vmul.f32 %v4072_v55, %v1753_v53 }
 0x4c1   :  { %v1801_v35 = vor.u32 1.1754944e-38, %v1800_v40  ;;  %vm1799_vm6 = vcmp.eq.f32.partialorder %v1798_v31, 8.507059e+37 }
 0x4c2   :  { %v1777_v54 = vmul.f32 %v3117_v38, %v1776_v0  ;;  %v1805_v46 = vsub.f32 0.0, %v1721_v1  ;;  %v1755_v56 = vadd.f32 %v4072_v55, %v1754_v37  ;;  %v1786_v0 = vor.u32 1.1754944e-38, %v1785_v24 }
 0x4c3   :  { %v1726_v37 = vmax.f32 %v1724_v43, 0.0  ;;  %v1727_v24 = vmax.f32 %v4088_v59, 0.0 }
 0x4c4   :  { %v3119_v47 = vpop.eup %3118  ;;  %v1808_v16 = vmul.f32 1.442695, %v1805_v46  ;;  %v1778_v30 = vadd.f32 %v3117_v38, %v1777_v54  ;;  %v1759_v4 = vsel %vm4133_vm2, %v4072_v55, %v1755_v56 }
 0x4c5   :  { %v3121_v28 = vpop.eup %3120  ;;  %v4094_v60 = vadd.f32 1.0, %v3119_v47  ;;  %v1763_v47 = vor.u32 1.1754944e-38, %v1762_v36 }
 0x4c6   :  { %v1790_v41 = vmul.f32 %v3121_v28, %v4078_v50  ;;  %3122 = vpow2.f32 %v1808_v16  ;;  %v1782_v51 = vsel %vm4110_vm13, %v3117_v38, %v1778_v30  ;;  %vm1795_vm14 = vweird.f32 %v3121_v28 }
 0x4c7   :  { %3124 = vrcp.f32 %v4094_v60  ;;  %v1744_v38 = vsel %vm4122_vm15, %v4070_v32, %v1740_v57  ;;  %v1787_v46 = vsel %vm1784_vm3, %v1786_v0, %v1782_v51  ;;  %vm1796_vm5 = vmor %vm1794_vm4, %vm1795_vm14  ;;  %v1764_v30 = vsel %vm1761_vm7, %v1763_v47, %v1759_v4  ;;  %v2978_v47 = vld [vmem:[%s4476_s2 + $0x18] sm:$0xff] }
 0x4c8   :  { %v1791_v33 = vsub.f32 1.0, %v1790_v41  ;;  %v1749_v27 = vsel %vm4098_vm10, %v1748_v26, %v1744_v38  ;;  %v1844_v55 = vmul.f32 %v1787_v46, %v4031_v21  ;;  %v1823_v43 = vand.u32 2147483648, %v4094_v60 }
 0x4c9   :  { %v1846_v20 = vmul.f32 %v1749_v27, %v1726_v37  ;;  %vm1817_vm9 = vweird.f32 %v4094_v60  ;;  %v1821_v21 = vand.u32 2147483647, %v4094_v60 }
 0x4ca   :  { %v1792_v34 = vmul.f32 %v3121_v28, %v1791_v33  ;;  %v1847_v33 = vmul.f32 %v1764_v30, %v1727_v24  ;;  %v1824_v13 = vor.u32 1.1754944e-38, %v1823_v43 }
 0x4cb   :  { %v4148_v56 = vadd.f32 %v1846_v20, %v1844_v55  ;;  %vm1822_vm12 = vcmp.eq.f32.partialorder %v1821_v21, 8.507059e+37 }
 0x4cc   :  { %v3123_v1 = vpop.eup %3122  ;;  %v1793_v49 = vadd.f32 %v3121_v28, %v1792_v34 }
 0x4cd   :  { %v3125_v54 = vpop.eup %3124  ;;  %v1811_v32 = vadd.f32 1.0, %v3123_v1 }
 0x4ce   :  { %v1797_v25 = vsel %vm1796_vm5, %v3121_v28, %v1793_v49  ;;  %v1813_v16 = vmul.f32 %v3125_v54, %v4094_v60  ;;  %vm1818_vm8 = vweird.f32 %v3125_v54 }
 0x4cf   :  { %v1802_v50 = vsel %vm1799_vm6, %v1801_v35, %v1797_v25  ;;  %3126 = vrcp.f32 %v1811_v32  ;;  %vm1819_vm10 = vmor %vm1817_vm9, %vm1818_vm8  ;;  %v1838_v59 = vand.u32 2147483648, %v1811_v32  ;;  %v1836_v31 = vand.u32 2147483647, %v1811_v32  ;;  %v2976_v35 = vld [vmem:[%s4476_s2 + $0x8] sm:$0xff] }
 0x4d0   :  { %v1814_v41 = vsub.f32 1.0, %v1813_v16  ;;  %v1845_v57 = vmul.f32 %v1802_v50, %v4033_v3  ;;  %3128 = vtanh.f32 %v4148_v56  ;;  %vm1832_vm13 = vweird.f32 %v1811_v32 }
 0x4d1   :  { %v1839_v0 = vor.u32 1.1754944e-38, %v1838_v59  ;;  %vm1837_vm15 = vcmp.eq.f32.partialorder %v1836_v31, 8.507059e+37 }
 0x4d2   :  { %v1815_v28 = vmul.f32 %v3125_v54, %v1814_v41  ;;  %v4150_v5 = vadd.f32 %v1847_v33, %v1845_v57 }
 0x4d4   :  { %v1816_v63 = vadd.f32 %v3125_v54, %v1815_v28  ;;  %3130 = vtanh.f32 %v4150_v5 }
 0x4d5   :  { %v3127_v36 = vpop.eup %3126 }
 0x4d6   :  { %v1828_v40 = vmul.f32 %v3127_v36, %v1811_v32  ;;  %v1820_v51 = vsel %vm1819_vm10, %v3125_v54, %v1816_v63  ;;  %vm1833_vm11 = vweird.f32 %v3127_v36  ;;  %v3129_v1 = vpop.eup %3128  ;;  %v2975_v54 = vld [vmem:[%s4476_s2] sm:$0xff]  ;;  %v2977_v32 = vld [vmem:[%s4476_s2 + $0x10] sm:$0xff] }
 0x4d7   :  { %v1825_v45 = vsel %vm1822_vm12, %v1824_v13, %v1820_v51  ;;  %vm1834_vm14 = vmor %vm1832_vm13, %vm1833_vm11 }
 0x4d8   :  { %v1829_v3 = vsub.f32 1.0, %v1828_v40  ;;  %v1854_v49 = vmul.f32 %v3129_v1, %v1825_v45 }
 0x4da   :  { %v1830_v34 = vmul.f32 %v3127_v36, %v1829_v3  ;;  %v3131_v60 = vpop.eup %3130 }
 0x4dc   :  { %v1831_v26 = vadd.f32 %v3127_v36, %v1830_v34 }
 0x4de   :  { %v1835_v38 = vsel %vm1834_vm14, %v3127_v36, %v1831_v26 }
 0x4df   :  { %v1840_v53 = vsel %vm1837_vm15, %v1839_v0, %v1835_v38 }
 0x4e0   :  { %v1855_v4 = vmul.f32 %v3131_v60, %v1840_v53 }
 0x4e2   :  { %v1860_v46 = vpack.c.bf16 %v1855_v4, %v1854_v49 }
 0x4e4   :  { %1916 = vmatpush.bf16.msrb.mxu1 %v1860_v46 }
 0x4e7   :  { %2871 = vmatmul.msk.bf16.vlgmr.msrb.gmra.mxu1 %vm79_vm0, %v2975_v54 }
 0x4f7   :  { %2872 = vmatmul.msk.bf16.gmra.mxu1 %vm79_vm0, %v2976_v35 }
 0x507   :  { %2873 = vmatmul.msk.bf16.gmra.mxu1 %vm79_vm0, %v2977_v32 }
 0x517   :  { %2874 = vmatmul.msk.bf16.gmra.mxu1 %vm79_vm0, %v2978_v47 }
 0x564   :  { %v1918_v25 = vpop.f32.mrf.mxu1 }
 0x56c   :  { %v1920_v16 = vpop.f32.mrf.mxu1 }
 0x56d   :  { %v1939_v46 = vadd.f32 %v1920_v16, %v3571_v7 }
 0x574   :  { %v1923_v27 = vpop.f32.mrf.mxu1 }
 0x575   :  { %v1940_v50 = vadd.f32 %v1923_v27, %v3574_v8 }
 0x577   :  { %v1952_v37 = vsub.f32 0.0, %v1940_v50 }
 0x579   :  { %v1954_v41 = vmul.f32 1.442695, %v1952_v37 }
 0x57b   :  { %3132 = vpow2.f32 %v1954_v41  ;;  %v4205_v41 = vadd.f32 %v1939_v46, %v3962_v14 }
 0x57c   :  { %v1925_v30 = vpop.f32.mrf.mxu1 }
 0x57d   :  { %v1941_v55 = vadd.f32 %v1925_v30, %v3576_v9 }
 0x57f   :  { %v1953_v24 = vsub.f32 0.0, %v1941_v55 }
 0x581   :  { %v1956_v57 = vmul.f32 1.442695, %v1953_v24  ;;  %v3133_v36 = vpop.eup %3132 }
 0x582   :  { %v4176_v43 = vadd.f32 1.0, %v3133_v36 }
 0x583   :  { %3134 = vpow2.f32 %v1956_v57 }
 0x584   :  { %v1928_v20 = vpop.f32.mrf.mxu1  ;;  %v1969_v37 = vand.u32 2147483647, %v4176_v43  ;;  %vm1965_vm1 = vweird.f32 %v4176_v43  ;;  %v1971_v7 = vand.u32 2147483648, %v4176_v43 }
 0x585   :  { %v1942_v28 = vadd.f32 %v1928_v20, %v3578_v10 }
 0x586   :  { %vm4215_vm4 = vcmp.eq.f32.partialorder %v1969_v37, 8.507059e+37  ;;  %v1951_v37 = vmax.f32 %v4205_v41, 0.0 }
 0x587   :  { %v1990_v33 = vsub.f32 0.0, %v1942_v28 }
 0x589   :  { %v1992_v63 = vmul.f32 1.442695, %v1990_v33  ;;  %v3135_v40 = vpop.eup %3134 }
 0x58a   :  { %v4178_v21 = vadd.f32 1.0, %v3135_v40 }
 0x58b   :  { %3136 = vpow2.f32 %v1992_v63 }
 0x58c   :  { %v1930_v8 = vpop.f32.mrf.mxu1  ;;  %3138 = vrcp.f32 %v4176_v43  ;;  %vm1980_vm10 = vweird.f32 %v4178_v21 }
 0x58d   :  { %v1943_v9 = vadd.f32 %v1930_v8, %v3580_v11  ;;  %3140 = vrcp.f32 %v4178_v21 }
 0x58f   :  { %v1991_v3 = vsub.f32 0.0, %v1943_v9  ;;  %v1986_v9 = vand.u32 2147483648, %v4178_v21 }
 0x591   :  { %v3137_v59 = vpop.eup %3136  ;;  %v1994_v51 = vmul.f32 1.442695, %v1991_v3  ;;  %v1987_v46 = vor.u32 1.1754944e-38, %v1986_v9 }
 0x592   :  { %v4183_v10 = vadd.f32 1.0, %v3137_v59  ;;  %v4187_v13 = vpop.eup %3138 }
 0x593   :  { %3142 = vpow2.f32 %v1994_v51  ;;  %v4189_v26 = vpop.eup %3140  ;;  %v1961_v0 = vmul.f32 %v4187_v13, %v4176_v43  ;;  %vm1966_vm3 = vweird.f32 %v4187_v13 }
 0x594   :  { %3144 = vrcp.f32 %v4183_v10  ;;  %v1933_v34 = vpop.f32.mrf.mxu1  ;;  %v1976_v60 = vmul.f32 %v4189_v26, %v4178_v21  ;;  %v2009_v33 = vand.u32 2147483648, %v4183_v10  ;;  %vm2003_vm5 = vweird.f32 %v4183_v10  ;;  %vm4239_vm9 = vmor %vm1965_vm1, %vm1966_vm3 }
 0x595   :  { %v1944_v31 = vadd.f32 %v1933_v34, %v3586_v15  ;;  %v1938_v15 = vadd.f32 %v1918_v25, %v3565_v6  ;;  %v1962_v54 = vsub.f32 1.0, %v1961_v0  ;;  %v2007_v63 = vand.u32 2147483647, %v4183_v10 }
 0x596   :  { %v1977_v47 = vsub.f32 1.0, %v1976_v60  ;;  %vm1981_vm6 = vweird.f32 %v4189_v26  ;;  %v2010_v0 = vor.u32 1.1754944e-38, %v2009_v33 }
 0x597   :  { %v2028_v11 = vsub.f32 0.0, %v1944_v31  ;;  %v1948_v55 = vadd.f32 %v1938_v15, %v3960_v12  ;;  %v1963_v6 = vmul.f32 %v4187_v13, %v1962_v54  ;;  %vm4250_vm11 = vmor %vm1980_vm10, %vm1981_vm6  ;;  %vm2008_vm12 = vcmp.eq.f32.partialorder %v2007_v63, 8.507059e+37 }
 0x599   :  { %v3143_v45 = vpop.eup %3142  ;;  %v2030_v1 = vmul.f32 1.442695, %v2028_v11  ;;  %v1964_v36 = vadd.f32 %v4187_v13, %v1963_v6  ;;  %v1972_v11 = vor.u32 1.1754944e-38, %v1971_v7 }
 0x59a   :  { %v3145_v38 = vpop.eup %3144  ;;  %v4195_v53 = vadd.f32 1.0, %v3143_v45  ;;  %v1984_v45 = vand.u32 2147483647, %v4178_v21 }
 0x59b   :  { %v1999_v49 = vmul.f32 %v3145_v38, %v4183_v10  ;;  %3146 = vpow2.f32 %v2030_v1  ;;  %vm2004_vm2 = vweird.f32 %v3145_v38 }
 0x59c   :  { %3148 = vrcp.f32 %v4195_v53  ;;  %v1935_v4 = vpop.f32.mrf.mxu1  ;;  %vm4227_vm7 = vmor %vm2003_vm5, %vm2004_vm2  ;;  %v2024_v59 = vand.u32 2147483648, %v4195_v53  ;;  %v2022_v10 = vand.u32 2147483647, %v4195_v53  ;;  %vm2018_vm13 = vweird.f32 %v4195_v53 }
 0x59d   :  { %v2000_v35 = vsub.f32 1.0, %v1999_v49  ;;  %v1945_v32 = vadd.f32 %v1935_v4, %v3594_v18  ;;  %v1978_v18 = vmul.f32 %v4189_v26, %v1977_v47  ;;  %vm1985_vm1 = vcmp.eq.f32.partialorder %v1984_v45, 8.507059e+37  ;;  %v2979_v45 = vld [vmem:[%s4476_s2] sm:$0xff] }
 0x59e   :  { %v2025_v4 = vor.u32 1.1754944e-38, %v2024_v59  ;;  %vm2023_vm15 = vcmp.eq.f32.partialorder %v2022_v10, 8.507059e+37  ;;  %v1950_v47 = vmax.f32 %v1948_v55, 0.0 }
 0x59f   :  { %v2001_v27 = vmul.f32 %v3145_v38, %v2000_v35  ;;  %v2029_v50 = vsub.f32 0.0, %v1945_v32  ;;  %v1979_v8 = vadd.f32 %v4189_v26, %v1978_v18 }
 0x5a1   :  { %v3147_v30 = vpop.eup %3146  ;;  %v2032_v25 = vmul.f32 1.442695, %v2029_v50  ;;  %v2002_v57 = vadd.f32 %v3145_v38, %v2001_v27  ;;  %v1983_v21 = vsel %vm4250_vm11, %v4189_v26, %v1979_v8 }
 0x5a2   :  { %v3149_v24 = vpop.eup %3148  ;;  %v4211_v16 = vadd.f32 1.0, %v3147_v30  ;;  %v1988_v27 = vsel %vm1985_vm1, %v1987_v46, %v1983_v21 }
 0x5a3   :  { %v2014_v20 = vmul.f32 %v3149_v24, %v4195_v53  ;;  %3150 = vpow2.f32 %v2032_v25  ;;  %v2006_v51 = vsel %vm4227_vm7, %v3145_v38, %v2002_v57  ;;  %vm2019_vm8 = vweird.f32 %v3149_v24 }
 0x5a4   :  { %3152 = vrcp.f32 %v4211_v16  ;;  %v1968_v38 = vsel %vm4239_vm9, %v4187_v13, %v1964_v36  ;;  %v2011_v15 = vsel %vm2008_vm12, %v2010_v0, %v2006_v51  ;;  %vm2020_vm14 = vmor %vm2018_vm13, %vm2019_vm8  ;;  %v2047_v55 = vand.u32 2147483648, %v4211_v16  ;;  %v2980_v0 = vld [vmem:[%s4476_s2 + $0x8] sm:$0xff] }
 0x5a5   :  { %v2015_v40 = vsub.f32 1.0, %v2014_v20  ;;  %v1973_v32 = vsel %vm4215_vm4, %v1972_v11, %v1968_v38  ;;  %v2068_v26 = vmul.f32 %v2011_v15, %v4148_v56  ;;  %vm2041_vm3 = vweird.f32 %v4211_v16  ;;  %v2982_v38 = vld [vmem:[%s4476_s2 + $0x18] sm:$0xff] }
 0x5a6   :  { %v2070_v6 = vmul.f32 %v1973_v32, %v1950_v47  ;;  %v2045_v56 = vand.u32 2147483647, %v4211_v16 }
 0x5a7   :  { %v2016_v34 = vmul.f32 %v3149_v24, %v2015_v40  ;;  %v2048_v40 = vor.u32 1.1754944e-38, %v2047_v55 }
 0x5a8   :  { %v4265_v7 = vadd.f32 %v2070_v6, %v2068_v26  ;;  %vm2046_vm6 = vcmp.eq.f32.partialorder %v2045_v56, 8.507059e+37 }
 0x5a9   :  { %v3151_v1 = vpop.eup %3150  ;;  %v2017_v43 = vadd.f32 %v3149_v24, %v2016_v34 }
 0x5aa   :  { %v3153_v49 = vpop.eup %3152  ;;  %v2035_v13 = vadd.f32 1.0, %v3151_v1  ;;  %v2981_v1 = vld [vmem:[%s4476_s2 + $0x10] sm:$0xff] }
 0x5ab   :  { %v2021_v54 = vsel %vm2020_vm14, %v3149_v24, %v2017_v43  ;;  %v2037_v35 = vmul.f32 %v3153_v49, %v4211_v16  ;;  %v2071_v24 = vmul.f32 %v1988_v27, %v1951_v37  ;;  %vm2042_vm2 = vweird.f32 %v3153_v49 }
 0x5ac   :  { %v2026_v53 = vsel %vm2023_vm15, %v2025_v4, %v2021_v54  ;;  %3154 = vrcp.f32 %v2035_v13  ;;  %vm2043_vm4 = vmor %vm2041_vm3, %vm2042_vm2  ;;  %v2062_v41 = vand.u32 2147483648, %v2035_v13  ;;  %v2060_v63 = vand.u32 2147483647, %v2035_v13 }
 0x5ad   :  { %v2038_v50 = vsub.f32 1.0, %v2037_v35  ;;  %v2069_v30 = vmul.f32 %v2026_v53, %v4150_v5  ;;  %3156 = vtanh.f32 %v4265_v7  ;;  %vm2056_vm7 = vweird.f32 %v2035_v13 }
 0x5ae   :  { %v2063_v3 = vor.u32 1.1754944e-38, %v2062_v41  ;;  %vm2061_vm9 = vcmp.eq.f32.partialorder %v2060_v63, 8.507059e+37 }
 0x5af   :  { %v2039_v25 = vmul.f32 %v3153_v49, %v2038_v50  ;;  %v4267_v57 = vadd.f32 %v2071_v24, %v2069_v30 }
 0x5b1   :  { %v2040_v20 = vadd.f32 %v3153_v49, %v2039_v25  ;;  %3158 = vtanh.f32 %v4267_v57 }
 0x5b2   :  { %v3155_v18 = vpop.eup %3154 }
 0x5b3   :  { %v2052_v28 = vmul.f32 %v3155_v18, %v2035_v13  ;;  %v2044_v33 = vsel %vm2043_vm4, %v3153_v49, %v2040_v20  ;;  %vm2057_vm5 = vweird.f32 %v3155_v18  ;;  %v3157_v59 = vpop.eup %3156 }
 0x5b4   :  { %v2049_v9 = vsel %vm2046_vm6, %v2048_v40, %v2044_v33  ;;  %vm2058_vm8 = vmor %vm2056_vm7, %vm2057_vm5 }
 0x5b5   :  { %v2053_v5 = vsub.f32 1.0, %v2052_v28  ;;  %v2078_v10 = vmul.f32 %v3157_v59, %v2049_v9 }
 0x5b7   :  { %v2054_v36 = vmul.f32 %v3155_v18, %v2053_v5  ;;  %v3159_v16 = vpop.eup %3158 }
 0x5b9   :  { %v2055_v8 = vadd.f32 %v3155_v18, %v2054_v36 }
 0x5bb   :  { %v2059_v51 = vsel %vm2058_vm8, %v3155_v18, %v2055_v8 }
 0x5bc   :  { %v2064_v34 = vsel %vm2061_vm9, %v2063_v3, %v2059_v51 }
 0x5bd   :  { %v2079_v31 = vmul.f32 %v3159_v16, %v2064_v34 }
 0x5bf   :  { %v2084_v11 = vpack.c.bf16 %v2079_v31, %v2078_v10 }
 0x5c1   :  { %2140 = vmatpush.bf16.msrb.mxu2 %v2084_v11 }
 0x5c4   :  { %2891 = vmatmul.msk.bf16.vlgmr.msrb.gmra.mxu2 %vm79_vm0, %v2979_v45 }
 0x5d4   :  { %2892 = vmatmul.msk.bf16.gmra.mxu2 %vm79_vm0, %v2980_v0 }
 0x5e4   :  { %2893 = vmatmul.msk.bf16.gmra.mxu2 %vm79_vm0, %v2981_v1 }
 0x5f4   :  { %2894 = vmatmul.msk.bf16.gmra.mxu2 %vm79_vm0, %v2982_v38 }
 0x647   :  { %v2142_v60 = vpop.f32.mrf.mxu2 }
 0x64f   :  { %v2144_v43 = vpop.f32.mrf.mxu2 }
 0x650   :  { %v2163_v9 = vadd.f32 %v2144_v43, %v3754_v19 }
 0x652   :  { %v4322_v0 = vadd.f32 %v2163_v9, %v3962_v14 }
 0x657   :  { %v2147_v49 = vpop.f32.mrf.mxu2 }
 0x658   :  { %v2164_v21 = vadd.f32 %v2147_v49, %v3757_v17 }
 0x65a   :  { %v2176_v15 = vsub.f32 0.0, %v2164_v21 }
 0x65c   :  { %v2178_v46 = vmul.f32 1.442695, %v2176_v15 }
 0x65e   :  { %3160 = vpow2.f32 %v2178_v46 }
 0x65f   :  { %v2149_v4 = vpop.f32.mrf.mxu2 }
 0x660   :  { %v2165_v13 = vadd.f32 %v2149_v4, %v3759_v2 }
 0x662   :  { %v2177_v54 = vsub.f32 0.0, %v2165_v13 }
 0x664   :  { %v2180_v35 = vmul.f32 1.442695, %v2177_v54  ;;  %v3161_v27 = vpop.eup %3160  ;;  %v2986_v54 = vld [vmem:[%s4476_s2 + $0x18] sm:$0xff] }
 0x665   :  { %v4293_v37 = vadd.f32 1.0, %v3161_v27 }
 0x666   :  { %3162 = vpow2.f32 %v2180_v35 }
 0x667   :  { %v2152_v32 = vpop.f32.mrf.mxu2  ;;  %v2193_v31 = vand.u32 2147483647, %v4293_v37  ;;  %vm2189_vm10 = vweird.f32 %v4293_v37  ;;  %v2195_v19 = vand.u32 2147483648, %v4293_v37 }
 0x668   :  { %v2166_v53 = vadd.f32 %v2152_v32, %v3761_v23 }
 0x669   :  { %vm4332_vm13 = vcmp.eq.f32.partialorder %v2193_v31, 8.507059e+37 }
 0x66a   :  { %v2214_v47 = vsub.f32 0.0, %v2166_v53 }
 0x66c   :  { %v2216_v26 = vmul.f32 1.442695, %v2214_v47  ;;  %v3163_v50 = vpop.eup %3162 }
 0x66d   :  { %v4295_v30 = vadd.f32 1.0, %v3163_v50 }
 0x66e   :  { %3164 = vpow2.f32 %v2216_v26  ;;  %v2196_v26 = vor.u32 1.1754944e-38, %v2195_v19 }
 0x66f   :  { %v2154_v17 = vpop.f32.mrf.mxu2  ;;  %3166 = vrcp.f32 %v4293_v37  ;;  %v2210_v46 = vand.u32 2147483648, %v4295_v30  ;;  %vm2204_vm4 = vweird.f32 %v4295_v30  ;;  %v2208_v50 = vand.u32 2147483647, %v4295_v30 }
 0x670   :  { %v2167_v2 = vadd.f32 %v2154_v17, %v3763_v42  ;;  %3168 = vrcp.f32 %v4295_v30 }
 0x672   :  { %v2215_v6 = vsub.f32 0.0, %v2167_v2 }
 0x674   :  { %v3165_v25 = vpop.eup %3164  ;;  %v2218_v24 = vmul.f32 1.442695, %v2215_v6 }
 0x675   :  { %v4300_v23 = vadd.f32 1.0, %v3165_v25  ;;  %v4304_v28 = vpop.eup %3166 }
 0x676   :  { %3170 = vpow2.f32 %v2218_v24  ;;  %v4306_v55 = vpop.eup %3168  ;;  %v2185_v5 = vmul.f32 %v4304_v28, %v4293_v37  ;;  %vm2190_vm12 = vweird.f32 %v4304_v28 }
 0x677   :  { %3172 = vrcp.f32 %v4300_v23  ;;  %v2157_v18 = vpop.f32.mrf.mxu2  ;;  %v2200_v36 = vmul.f32 %v4306_v55, %v4295_v30  ;;  %v2233_v14 = vand.u32 2147483648, %v4300_v23  ;;  %vm2227_vm14 = vweird.f32 %v4300_v23  ;;  %vm4356_vm3 = vmor %vm2189_vm10, %vm2190_vm12 }
 0x678   :  { %v2168_v20 = vadd.f32 %v2157_v18, %v3769_v48  ;;  %v2162_v48 = vadd.f32 %v2142_v60, %v3749_v39  ;;  %v2186_v3 = vsub.f32 1.0, %v2185_v5  ;;  %v2231_v15 = vand.u32 2147483647, %v4300_v23 }
 0x679   :  { %v2201_v16 = vsub.f32 1.0, %v2200_v36  ;;  %vm2205_vm15 = vweird.f32 %v4306_v55  ;;  %v2234_v17 = vor.u32 1.1754944e-38, %v2233_v14  ;;  %vm2209_vm10 = vcmp.eq.f32.partialorder %v2208_v50, 8.507059e+37 }
 0x67a   :  { %v2252_v42 = vsub.f32 0.0, %v2168_v20  ;;  %v2172_v45 = vadd.f32 %v2162_v48, %v3960_v12  ;;  %v2187_v39 = vmul.f32 %v4304_v28, %v2186_v3  ;;  %vm4367_vm5 = vmor %vm2204_vm4, %vm2205_vm15  ;;  %vm2232_vm6 = vcmp.eq.f32.partialorder %v2231_v15, 8.507059e+37 }
 0x67c   :  { %v3171_v56 = vpop.eup %3170  ;;  %v2254_v41 = vmul.f32 1.442695, %v2252_v42  ;;  %v2188_v21 = vadd.f32 %v4304_v28, %v2187_v39 }
 0x67d   :  { %v3173_v33 = vpop.eup %3172  ;;  %v4312_v63 = vadd.f32 1.0, %v3171_v56 }
 0x67e   :  { %v2223_v40 = vmul.f32 %v3173_v33, %v4300_v23  ;;  %3174 = vpow2.f32 %v2254_v41  ;;  %vm2228_vm11 = vweird.f32 %v3173_v33  ;;  %v2192_v6 = vsel %vm4356_vm3, %v4304_v28, %v2188_v21 }
 0x67f   :  { %3176 = vrcp.f32 %v4312_v63  ;;  %v2159_v8 = vpop.f32.mrf.mxu2  ;;  %vm4344_vm1 = vmor %vm2227_vm14, %vm2228_vm11  ;;  %v2248_v35 = vand.u32 2147483648, %v4312_v63  ;;  %v2246_v47 = vand.u32 2147483647, %v4312_v63  ;;  %vm2242_vm7 = vweird.f32 %v4312_v63 }
 0x680   :  { %v2224_v59 = vsub.f32 1.0, %v2223_v40  ;;  %v2169_v51 = vadd.f32 %v2159_v8, %v3777_v29  ;;  %v2202_v29 = vmul.f32 %v4306_v55, %v2201_v16  ;;  %v2211_v28 = vor.u32 1.1754944e-38, %v2210_v46  ;;  %v2985_v46 = vld [vmem:[%s4476_s2 + $0x10] sm:$0xff] }
 0x681   :  { %v2249_v18 = vor.u32 1.1754944e-38, %v2248_v35  ;;  %vm2247_vm9 = vcmp.eq.f32.partialorder %v2246_v47, 8.507059e+37  ;;  %v2197_v5 = vsel %vm4332_vm13, %v2196_v26, %v2192_v6  ;;  %v2175_v40 = vmax.f32 %v4322_v0, 0.0 }
 0x682   :  { %v2225_v34 = vmul.f32 %v3173_v33, %v2224_v59  ;;  %v2253_v10 = vsub.f32 0.0, %v2169_v51  ;;  %v2203_v13 = vadd.f32 %v4306_v55, %v2202_v29 }
 0x684   :  { %v3175_v11 = vpop.eup %3174  ;;  %v2256_v1 = vmul.f32 1.442695, %v2253_v10  ;;  %v2226_v43 = vadd.f32 %v3173_v33, %v2225_v34  ;;  %v2207_v30 = vsel %vm4367_vm5, %v4306_v55, %v2203_v13  ;;  %v2984_v13 = vld [vmem:[%s4476_s2 + $0x8] sm:$0xff] }
 0x685   :  { %v3177_v38 = vpop.eup %3176  ;;  %v4328_v60 = vadd.f32 1.0, %v3175_v11  ;;  %v2212_v36 = vsel %vm2209_vm10, %v2211_v28, %v2207_v30 }
 0x686   :  { %v2238_v49 = vmul.f32 %v3177_v38, %v4312_v63  ;;  %3178 = vpow2.f32 %v2256_v1  ;;  %v2230_v32 = vsel %vm4344_vm1, %v3173_v33, %v2226_v43  ;;  %vm2243_vm2 = vweird.f32 %v3177_v38 }
 0x687   :  { %3180 = vrcp.f32 %v4328_v60  ;;  %v2235_v23 = vsel %vm2232_vm6, %v2234_v17, %v2230_v32  ;;  %vm2244_vm8 = vmor %vm2242_vm7, %vm2243_vm2  ;;  %v2174_v33 = vmax.f32 %v2172_v45, 0.0  ;;  %v2295_v3 = vmul.f32 %v2212_v36, %v2175_v40 }
 0x688   :  { %v2239_v4 = vsub.f32 1.0, %v2238_v49  ;;  %v2292_v55 = vmul.f32 %v2235_v23, %v4265_v7  ;;  %v2271_v31 = vand.u32 2147483648, %v4328_v60  ;;  %vm2265_vm12 = vweird.f32 %v4328_v60 }
 0x689   :  { %v2294_v8 = vmul.f32 %v2197_v5, %v2174_v33  ;;  %v2269_v7 = vand.u32 2147483647, %v4328_v60 }
 0x68a   :  { %v2240_v53 = vmul.f32 %v3177_v38, %v2239_v4  ;;  %v2272_v1 = vor.u32 1.1754944e-38, %v2271_v31  ;;  %v2983_v4 = vld [vmem:[%s4476_s2] sm:$0xff]  ;;  %s3272_s2 = smov [#allocation7]  }
 0x68b   :  { %v4382_v59 = vadd.f32 %v2294_v8, %v2292_v55  ;;  %vm2270_vm15 = vcmp.eq.f32.partialorder %v2269_v7, 8.507059e+37  ;;  %v2394_v7 = vld [vmem:[#allocation4] sm:$0xff]  ;;  %s2534_s10 = sshll.u32 %s3272_s2, 4  ;;  %s2535_s10 = int_to_ptr.vmem [resolvable:$true] %s2534_s10 }
 0x68c   :  { %v3179_v2 = vpop.eup %3178  ;;  %v2241_v37 = vadd.f32 %v3177_v38, %v2240_v53 }
 0x68d   :  { %v3181_v24 = vpop.eup %3180  ;;  %v2259_v20 = vadd.f32 1.0, %v3179_v2 }
 0x68e   :  { %v2245_v42 = vsel %vm2244_vm8, %v3177_v38, %v2241_v37  ;;  %v2261_v56 = vmul.f32 %v3181_v24, %v4328_v60  ;;  %vm2266_vm11 = vweird.f32 %v3181_v24 }
 0x68f   :  { %v2250_v41 = vsel %vm2247_vm9, %v2249_v18, %v2245_v42  ;;  %3182 = vrcp.f32 %v2259_v20  ;;  %vm2267_vm13 = vmor %vm2265_vm12, %vm2266_vm11  ;;  %v2286_v11 = vand.u32 2147483648, %v2259_v20  ;;  %v2284_v39 = vand.u32 2147483647, %v2259_v20 }
 0x690   :  { %v2262_v63 = vsub.f32 1.0, %v2261_v56  ;;  %v2293_v48 = vmul.f32 %v2250_v41, %v4267_v57  ;;  %3184 = vtanh.f32 %v4382_v59  ;;  %vm2280_vm1 = vweird.f32 %v2259_v20 }
 0x691   :  { %v2287_v29 = vor.u32 1.1754944e-38, %v2286_v11  ;;  %vm2285_vm3 = vcmp.eq.f32.partialorder %v2284_v39, 8.507059e+37 }
 0x692   :  { %v2263_v9 = vmul.f32 %v3181_v24, %v2262_v63  ;;  %v4384_v16 = vadd.f32 %v2295_v3, %v2293_v48 }
 0x694   :  { %v2264_v34 = vadd.f32 %v3181_v24, %v2263_v9  ;;  %3186 = vtanh.f32 %v4384_v16 }
 0x695   :  { %v3183_v51 = vpop.eup %3182 }
 0x696   :  { %v2276_v10 = vmul.f32 %v3183_v51, %v2259_v20  ;;  %v2268_v45 = vsel %vm2267_vm13, %v3181_v24, %v2264_v34  ;;  %vm2281_vm14 = vweird.f32 %v3183_v51  ;;  %v3185_v43 = vpop.eup %3184 }
 0x697   :  { %v2273_v19 = vsel %vm2270_vm15, %v2272_v1, %v2268_v45  ;;  %vm2282_vm2 = vmor %vm2280_vm1, %vm2281_vm14  ;;  %v4537_v45 = vld [vmem:[#allocation11_spill] sm:$0xff] }
 0x698   :  { %v2277_v57 = vsub.f32 1.0, %v2276_v10  ;;  %v2302_v14 = vmul.f32 %v3185_v43, %v2273_v19 }
 0x69a   :  { %v2278_v0 = vmul.f32 %v3183_v51, %v2277_v57  ;;  %v3187_v60 = vpop.eup %3186 }
 0x69c   :  { %v2279_v38 = vadd.f32 %v3183_v51, %v2278_v0 }
 0x69e   :  { %v2283_v49 = vsel %vm2282_vm2, %v3183_v51, %v2279_v38 }
 0x69f   :  { %v2288_v12 = vsel %vm2285_vm3, %v2287_v29, %v2283_v49 }
 0x6a0   :  { %v2303_v21 = vmul.f32 %v3187_v60, %v2288_v12 }
 0x6a2   :  { %v2308_v15 = vpack.c.bf16 %v2303_v21, %v2302_v14 }
 0x6a4   :  { %2364 = vmatpush.bf16.msrb.mxu3 %v2308_v15 }
 0x6a7   :  { %2911 = vmatmul.msk.bf16.vlgmr.msrb.gmra.mxu3 %vm79_vm0, %v2983_v4 }
 0x6b7   :  { %2912 = vmatmul.msk.bf16.gmra.mxu3 %vm79_vm0, %v2984_v13 }
 0x6c7   :  { %2913 = vmatmul.msk.bf16.gmra.mxu3 %vm79_vm0, %v2985_v46 }
 0x6d7   :  { %2914 = vmatmul.msk.bf16.gmra.mxu3 %vm79_vm0, %v2986_v54 }
 0x72a   :  { %v2366_v35 = vpop.f32.mrf.mxu3 }
 0x72b   :  { %v2386_v31 = vadd.f32 %v2366_v35, %v3918_v62 }
 0x72d   :  { %v2396_v62 = vadd.f32 %v2394_v7, %v2386_v31 }
 0x732   :  { %v4407_v32 = vpop.f32.mrf.mxu3 }
 0x73a   :  { %v2371_v53 = vpop.f32.mrf.mxu3 }
 0x73b   :  { %v2388_v47 = vadd.f32 %v2371_v53, %v3922_v52 }
 0x73d   :  { %v2400_v27 = vsub.f32 0.0, %v2388_v47 }
 0x73f   :  { %v2402_v26 = vmul.f32 1.442695, %v2400_v27 }
 0x741   :  { %3188 = vpow2.f32 %v2402_v26  ;;  %v2398_v26 = vmax.f32 %v2396_v62, 0.0 }
 0x742   :  { %v2373_v50 = vpop.f32.mrf.mxu3 }
 0x743   :  { %v2389_v17 = vadd.f32 %v2373_v50, %v3924_v61  ;;  %v4540_v50 = vld [vmem:[#allocation10_spill] sm:$0xff] }
 0x745   :  { %v2401_v2 = vsub.f32 0.0, %v2389_v17  ;;  %v2387_v17 = vadd.f32 %v4407_v32, %v4540_v50 }
 0x747   :  { %v2404_v6 = vmul.f32 1.442695, %v2401_v2  ;;  %v3189_v25 = vpop.eup %3188 }
 0x748   :  { %v4411_v24 = vadd.f32 1.0, %v3189_v25  ;;  %v2395_v25 = vld [vmem:[#allocation4 + $0x8] sm:$0xff] }
 0x749   :  { %3190 = vpow2.f32 %v2404_v6 }
 0x74a   :  { %v2376_v37 = vpop.f32.mrf.mxu3  ;;  %3192 = vrcp.f32 %v4411_v24  ;;  %v2419_v57 = vand.u32 2147483648, %v4411_v24  ;;  %vm2413_vm5 = vweird.f32 %v4411_v24  ;;  %v2417_v49 = vand.u32 2147483647, %v4411_v24 }
 0x74b   :  { %v2390_v30 = vadd.f32 %v2376_v37, %v3926_v44 }
 0x74c   :  { %v2420_v14 = vor.u32 1.1754944e-38, %v2419_v57  ;;  %vm2418_vm10 = vcmp.eq.f32.partialorder %v2417_v49, 8.507059e+37 }
 0x74d   :  { %v2438_v23 = vsub.f32 0.0, %v2390_v30 }
 0x74f   :  { %v2440_v18 = vmul.f32 1.442695, %v2438_v23  ;;  %v3191_v52 = vpop.eup %3190 }
 0x750   :  { %v4415_v28 = vadd.f32 1.0, %v3191_v52  ;;  %v4418_v42 = vpop.eup %3192 }
 0x751   :  { %3194 = vpow2.f32 %v2440_v18  ;;  %v2409_v44 = vmul.f32 %v4418_v42, %v4411_v24  ;;  %vm2414_vm0 = vweird.f32 %v4418_v42 }
 0x752   :  { %v2378_v20 = vpop.f32.mrf.mxu3  ;;  %3196 = vrcp.f32 %v4415_v28  ;;  %vm4439_vm6 = vmor %vm2413_vm5, %vm2414_vm0  ;;  %v2434_v23 = vand.u32 2147483648, %v4415_v28  ;;  %vm2428_vm13 = vweird.f32 %v4415_v28  ;;  %v2432_v32 = vand.u32 2147483647, %v4415_v28 }
 0x753   :  { %v2391_v61 = vadd.f32 %v2378_v20, %v3928_v22  ;;  %v2410_v63 = vsub.f32 1.0, %v2409_v44 }
 0x754   :  { %vm2433_vm3 = vcmp.eq.f32.partialorder %v2432_v32, 8.507059e+37 }
 0x755   :  { %v2439_v56 = vsub.f32 0.0, %v2391_v61  ;;  %v2411_v3 = vmul.f32 %v4418_v42, %v2410_v63 }
 0x757   :  { %v3195_v5 = vpop.eup %3194  ;;  %v2442_v41 = vmul.f32 1.442695, %v2439_v56  ;;  %v2412_v39 = vadd.f32 %v4418_v42, %v2411_v3 }
 0x758   :  { %v2444_v33 = vadd.f32 1.0, %v3195_v5  ;;  %v4424_v40 = vpop.eup %3196 }
 0x759   :  { %3198 = vpow2.f32 %v2442_v41  ;;  %v2424_v51 = vmul.f32 %v4424_v40, %v4415_v28  ;;  %v2416_v13 = vsel %vm4439_vm6, %v4418_v42, %v2412_v39  ;;  %vm2429_vm11 = vweird.f32 %v4424_v40 }
 0x75a   :  { %3200 = vrcp.f32 %v2444_v33  ;;  %v2381_v36 = vpop.f32.mrf.mxu3  ;;  %v2457_v38 = vand.u32 2147483648, %v2444_v33  ;;  %v2455_v29 = vand.u32 2147483647, %v2444_v33  ;;  %vm2451_vm7 = vweird.f32 %v2444_v33  ;;  %vm4459_vm14 = vmor %vm2428_vm13, %vm2429_vm11 }
 0x75b   :  { %v2392_v55 = vadd.f32 %v2381_v36, %v3930_v58  ;;  %v2425_v1 = vsub.f32 1.0, %v2424_v51  ;;  %v2421_v2 = vsel %vm2418_vm10, %v2420_v14, %v2416_v13  ;;  %v2397_v42 = vadd.f32 %v2395_v25, %v2387_v17 }
 0x75c   :  { %v2458_v54 = vor.u32 1.1754944e-38, %v2457_v38  ;;  %vm2456_vm9 = vcmp.eq.f32.partialorder %v2455_v29, 8.507059e+37  ;;  %v2518_v20 = vmul.f32 %v2421_v2, %v2398_v26 }
 0x75d   :  { %v2476_v22 = vsub.f32 0.0, %v2392_v55  ;;  %v2426_v46 = vmul.f32 %v4424_v40, %v2425_v1  ;;  %v2435_v55 = vor.u32 1.1754944e-38, %v2434_v23 }
 0x75f   :  { %v3199_v48 = vpop.eup %3198  ;;  %v2478_v8 = vmul.f32 1.442695, %v2476_v22  ;;  %v2427_v37 = vadd.f32 %v4424_v40, %v2426_v46 }
 0x760   :  { %v3201_v9 = vpop.eup %3200  ;;  %v4429_v34 = vadd.f32 1.0, %v3199_v48 }
 0x761   :  { %v2447_v10 = vmul.f32 %v3201_v9, %v2444_v33  ;;  %3202 = vpow2.f32 %v2478_v8  ;;  %vm2452_vm4 = vweird.f32 %v3201_v9  ;;  %v2431_v41 = vsel %vm4459_vm14, %v4424_v40, %v2427_v37 }
 0x762   :  { %3204 = vrcp.f32 %v4429_v34  ;;  %v2383_v58 = vpop.f32.mrf.mxu3  ;;  %vm2453_vm8 = vmor %vm2451_vm7, %vm2452_vm4  ;;  %v2472_v30 = vand.u32 2147483648, %v4429_v34  ;;  %v2470_v52 = vand.u32 2147483647, %v4429_v34  ;;  %vm2466_vm15 = vweird.f32 %v4429_v34 }
 0x763   :  { %v2448_v11 = vsub.f32 1.0, %v2447_v10  ;;  %v2393_v0 = vadd.f32 %v2383_v58, %v4537_v45  ;;  %v2436_v48 = vsel %vm2433_vm3, %v2435_v55, %v2431_v41 }
 0x764   :  { %v2473_v44 = vor.u32 1.1754944e-38, %v2472_v30  ;;  %vm2471_vm2 = vcmp.eq.f32.partialorder %v2470_v52, 8.507059e+37 }
 0x765   :  { %v2449_v19 = vmul.f32 %v3201_v9, %v2448_v11  ;;  %v2477_v43 = vsub.f32 0.0, %v2393_v0 }
 0x767   :  { %v3203_v60 = vpop.eup %3202  ;;  %v2450_v21 = vadd.f32 %v3201_v9, %v2449_v19  ;;  %v2480_v15 = vmul.f32 1.442695, %v2477_v43 }
 0x768   :  { %v3205_v4 = vpop.eup %3204  ;;  %v2482_v35 = vadd.f32 1.0, %v3203_v60 }
 0x769   :  { %v2454_v53 = vsel %vm2453_vm8, %v3201_v9, %v2450_v21  ;;  %v2462_v47 = vmul.f32 %v3205_v4, %v4429_v34  ;;  %3206 = vpow2.f32 %v2480_v15  ;;  %vm2467_vm12 = vweird.f32 %v3205_v4 }
 0x76a   :  { %v2459_v27 = vsel %vm2456_vm9, %v2458_v54, %v2454_v53  ;;  %3208 = vrcp.f32 %v2482_v35  ;;  %vm2468_vm1 = vmor %vm2466_vm15, %vm2467_vm12  ;;  %v2399_v9 = vmax.f32 %v2397_v42, 0.0  ;;  %v2495_v51 = vand.u32 2147483648, %v2482_v35 }
 0x76b   :  { %v2463_v6 = vsub.f32 1.0, %v2462_v47  ;;  %v2516_v24 = vmul.f32 %v2459_v27, %v4382_v59  ;;  %v2493_v40 = vand.u32 2147483647, %v2482_v35  ;;  %vm2489_vm4 = vweird.f32 %v2482_v35 }
 0x76c   :  { %v2519_v10 = vmul.f32 %v2436_v48, %v2399_v9  ;;  %v2496_v7 = vor.u32 1.1754944e-38, %v2495_v51 }
 0x76d   :  { %v2464_v18 = vmul.f32 %v3205_v4, %v2463_v6  ;;  %v2520_v36 = vadd.f32 %v2518_v20, %v2516_v24  ;;  %vm2494_vm6 = vcmp.eq.f32.partialorder %v2493_v40, 8.507059e+37 }
 0x76f   :  { %v3207_v61 = vpop.eup %3206  ;;  %v2465_v59 = vadd.f32 %v3205_v4, %v2464_v18 }
 0x770   :  { %v3209_v5 = vpop.eup %3208  ;;  %v2483_v33 = vadd.f32 1.0, %v3207_v61 }
 0x771   :  { %v2469_v28 = vsel %vm2468_vm1, %v3205_v4, %v2465_v59  ;;  %v2485_v63 = vmul.f32 %v3209_v5, %v2482_v35  ;;  %vm2490_vm0 = vweird.f32 %v3209_v5 }
 0x772   :  { %v2474_v22 = vsel %vm2471_vm2, %v2473_v44, %v2469_v28  ;;  %3210 = vrcp.f32 %v2483_v33  ;;  %vm2491_vm5 = vmor %vm2489_vm4, %vm2490_vm0  ;;  %v2508_v29 = vand.u32 2147483647, %v2483_v33  ;;  %vm2504_vm8 = vweird.f32 %v2483_v33 }
 0x773   :  { %v2486_v8 = vsub.f32 1.0, %v2485_v63  ;;  %v2517_v3 = vmul.f32 %v2474_v22, %v4384_v16  ;;  %3212 = vtanh.f32 %v2520_v36  ;;  %v2510_v16 = vand.u32 2147483648, %v2483_v33 }
 0x774   :  { %vm2509_vm10 = vcmp.eq.f32.partialorder %v2508_v29, 8.507059e+37 }
 0x775   :  { %v2487_v34 = vmul.f32 %v3209_v5, %v2486_v8  ;;  %v2521_v57 = vadd.f32 %v2519_v10, %v2517_v3  ;;  %v2511_v62 = vor.u32 1.1754944e-38, %v2510_v16 }
 0x777   :  { %v2488_v31 = vadd.f32 %v3209_v5, %v2487_v34  ;;  %3214 = vtanh.f32 %v2521_v57 }
 0x778   :  { %v3211_v58 = vpop.eup %3210 }
 0x779   :  { %v2500_v11 = vmul.f32 %v3211_v58, %v2483_v33  ;;  %v2492_v45 = vsel %vm2491_vm5, %v3209_v5, %v2488_v31  ;;  %v3213_v0 = vpop.eup %3212  ;;  %vm2505_vm7 = vweird.f32 %v3211_v58 }
 0x77a   :  { %v2497_v39 = vsel %vm2494_vm6, %v2496_v7, %v2492_v45  ;;  %vm2506_vm9 = vmor %vm2504_vm8, %vm2505_vm7 }
 0x77b   :  { %v2501_v1 = vsub.f32 1.0, %v2500_v11  ;;  %v2526_v38 = vmul.f32 %v3213_v0, %v2497_v39 }
 0x77d   :  { %v2502_v19 = vmul.f32 %v3211_v58, %v2501_v1  ;;  %2528 = vst [vmem:[#allocation7] sm:$0xff] %v2526_v38  ;;  %v3215_v60 = vpop.eup %3214 }
 0x77f   :  { %v2503_v43 = vadd.f32 %v3211_v58, %v2502_v19 }
 0x781   :  { %v2507_v49 = vsel %vm2506_vm9, %v3211_v58, %v2503_v43 }
 0x782   :  { %v2512_v12 = vsel %vm2509_vm10, %v2511_v62, %v2507_v49 }
 0x783   :  { %v2527_v14 = vmul.f32 %v3215_v60, %v2512_v12 }
 0x785   :  { %2529 = vst [vmem:[#allocation7 + $0x8] sm:$0xff] %v2527_v14 }
 0x786   :  { %2542 = dma.vmem_to_hbm [thread:$0]  %s2535_s10, 256, %s2537_s13, [#allocation6], %s3269_s20, %s3269_s20, %s3270_s21  }
 0x787   :  { %3266 = dma.done.wait [#allocation6], 256  }
 0x788   :  { %3267 = vsyncadd [#allocation6], 4294967040 }
 0x789   :  { %2547 = vsyncpa [#allocation5], 1 }
 0x78a   :  { %2548 = vsyncpa [#allocation6], 1 }

</bundles_post_ra>
